<compile_context>
chip_gen: v7x
topology: tpu7x:2x2x1
jax: 0.10.0
libtpu: 0.0.40
codegen_flags: <defaults>
</compile_context>

<pallas_src>
import functools

import jax
import jax.numpy as jnp
from jax import lax
from jax.experimental import pallas as pl
from jax.experimental.pallas import tpu as pltpu


_DIMNUMS = ("CNDHW", "OIDHW", "CNDHW")   # channels-first internal conv layout


# ---------------------------------------------------------------- Pallas kernels

def _conv_bn_elu_kernel(w_ref, a_ref, g_ref, b_ref, o_ref):
    """Fused Conv3d('same') -> BatchNorm3d (batch stats) -> ELU.

    w_ref: (cg, K) bf16   conv weight rows for this channel group
    a_ref: (K, M)  bf16   im2col of the input (K on sublanes, M on lanes)
    g_ref: (cg, 1) f32    BN gamma
    b_ref: (cg, 1) f32    BN beta
    o_ref: (cg, M) bf16   output (lane-dense for layer1; the tiny layer2/3
                          widths produce partial stores, accepted per review)
    """
    z = jnp.dot(w_ref[...], a_ref[...], preferred_element_type=jnp.float32)
    # BatchNorm3d training-mode statistics: per-channel mean / biased variance
    # over all N*D*H*W positions (each channel row lives fully in this block).
    mean = jnp.mean(z, axis=-1, keepdims=True)                     # (cg, 1)
    var = jnp.mean((z - mean) ** 2, axis=-1, keepdims=True)        # (cg, 1)
    scale = g_ref[...] * lax.rsqrt(var + 1e-5)
    bias = b_ref[...] - mean * scale
    y = z * scale + bias
    # ELU(alpha=1), f32 in-register, bf16 only at the store.
    o_ref[...] = jnp.where(y > 0.0, y,
                           jnp.exp(jnp.minimum(y, 0.0)) - 1.0).astype(o_ref.dtype)


def _attn_apply_kernel(y_ref, ca_ref, p_ref, w_ref, o_ref, *, n, dhw):
    """Fused spatial-attention conv + sigmoid + combined (ca ⊗ sa) scaling.

    y_ref : (C, M)  bf16  post-conv/BN/ELU activations
    ca_ref: (C, N)  f32   channel-attention scales
    p_ref : (K2, M) bf16  im2col of [channel-mean, channel-max] of (ca-scaled y)
    w_ref : (K2, 1) f32   spatial-attention conv weight
    o_ref : (C, M)  bf16  = y * ca * sigmoid(SA conv)
    """
    c, m = y_ref.shape
    # SA conv (2 -> 1 channel) as a VPU multiply + sublane reduce, f32 accumulate.
    s = jnp.sum(p_ref[...].astype(jnp.float32) * w_ref[...],
                axis=0, keepdims=True)                              # (1, M)
    sa = 1.0 / (1.0 + jnp.exp(-s))                                  # exact sigmoid
    # Expand ca (C, N) -> (C, M): sample i owns lanes [i*dhw, (i+1)*dhw).
    lane = lax.broadcasted_iota(jnp.int32, (c, m), 1)
    ca_full = jnp.broadcast_to(ca_ref[:, 0:1], (c, m))
    for i in range(1, n):
        ca_i = jnp.broadcast_to(ca_ref[:, i:i + 1], (c, m))
        ca_full = jnp.where(lane >= i * dhw, ca_i, ca_full)
    y = y_ref[...].astype(jnp.float32)
    o_ref[...] = (y * ca_full * sa).astype(o_ref.dtype)


# ---------------------------------------------------------------- helpers

@functools.lru_cache(maxsize=None)
def _num_tensorcores_per_chip():
    # v7x exposes 2 TensorCores per chip; v5e/v6e have 1 — a channel-group grid
    # split only pays off when there is a second core to feed.
    try:
        kind = jax.devices()[0].device_kind.lower()
    except Exception:
        return 1
    return 2 if "v7" in kind else 1


def _channel_groups(cout):
    if _num_tensorcores_per_chip() >= 2 and cout >= 16 and cout % 2 == 0:
        return cout // 2          # grid=(2,) "parallel": both TCs get work
    return cout                   # grid=(1,): no serial-loop overhead on 1-TC chips


def _conv_patches(x, k, dtype=jnp.bfloat16):
    """(C, N, D, H, W) -> (C*k^3, N*D*H*W) 'same' im2col, K ordered (c,kd,kh,kw).

    Single XLA op (conv_general_dilated_patches) instead of 27 slice+stack copies.
    """
    C, N, D, H, W = x.shape
    p = k // 2
    a = lax.conv_general_dilated_patches(
        x.astype(dtype), (k, k, k), (1, 1, 1), [(p, p)] * 3,
        dimension_numbers=_DIMNUMS)
    return a.reshape(C * k ** 3, N * D * H * W)


# ---------------------------------------------------------------- kernel wrappers

def conv3d_bn_elu(x, w, gamma, beta, k):
    """x: (Cin, N, D, H, W); w: (Cout, Cin, k, k, k) -> (Cout, N, D, H, W) bf16."""
    Cin, N, D, H, W = x.shape
    Cout = w.shape[0]
    M = N * D * H * W
    K = Cin * k ** 3
    a = _conv_patches(x, k)                                      # (K, M) bf16
    wm = w.reshape(Cout, K).astype(jnp.bfloat16)                 # (Cout, K) bf16
    cg = _channel_groups(Cout)
    y = pl.pallas_call(
        _conv_bn_elu_kernel,
        out_shape=jax.ShapeDtypeStruct((Cout, M), jnp.bfloat16),
        grid=(Cout // cg,),
        in_specs=[
            pl.BlockSpec((cg, K), lambda i: (i, 0)),
            pl.BlockSpec((K, M), lambda i: (0, 0)),
            pl.BlockSpec((cg, 1), lambda i: (i, 0)),
            pl.BlockSpec((cg, 1), lambda i: (i, 0)),
        ],
        out_specs=pl.BlockSpec((cg, M), lambda i: (i, 0)),
        compiler_params=pltpu.CompilerParams(
            dimension_semantics=("parallel",)),
    )(wm, a,
      gamma.reshape(Cout, 1).astype(jnp.float32),
      beta.reshape(Cout, 1).astype(jnp.float32))
    return y.reshape(Cout, N, D, H, W)


def channel_attention(y, w1, w2):
    """y: (C, N, D, H, W) -> (C, N). Tiny pools + 1x1 FCs kept in XLA (review)."""
    avg = jnp.mean(y.astype(jnp.float32), axis=(2, 3, 4))        # (C, N)
    mx = jnp.max(y, axis=(2, 3, 4)).astype(jnp.float32)          # (C, N)

    def fc(v):
        return w2 @ jnp.maximum(w1 @ v, 0.0)

    return jax.nn.sigmoid(fc(avg) + fc(mx))                      # (C, N)


def cbam_apply(y, ca, sa_w, ks):
    """Fused CBAM application: returns y * ca * sigmoid(SAconv) in ONE Pallas call.

    y: (C, N, D, H, W) bf16; ca: (C, N) f32; sa_w: (1, 2, ks, ks, ks).
    """
    C, N, D, H, W = y.shape
    M = N * D * H * W
    dhw = D * H * W
    # Channel-mean / channel-max of the ca-scaled activations; the multiply is
    # fused by XLA into the two reductions (never materialized at (C, M)).
    yw = y.astype(jnp.float32) * ca[:, :, None, None, None]
    sa_in = jnp.stack([jnp.mean(yw, axis=0), jnp.max(yw, axis=0)], axis=0)
    K2 = 2 * ks ** 3
    patches = _conv_patches(sa_in, ks)                           # (K2, M) bf16
    wv = sa_w.reshape(K2, 1).astype(jnp.float32)
    out = pl.pallas_call(
        functools.partial(_attn_apply_kernel, n=N, dhw=dhw),
        out_shape=jax.ShapeDtypeStruct((C, M), jnp.bfloat16),
        grid=(1,),
        in_specs=[
            pl.BlockSpec((C, M), lambda i: (0, 0)),
            pl.BlockSpec((C, N), lambda i: (0, 0)),
            pl.BlockSpec((K2, M), lambda i: (0, 0)),
            pl.BlockSpec((K2, 1), lambda i: (0, 0)),
        ],
        out_specs=pl.BlockSpec((C, M), lambda i: (0, 0)),
    )(y.reshape(C, M), ca, patches, wv)
    return out.reshape(C, N, D, H, W)


def maxpool3d(y, k):
    """MaxPool3d(kernel_size=k, stride=(1,1,2), padding=0) on (C, N, D, H, W)."""
    # TODO(synk): windowed max stays in XLA (lax.reduce_window); no clean
    # flattened-M Pallas formulation and the arrays are tiny.
    return lax.reduce_window(
        y, jnp.array(-jnp.inf, y.dtype), lax.max,
        window_dimensions=(1, 1, k, k, k),
        window_strides=(1, 1, 1, 1, 2),
        padding='VALID')


def final_conv_elu(x, w, b, k):
    """Final Conv3d('same') + bias + ELU in plain XLA (M = 8 output: a Pallas
    launch there is pure dispatch overhead — explicit perf-review item)."""
    p = k // 2
    z = lax.conv_general_dilated(
        x.astype(jnp.float32), w.astype(jnp.float32), (1, 1, 1), [(p, p)] * 3,
        dimension_numbers=_DIMNUMS)
    z = z + b.astype(jnp.float32)[:, None, None, None, None]
    return jax.nn.elu(z)


# ---------------------------------------------------------------- model

def basic_block(x, params, k, spatial_size):
    conv_w, conv_b, gamma, beta, ca_w1, ca_w2, sa_w = params
    # NOTE: conv_b is not applied — with training-mode BatchNorm (batch stats)
    # the bias is exactly absorbed by the mean subtraction (exact no-op).
    del conv_b
    y = conv3d_bn_elu(x, conv_w, gamma, beta, k)         # (Cout, N, D, H, W) bf16
    ca = channel_attention(y, ca_w1, ca_w2)              # (Cout, N)
    y = cbam_apply(y, ca, sa_w, spatial_size)            # fused ca ⊗ sa scaling
    return maxpool3d(y, k)


def parallel_model(x_ncdhw, params, k, spatial_size):
    # NCDHW -> internal channels-first layout (C, N, D, H, W)
    y = jnp.transpose(x_ncdhw, (1, 0, 2, 3, 4))
    y = basic_block(y, params['layer1'], k, spatial_size)
    y = basic_block(y, params['layer2'], k, spatial_size)
    y = basic_block(y, params['layer3'], k, spatial_size)
    y = final_conv_elu(y, params['conv_w'], params['conv_b'], k)
    return jnp.transpose(y, (1, 0, 2, 3, 4))             # back to NCDHW (f32)


# ---------------------------------------------------------------- params / main

def _nrm(key, shape, scale=0.1):
    return scale * jax.random.normal(key, shape, jnp.float32)


def make_block_params(key, cin, cout, k, ratio, spatial_size):
    ks = jax.random.split(key, 7)
    conv_w = _nrm(ks[0], (cout, cin, k, k, k))
    conv_b = _nrm(ks[1], (cout,))
    gamma = 1.0 + 0.1 * jax.random.normal(ks[2], (cout,), jnp.float32)
    beta = _nrm(ks[3], (cout,))
    ca_w1 = _nrm(ks[4], (cout // ratio, cout))       # Conv3d(C, C//r, 1), no bias
    ca_w2 = _nrm(ks[5], (cout, cout // ratio))       # Conv3d(C//r, C, 1), no bias
    sa_w = _nrm(ks[6], (1, 2, spatial_size, spatial_size, spatial_size))
    return (conv_w, conv_b, gamma, beta, ca_w1, ca_w2, sa_w)


if __name__ == "__main__":
    kernel_size, layer_size, ratio, spatial_size = 3, 2, 2, 3
    c1, c2, c3 = layer_size * 2, layer_size * 4, layer_size * 8  # 4, 8, 16

    key = jax.random.PRNGKey(0)
    k_x, k_p = jax.random.split(key)
    N, Cin, D, H, W = 2, 1, 8, 8, 16
    x = jax.random.normal(k_x, (N, Cin, D, H, W), jnp.float32)

    kp = jax.random.split(k_p, 5)
    params = {
        'layer1': make_block_params(kp[0], 1, c1, kernel_size, ratio, spatial_size),
        'layer2': make_block_params(kp[1], c1, c2, kernel_size, ratio, spatial_size),
        'layer3': make_block_params(kp[2], c2, c3, kernel_size, ratio, spatial_size),
        'conv_w': _nrm(kp[3], (c3, c3, kernel_size, kernel_size, kernel_size)),
        'conv_b': _nrm(kp[4], (c3,)),
    }

    fwd = jax.jit(functools.partial(parallel_model,
                                    k=kernel_size, spatial_size=spatial_size))
    out = fwd(x, params)
    jax.block_until_ready(out)
    assert out.shape == (N, c3, 2, 2, 1), out.shape
    print("KERNEL_OK")
</pallas_src>

<mosaic_0001>
module attributes {stable_mosaic.version = 11 : i64} {
  func.func @_conv_bn_elu_kernel(%arg0: i32, %arg1: memref<4x27xbf16, #tpu.memory_space<vmem>>, %arg2: memref<27x2048xbf16, #tpu.memory_space<vmem>>, %arg3: memref<4x1xf32, #tpu.memory_space<vmem>>, %arg4: memref<4x1xf32, #tpu.memory_space<vmem>>, %arg5: memref<4x2048xbf16, #tpu.memory_space<vmem>>) attributes {dimension_semantics = [#tpu.dimension_semantics<parallel>], iteration_bounds = array<i64: 1>, scalar_prefetch = 0 : i64, scratch_operands = 0 : i64, tpu.core_type = #tpu.core_type<tc>, window_params = [{transform_indices = @transform_0, window_bounds = array<i64: 4, 27>}, {pipeline_mode = #tpu.pipeline_mode<synchronous>, transform_indices = @transform_1, window_bounds = array<i64: 27, 2048>}, {transform_indices = @transform_2, window_bounds = array<i64: 4, 1>}, {transform_indices = @transform_3, window_bounds = array<i64: 4, 1>}, {transform_indices = @transform_4, window_bounds = array<i64: 4, 2048>}]} {
    %c0 = arith.constant 0 : index
    %c0_0 = arith.constant 0 : index
    %0 = vector.load %arg1[%c0, %c0_0] : memref<4x27xbf16, #tpu.memory_space<vmem>>, vector<4x27xbf16>
    %c0_1 = arith.constant 0 : index
    %c0_2 = arith.constant 0 : index
    %1 = vector.load %arg2[%c0_1, %c0_2] : memref<27x2048xbf16, #tpu.memory_space<vmem>>, vector<27x2048xbf16>
    %cst = arith.constant dense<0.000000e+00> : vector<4x2048xf32>
    %2 = tpu.matmul %0, %1, %cst {dimension_numbers = #tpu.dot_dimension_numbers<[1], [0], [0], [1], [0, 0, 1, 1], [], []>} : vector<4x27xbf16>, vector<27x2048xbf16>, vector<4x2048xf32> -> vector<4x2048xf32>
    %cst_3 = arith.constant dense<0.000000e+00> : vector<4xf32>
    %3 = vector.multi_reduction <add>, %2, %cst_3 [1] : vector<4x2048xf32> to vector<4xf32>
    %4 = vector.shape_cast %3 : vector<4xf32> to vector<4x1xf32>
    %cst_4 = arith.constant 2.048000e+03 : f32
    %5 = vector.broadcast %cst_4 : f32 to vector<4x1xf32>
    %6 = arith.divf %4, %5 : vector<4x1xf32>
    %7 = vector.broadcast %6 : vector<4x1xf32> to vector<4x2048xf32>
    %8 = arith.subf %2, %7 : vector<4x2048xf32>
    %9 = arith.mulf %8, %8 : vector<4x2048xf32>
    %cst_5 = arith.constant dense<0.000000e+00> : vector<4xf32>
    %10 = vector.multi_reduction <add>, %9, %cst_5 [1] : vector<4x2048xf32> to vector<4xf32>
    %11 = vector.shape_cast %10 : vector<4xf32> to vector<4x1xf32>
    %cst_6 = arith.constant 2.048000e+03 : f32
    %12 = vector.broadcast %cst_6 : f32 to vector<4x1xf32>
    %13 = arith.divf %11, %12 : vector<4x1xf32>
    %c0_7 = arith.constant 0 : index
    %c0_8 = arith.constant 0 : index
    %14 = vector.load %arg3[%c0_7, %c0_8] : memref<4x1xf32, #tpu.memory_space<vmem>>, vector<4x1xf32>
    %cst_9 = arith.constant 9.99999974E-6 : f32
    %15 = vector.broadcast %cst_9 : f32 to vector<4x1xf32>
    %16 = arith.addf %13, %15 : vector<4x1xf32>
    %17 = math.rsqrt %16 : vector<4x1xf32>
    %18 = arith.mulf %14, %17 : vector<4x1xf32>
    %c0_10 = arith.constant 0 : index
    %c0_11 = arith.constant 0 : index
    %19 = vector.load %arg4[%c0_10, %c0_11] : memref<4x1xf32, #tpu.memory_space<vmem>>, vector<4x1xf32>
    %20 = arith.mulf %6, %18 : vector<4x1xf32>
    %21 = arith.subf %19, %20 : vector<4x1xf32>
    %22 = vector.broadcast %18 : vector<4x1xf32> to vector<4x2048xf32>
    %23 = arith.mulf %2, %22 : vector<4x2048xf32>
    %24 = vector.broadcast %21 : vector<4x1xf32> to vector<4x2048xf32>
    %25 = arith.addf %23, %24 : vector<4x2048xf32>
    %cst_12 = arith.constant 0.000000e+00 : f32
    %26 = vector.broadcast %cst_12 : f32 to vector<4x2048xf32>
    %27 = arith.cmpf ogt, %25, %26 : vector<4x2048xf32>
    %cst_13 = arith.constant 0.000000e+00 : f32
    %28 = vector.broadcast %cst_13 : f32 to vector<4x2048xf32>
    %29 = arith.minimumf %25, %28 : vector<4x2048xf32>
    %30 = math.exp %29 : vector<4x2048xf32>
    %cst_14 = arith.constant 1.000000e+00 : f32
    %31 = vector.broadcast %cst_14 : f32 to vector<4x2048xf32>
    %32 = arith.subf %30, %31 : vector<4x2048xf32>
    %33 = arith.select %27, %25, %32 : vector<4x2048xi1>, vector<4x2048xf32>
    %34 = arith.truncf %33 : vector<4x2048xf32> to vector<4x2048xbf16>
    %c0_15 = arith.constant 0 : index
    %c0_16 = arith.constant 0 : index
    %35 = vector.load %arg5[%c0_15, %c0_16] : memref<4x2048xbf16, #tpu.memory_space<vmem>>, vector<4x2048xbf16>
    tpu.vector_store %arg5[%c0_15, %c0_16], %34 {strides = array<i32>} : memref<4x2048xbf16, #tpu.memory_space<vmem>>, vector<4x2048xbf16>,
    return
  }
  func.func @transform_0(%arg0: i32) -> (i32, i32) {
    %c0_i32 = arith.constant 0 : i32
    %c0_i32_0 = arith.constant 0 : i32
    return %arg0, %c0_i32 : i32, i32
  }
  func.func @transform_1(%arg0: i32) -> (i32, i32) {
    %c0_i32 = arith.constant 0 : i32
    %c0_i32_0 = arith.constant 0 : i32
    %c0_i32_1 = arith.constant 0 : i32
    return %c0_i32, %c0_i32_0 : i32, i32
  }
  func.func @transform_2(%arg0: i32) -> (i32, i32) {
    %c0_i32 = arith.constant 0 : i32
    %c0_i32_0 = arith.constant 0 : i32
    return %arg0, %c0_i32 : i32, i32
  }
  func.func @transform_3(%arg0: i32) -> (i32, i32) {
    %c0_i32 = arith.constant 0 : i32
    %c0_i32_0 = arith.constant 0 : i32
    return %arg0, %c0_i32 : i32, i32
  }
  func.func @transform_4(%arg0: i32) -> (i32, i32) {
    %c0_i32 = arith.constant 0 : i32
    %c0_i32_0 = arith.constant 0 : i32
    return %arg0, %c0_i32 : i32, i32
  }
}

module attributes {stable_mosaic.version = 11 : i64} {
  func.func @_attn_apply_kernel(%arg0: i32, %arg1: memref<4x2048xbf16, #tpu.memory_space<vmem>>, %arg2: memref<4x2xf32, #tpu.memory_space<vmem>>, %arg3: memref<54x2048xbf16, #tpu.memory_space<vmem>>, %arg4: memref<54x1xf32, #tpu.memory_space<vmem>>, %arg5: memref<4x2048xbf16, #tpu.memory_space<vmem>>) attributes {dimension_semantics = [#tpu.dimension_semantics<arbitrary>], iteration_bounds = array<i64: 1>, scalar_prefetch = 0 : i64, scratch_operands = 0 : i64, tpu.core_type = #tpu.core_type<tc>, window_params = [{pipeline_mode = #tpu.pipeline_mode<synchronous>, transform_indices = @transform_0, window_bounds = array<i64: 4, 2048>}, {pipeline_mode = #tpu.pipeline_mode<synchronous>, transform_indices = @transform_1, window_bounds = array<i64: 4, 2>}, {pipeline_mode = #tpu.pipeline_mode<synchronous>, transform_indices = @transform_2, window_bounds = array<i64: 54, 2048>}, {pipeline_mode = #tpu.pipeline_mode<synchronous>, transform_indices = @transform_3, window_bounds = array<i64: 54, 1>}, {pipeline_mode = #tpu.pipeline_mode<synchronous>, transform_indices = @transform_4, window_bounds = array<i64: 4, 2048>}]} {
    %c0 = arith.constant 0 : index
    %c0_0 = arith.constant 0 : index
    %0 = vector.load %arg3[%c0, %c0_0] : memref<54x2048xbf16, #tpu.memory_space<vmem>>, vector<54x2048xbf16>
    %1 = arith.extf %0 : vector<54x2048xbf16> to vector<54x2048xf32>
    %c0_1 = arith.constant 0 : index
    %c0_2 = arith.constant 0 : index
    %2 = vector.load %arg4[%c0_1, %c0_2] : memref<54x1xf32, #tpu.memory_space<vmem>>, vector<54x1xf32>
    %3 = vector.broadcast %2 : vector<54x1xf32> to vector<54x2048xf32>
    %4 = arith.mulf %1, %3 : vector<54x2048xf32>
    %cst = arith.constant dense<0.000000e+00> : vector<2048xf32>
    %5 = vector.multi_reduction <add>, %4, %cst [0] : vector<54x2048xf32> to vector<2048xf32>
    %6 = vector.shape_cast %5 : vector<2048xf32> to vector<1x2048xf32>
    %cst_3 = arith.constant 0.000000e+00 : f32
    %7 = vector.broadcast %cst_3 : f32 to vector<1x2048xf32>
    %8 = arith.subf %7, %6 : vector<1x2048xf32>
    %9 = math.exp %8 : vector<1x2048xf32>
    %cst_4 = arith.constant 1.000000e+00 : f32
    %10 = vector.broadcast %cst_4 : f32 to vector<1x2048xf32>
    %11 = arith.addf %10, %9 : vector<1x2048xf32>
    %cst_5 = arith.constant 1.000000e+00 : f32
    %12 = vector.broadcast %cst_5 : f32 to vector<1x2048xf32>
    %13 = arith.divf %12, %11 : vector<1x2048xf32>
    %14 = tpu.iota {dimensions = array<i32: 1>} : vector<4x2048xi32>
    %c0_6 = arith.constant 0 : index
    %c0_7 = arith.constant 0 : index
    %15 = vector.load %arg2[%c0_6, %c0_7] : memref<4x2xf32, #tpu.memory_space<vmem>>, vector<4x1xf32>
    %16 = vector.shape_cast %15 : vector<4x1xf32> to vector<4x1xf32>
    %17 = vector.broadcast %16 : vector<4x1xf32> to vector<4x2048xf32>
    %c0_8 = arith.constant 0 : index
    %c1 = arith.constant 1 : index
    %18 = vector.load %arg2[%c0_8, %c1] : memref<4x2xf32, #tpu.memory_space<vmem>>, vector<4x1xf32>
    %19 = vector.shape_cast %18 : vector<4x1xf32> to vector<4x1xf32>
    %20 = vector.broadcast %19 : vector<4x1xf32> to vector<4x2048xf32>
    %c1024_i32 = arith.constant 1024 : i32
    %21 = vector.broadcast %c1024_i32 : i32 to vector<4x2048xi32>
    %22 = arith.cmpi sge, %14, %21 : vector<4x2048xi32>
    %23 = arith.select %22, %20, %17 : vector<4x2048xi1>, vector<4x2048xf32>
    %c0_9 = arith.constant 0 : index
    %c0_10 = arith.constant 0 : index
    %24 = vector.load %arg1[%c0_9, %c0_10] : memref<4x2048xbf16, #tpu.memory_space<vmem>>, vector<4x2048xbf16>
    %25 = arith.extf %24 : vector<4x2048xbf16> to vector<4x2048xf32>
    %26 = arith.mulf %25, %23 : vector<4x2048xf32>
    %27 = vector.broadcast %13 : vector<1x2048xf32> to vector<4x2048xf32>
    %28 = arith.mulf %26, %27 : vector<4x2048xf32>
    %29 = arith.truncf %28 : vector<4x2048xf32> to vector<4x2048xbf16>
    %c0_11 = arith.constant 0 : index
    %c0_12 = arith.constant 0 : index
    %30 = vector.load %arg5[%c0_11, %c0_12] : memref<4x2048xbf16, #tpu.memory_space<vmem>>, vector<4x2048xbf16>
    tpu.vector_store %arg5[%c0_11, %c0_12], %29 {strides = array<i32>} : memref<4x2048xbf16, #tpu.memory_space<vmem>>, vector<4x2048xbf16>,
    return
  }
  func.func @transform_0(%arg0: i32) -> (i32, i32) {
    %c0_i32 = arith.constant 0 : i32
    %c0_i32_0 = arith.constant 0 : i32
    %c0_i32_1 = arith.constant 0 : i32
    return %c0_i32, %c0_i32_0 : i32, i32
  }
  func.func @transform_1(%arg0: i32) -> (i32, i32) {
    %c0_i32 = arith.constant 0 : i32
    %c0_i32_0 = arith.constant 0 : i32
    %c0_i32_1 = arith.constant 0 : i32
    return %c0_i32, %c0_i32_0 : i32, i32
  }
  func.func @transform_2(%arg0: i32) -> (i32, i32) {
    %c0_i32 = arith.constant 0 : i32
    %c0_i32_0 = arith.constant 0 : i32
    %c0_i32_1 = arith.constant 0 : i32
    return %c0_i32, %c0_i32_0 : i32, i32
  }
  func.func @transform_3(%arg0: i32) -> (i32, i32) {
    %c0_i32 = arith.constant 0 : i32
    %c0_i32_0 = arith.constant 0 : i32
    %c0_i32_1 = arith.constant 0 : i32
    return %c0_i32, %c0_i32_0 : i32, i32
  }
  func.func @transform_4(%arg0: i32) -> (i32, i32) {
    %c0_i32 = arith.constant 0 : i32
    %c0_i32_0 = arith.constant 0 : i32
    %c0_i32_1 = arith.constant 0 : i32
    return %c0_i32, %c0_i32_0 : i32, i32
  }
}

module attributes {stable_mosaic.version = 11 : i64} {
  func.func @_conv_bn_elu_kernel(%arg0: i32, %arg1: memref<8x108xbf16, #tpu.memory_space<vmem>>, %arg2: memref<108x504xbf16, #tpu.memory_space<vmem>>, %arg3: memref<8x1xf32, #tpu.memory_space<vmem>>, %arg4: memref<8x1xf32, #tpu.memory_space<vmem>>, %arg5: memref<8x504xbf16, #tpu.memory_space<vmem>>) attributes {dimension_semantics = [#tpu.dimension_semantics<parallel>], iteration_bounds = array<i64: 1>, scalar_prefetch = 0 : i64, scratch_operands = 0 : i64, tpu.core_type = #tpu.core_type<tc>, window_params = [{transform_indices = @transform_0, window_bounds = array<i64: 8, 108>}, {pipeline_mode = #tpu.pipeline_mode<synchronous>, transform_indices = @transform_1, window_bounds = array<i64: 108, 504>}, {transform_indices = @transform_2, window_bounds = array<i64: 8, 1>}, {transform_indices = @transform_3, window_bounds = array<i64: 8, 1>}, {transform_indices = @transform_4, window_bounds = array<i64: 8, 504>}]} {
    %c0 = arith.constant 0 : index
    %c0_0 = arith.constant 0 : index
    %0 = vector.load %arg1[%c0, %c0_0] : memref<8x108xbf16, #tpu.memory_space<vmem>>, vector<8x108xbf16>
    %c0_1 = arith.constant 0 : index
    %c0_2 = arith.constant 0 : index
    %1 = vector.load %arg2[%c0_1, %c0_2] : memref<108x504xbf16, #tpu.memory_space<vmem>>, vector<108x504xbf16>
    %cst = arith.constant dense<0.000000e+00> : vector<8x504xf32>
    %2 = tpu.matmul %0, %1, %cst {dimension_numbers = #tpu.dot_dimension_numbers<[1], [0], [0], [1], [0, 0, 1, 1], [], []>} : vector<8x108xbf16>, vector<108x504xbf16>, vector<8x504xf32> -> vector<8x504xf32>
    %cst_3 = arith.constant dense<0.000000e+00> : vector<8xf32>
    %3 = vector.multi_reduction <add>, %2, %cst_3 [1] : vector<8x504xf32> to vector<8xf32>
    %4 = vector.shape_cast %3 : vector<8xf32> to vector<8x1xf32>
    %cst_4 = arith.constant 5.040000e+02 : f32
    %5 = vector.broadcast %cst_4 : f32 to vector<8x1xf32>
    %6 = arith.divf %4, %5 : vector<8x1xf32>
    %7 = vector.broadcast %6 : vector<8x1xf32> to vector<8x504xf32>
    %8 = arith.subf %2, %7 : vector<8x504xf32>
    %9 = arith.mulf %8, %8 : vector<8x504xf32>
    %cst_5 = arith.constant dense<0.000000e+00> : vector<8xf32>
    %10 = vector.multi_reduction <add>, %9, %cst_5 [1] : vector<8x504xf32> to vector<8xf32>
    %11 = vector.shape_cast %10 : vector<8xf32> to vector<8x1xf32>
    %cst_6 = arith.constant 5.040000e+02 : f32
    %12 = vector.broadcast %cst_6 : f32 to vector<8x1xf32>
    %13 = arith.divf %11, %12 : vector<8x1xf32>
    %c0_7 = arith.constant 0 : index
    %c0_8 = arith.constant 0 : index
    %14 = vector.load %arg3[%c0_7, %c0_8] : memref<8x1xf32, #tpu.memory_space<vmem>>, vector<8x1xf32>
    %cst_9 = arith.constant 9.99999974E-6 : f32
    %15 = vector.broadcast %cst_9 : f32 to vector<8x1xf32>
    %16 = arith.addf %13, %15 : vector<8x1xf32>
    %17 = math.rsqrt %16 : vector<8x1xf32>
    %18 = arith.mulf %14, %17 : vector<8x1xf32>
    %c0_10 = arith.constant 0 : index
    %c0_11 = arith.constant 0 : index
    %19 = vector.load %arg4[%c0_10, %c0_11] : memref<8x1xf32, #tpu.memory_space<vmem>>, vector<8x1xf32>
    %20 = arith.mulf %6, %18 : vector<8x1xf32>
    %21 = arith.subf %19, %20 : vector<8x1xf32>
    %22 = vector.broadcast %18 : vector<8x1xf32> to vector<8x504xf32>
    %23 = arith.mulf %2, %22 : vector<8x504xf32>
    %24 = vector.broadcast %21 : vector<8x1xf32> to vector<8x504xf32>
    %25 = arith.addf %23, %24 : vector<8x504xf32>
    %cst_12 = arith.constant 0.000000e+00 : f32
    %26 = vector.broadcast %cst_12 : f32 to vector<8x504xf32>
    %27 = arith.cmpf ogt, %25, %26 : vector<8x504xf32>
    %cst_13 = arith.constant 0.000000e+00 : f32
    %28 = vector.broadcast %cst_13 : f32 to vector<8x504xf32>
    %29 = arith.minimumf %25, %28 : vector<8x504xf32>
    %30 = math.exp %29 : vector<8x504xf32>
    %cst_14 = arith.constant 1.000000e+00 : f32
    %31 = vector.broadcast %cst_14 : f32 to vector<8x504xf32>
    %32 = arith.subf %30, %31 : vector<8x504xf32>
    %33 = arith.select %27, %25, %32 : vector<8x504xi1>, vector<8x504xf32>
    %34 = arith.truncf %33 : vector<8x504xf32> to vector<8x504xbf16>
    %c0_15 = arith.constant 0 : index
    %c0_16 = arith.constant 0 : index
    %35 = vector.load %arg5[%c0_15, %c0_16] : memref<8x504xbf16, #tpu.memory_space<vmem>>, vector<8x504xbf16>
    tpu.vector_store %arg5[%c0_15, %c0_16], %34 {strides = array<i32>} : memref<8x504xbf16, #tpu.memory_space<vmem>>, vector<8x504xbf16>,
    return
  }
  func.func @transform_0(%arg0: i32) -> (i32, i32) {
    %c0_i32 = arith.constant 0 : i32
    %c0_i32_0 = arith.constant 0 : i32
    return %arg0, %c0_i32 : i32, i32
  }
  func.func @transform_1(%arg0: i32) -> (i32, i32) {
    %c0_i32 = arith.constant 0 : i32
    %c0_i32_0 = arith.constant 0 : i32
    %c0_i32_1 = arith.constant 0 : i32
    return %c0_i32, %c0_i32_0 : i32, i32
  }
  func.func @transform_2(%arg0: i32) -> (i32, i32) {
    %c0_i32 = arith.constant 0 : i32
    %c0_i32_0 = arith.constant 0 : i32
    return %arg0, %c0_i32 : i32, i32
  }
  func.func @transform_3(%arg0: i32) -> (i32, i32) {
    %c0_i32 = arith.constant 0 : i32
    %c0_i32_0 = arith.constant 0 : i32
    return %arg0, %c0_i32 : i32, i32
  }
  func.func @transform_4(%arg0: i32) -> (i32, i32) {
    %c0_i32 = arith.constant 0 : i32
    %c0_i32_0 = arith.constant 0 : i32
    return %arg0, %c0_i32 : i32, i32
  }
}

module attributes {stable_mosaic.version = 11 : i64} {
  func.func @_attn_apply_kernel(%arg0: i32, %arg1: memref<8x504xbf16, #tpu.memory_space<vmem>>, %arg2: memref<8x2xf32, #tpu.memory_space<vmem>>, %arg3: memref<54x504xbf16, #tpu.memory_space<vmem>>, %arg4: memref<54x1xf32, #tpu.memory_space<vmem>>, %arg5: memref<8x504xbf16, #tpu.memory_space<vmem>>) attributes {dimension_semantics = [#tpu.dimension_semantics<arbitrary>], iteration_bounds = array<i64: 1>, scalar_prefetch = 0 : i64, scratch_operands = 0 : i64, tpu.core_type = #tpu.core_type<tc>, window_params = [{pipeline_mode = #tpu.pipeline_mode<synchronous>, transform_indices = @transform_0, window_bounds = array<i64: 8, 504>}, {pipeline_mode = #tpu.pipeline_mode<synchronous>, transform_indices = @transform_1, window_bounds = array<i64: 8, 2>}, {pipeline_mode = #tpu.pipeline_mode<synchronous>, transform_indices = @transform_2, window_bounds = array<i64: 54, 504>}, {pipeline_mode = #tpu.pipeline_mode<synchronous>, transform_indices = @transform_3, window_bounds = array<i64: 54, 1>}, {pipeline_mode = #tpu.pipeline_mode<synchronous>, transform_indices = @transform_4, window_bounds = array<i64: 8, 504>}]} {
    %c0 = arith.constant 0 : index
    %c0_0 = arith.constant 0 : index
    %0 = vector.load %arg3[%c0, %c0_0] : memref<54x504xbf16, #tpu.memory_space<vmem>>, vector<54x504xbf16>
    %1 = arith.extf %0 : vector<54x504xbf16> to vector<54x504xf32>
    %c0_1 = arith.constant 0 : index
    %c0_2 = arith.constant 0 : index
    %2 = vector.load %arg4[%c0_1, %c0_2] : memref<54x1xf32, #tpu.memory_space<vmem>>, vector<54x1xf32>
    %3 = vector.broadcast %2 : vector<54x1xf32> to vector<54x504xf32>
    %4 = arith.mulf %1, %3 : vector<54x504xf32>
    %cst = arith.constant dense<0.000000e+00> : vector<504xf32>
    %5 = vector.multi_reduction <add>, %4, %cst [0] : vector<54x504xf32> to vector<504xf32>
    %6 = vector.shape_cast %5 : vector<504xf32> to vector<1x504xf32>
    %cst_3 = arith.constant 0.000000e+00 : f32
    %7 = vector.broadcast %cst_3 : f32 to vector<1x504xf32>
    %8 = arith.subf %7, %6 : vector<1x504xf32>
    %9 = math.exp %8 : vector<1x504xf32>
    %cst_4 = arith.constant 1.000000e+00 : f32
    %10 = vector.broadcast %cst_4 : f32 to vector<1x504xf32>
    %11 = arith.addf %10, %9 : vector<1x504xf32>
    %cst_5 = arith.constant 1.000000e+00 : f32
    %12 = vector.broadcast %cst_5 : f32 to vector<1x504xf32>
    %13 = arith.divf %12, %11 : vector<1x504xf32>
    %14 = tpu.iota {dimensions = array<i32: 1>} : vector<8x504xi32>
    %c0_6 = arith.constant 0 : index
    %c0_7 = arith.constant 0 : index
    %15 = vector.load %arg2[%c0_6, %c0_7] : memref<8x2xf32, #tpu.memory_space<vmem>>, vector<8x1xf32>
    %16 = vector.shape_cast %15 : vector<8x1xf32> to vector<8x1xf32>
    %17 = vector.broadcast %16 : vector<8x1xf32> to vector<8x504xf32>
    %c0_8 = arith.constant 0 : index
    %c1 = arith.constant 1 : index
    %18 = vector.load %arg2[%c0_8, %c1] : memref<8x2xf32, #tpu.memory_space<vmem>>, vector<8x1xf32>
    %19 = vector.shape_cast %18 : vector<8x1xf32> to vector<8x1xf32>
    %20 = vector.broadcast %19 : vector<8x1xf32> to vector<8x504xf32>
    %c252_i32 = arith.constant 252 : i32
    %21 = vector.broadcast %c252_i32 : i32 to vector<8x504xi32>
    %22 = arith.cmpi sge, %14, %21 : vector<8x504xi32>
    %23 = arith.select %22, %20, %17 : vector<8x504xi1>, vector<8x504xf32>
    %c0_9 = arith.constant 0 : index
    %c0_10 = arith.constant 0 : index
    %24 = vector.load %arg1[%c0_9, %c0_10] : memref<8x504xbf16, #tpu.memory_space<vmem>>, vector<8x504xbf16>
    %25 = arith.extf %24 : vector<8x504xbf16> to vector<8x504xf32>
    %26 = arith.mulf %25, %23 : vector<8x504xf32>
    %27 = vector.broadcast %13 : vector<1x504xf32> to vector<8x504xf32>
    %28 = arith.mulf %26, %27 : vector<8x504xf32>
    %29 = arith.truncf %28 : vector<8x504xf32> to vector<8x504xbf16>
    %c0_11 = arith.constant 0 : index
    %c0_12 = arith.constant 0 : index
    %30 = vector.load %arg5[%c0_11, %c0_12] : memref<8x504xbf16, #tpu.memory_space<vmem>>, vector<8x504xbf16>
    tpu.vector_store %arg5[%c0_11, %c0_12], %29 {strides = array<i32>} : memref<8x504xbf16, #tpu.memory_space<vmem>>, vector<8x504xbf16>,
    return
  }
  func.func @transform_0(%arg0: i32) -> (i32, i32) {
    %c0_i32 = arith.constant 0 : i32
    %c0_i32_0 = arith.constant 0 : i32
    %c0_i32_1 = arith.constant 0 : i32
    return %c0_i32, %c0_i32_0 : i32, i32
  }
  func.func @transform_1(%arg0: i32) -> (i32, i32) {
    %c0_i32 = arith.constant 0 : i32
    %c0_i32_0 = arith.constant 0 : i32
    %c0_i32_1 = arith.constant 0 : i32
    return %c0_i32, %c0_i32_0 : i32, i32
  }
  func.func @transform_2(%arg0: i32) -> (i32, i32) {
    %c0_i32 = arith.constant 0 : i32
    %c0_i32_0 = arith.constant 0 : i32
    %c0_i32_1 = arith.constant 0 : i32
    return %c0_i32, %c0_i32_0 : i32, i32
  }
  func.func @transform_3(%arg0: i32) -> (i32, i32) {
    %c0_i32 = arith.constant 0 : i32
    %c0_i32_0 = arith.constant 0 : i32
    %c0_i32_1 = arith.constant 0 : i32
    return %c0_i32, %c0_i32_0 : i32, i32
  }
  func.func @transform_4(%arg0: i32) -> (i32, i32) {
    %c0_i32 = arith.constant 0 : i32
    %c0_i32_0 = arith.constant 0 : i32
    %c0_i32_1 = arith.constant 0 : i32
    return %c0_i32, %c0_i32_0 : i32, i32
  }
}

module attributes {stable_mosaic.version = 11 : i64} {
  func.func @_conv_bn_elu_kernel(%arg0: i32, %arg1: memref<16x216xbf16, #tpu.memory_space<vmem>>, %arg2: memref<216x96xbf16, #tpu.memory_space<vmem>>, %arg3: memref<16x1xf32, #tpu.memory_space<vmem>>, %arg4: memref<16x1xf32, #tpu.memory_space<vmem>>, %arg5: memref<16x96xbf16, #tpu.memory_space<vmem>>) attributes {dimension_semantics = [#tpu.dimension_semantics<parallel>], iteration_bounds = array<i64: 1>, scalar_prefetch = 0 : i64, scratch_operands = 0 : i64, tpu.core_type = #tpu.core_type<tc>, window_params = [{transform_indices = @transform_0, window_bounds = array<i64: 16, 216>}, {pipeline_mode = #tpu.pipeline_mode<synchronous>, transform_indices = @transform_1, window_bounds = array<i64: 216, 96>}, {transform_indices = @transform_2, window_bounds = array<i64: 16, 1>}, {transform_indices = @transform_3, window_bounds = array<i64: 16, 1>}, {transform_indices = @transform_4, window_bounds = array<i64: 16, 96>}]} {
    %c0 = arith.constant 0 : index
    %c0_0 = arith.constant 0 : index
    %0 = vector.load %arg1[%c0, %c0_0] : memref<16x216xbf16, #tpu.memory_space<vmem>>, vector<16x216xbf16>
    %c0_1 = arith.constant 0 : index
    %c0_2 = arith.constant 0 : index
    %1 = vector.load %arg2[%c0_1, %c0_2] : memref<216x96xbf16, #tpu.memory_space<vmem>>, vector<216x96xbf16>
    %cst = arith.constant dense<0.000000e+00> : vector<16x96xf32>
    %2 = tpu.matmul %0, %1, %cst {dimension_numbers = #tpu.dot_dimension_numbers<[1], [0], [0], [1], [0, 0, 1, 1], [], []>} : vector<16x216xbf16>, vector<216x96xbf16>, vector<16x96xf32> -> vector<16x96xf32>
    %cst_3 = arith.constant dense<0.000000e+00> : vector<16xf32>
    %3 = vector.multi_reduction <add>, %2, %cst_3 [1] : vector<16x96xf32> to vector<16xf32>
    %4 = vector.shape_cast %3 : vector<16xf32> to vector<16x1xf32>
    %cst_4 = arith.constant 9.600000e+01 : f32
    %5 = vector.broadcast %cst_4 : f32 to vector<16x1xf32>
    %6 = arith.divf %4, %5 : vector<16x1xf32>
    %7 = vector.broadcast %6 : vector<16x1xf32> to vector<16x96xf32>
    %8 = arith.subf %2, %7 : vector<16x96xf32>
    %9 = arith.mulf %8, %8 : vector<16x96xf32>
    %cst_5 = arith.constant dense<0.000000e+00> : vector<16xf32>
    %10 = vector.multi_reduction <add>, %9, %cst_5 [1] : vector<16x96xf32> to vector<16xf32>
    %11 = vector.shape_cast %10 : vector<16xf32> to vector<16x1xf32>
    %cst_6 = arith.constant 9.600000e+01 : f32
    %12 = vector.broadcast %cst_6 : f32 to vector<16x1xf32>
    %13 = arith.divf %11, %12 : vector<16x1xf32>
    %c0_7 = arith.constant 0 : index
    %c0_8 = arith.constant 0 : index
    %14 = vector.load %arg3[%c0_7, %c0_8] : memref<16x1xf32, #tpu.memory_space<vmem>>, vector<16x1xf32>
    %cst_9 = arith.constant 9.99999974E-6 : f32
    %15 = vector.broadcast %cst_9 : f32 to vector<16x1xf32>
    %16 = arith.addf %13, %15 : vector<16x1xf32>
    %17 = math.rsqrt %16 : vector<16x1xf32>
    %18 = arith.mulf %14, %17 : vector<16x1xf32>
    %c0_10 = arith.constant 0 : index
    %c0_11 = arith.constant 0 : index
    %19 = vector.load %arg4[%c0_10, %c0_11] : memref<16x1xf32, #tpu.memory_space<vmem>>, vector<16x1xf32>
    %20 = arith.mulf %6, %18 : vector<16x1xf32>
    %21 = arith.subf %19, %20 : vector<16x1xf32>
    %22 = vector.broadcast %18 : vector<16x1xf32> to vector<16x96xf32>
    %23 = arith.mulf %2, %22 : vector<16x96xf32>
    %24 = vector.broadcast %21 : vector<16x1xf32> to vector<16x96xf32>
    %25 = arith.addf %23, %24 : vector<16x96xf32>
    %cst_12 = arith.constant 0.000000e+00 : f32
    %26 = vector.broadcast %cst_12 : f32 to vector<16x96xf32>
    %27 = arith.cmpf ogt, %25, %26 : vector<16x96xf32>
    %cst_13 = arith.constant 0.000000e+00 : f32
    %28 = vector.broadcast %cst_13 : f32 to vector<16x96xf32>
    %29 = arith.minimumf %25, %28 : vector<16x96xf32>
    %30 = math.exp %29 : vector<16x96xf32>
    %cst_14 = arith.constant 1.000000e+00 : f32
    %31 = vector.broadcast %cst_14 : f32 to vector<16x96xf32>
    %32 = arith.subf %30, %31 : vector<16x96xf32>
    %33 = arith.select %27, %25, %32 : vector<16x96xi1>, vector<16x96xf32>
    %34 = arith.truncf %33 : vector<16x96xf32> to vector<16x96xbf16>
    %c0_15 = arith.constant 0 : index
    %c0_16 = arith.constant 0 : index
    %35 = vector.load %arg5[%c0_15, %c0_16] : memref<16x96xbf16, #tpu.memory_space<vmem>>, vector<16x96xbf16>
    tpu.vector_store %arg5[%c0_15, %c0_16], %34 {strides = array<i32>} : memref<16x96xbf16, #tpu.memory_space<vmem>>, vector<16x96xbf16>,
    return
  }
  func.func @transform_0(%arg0: i32) -> (i32, i32) {
    %c0_i32 = arith.constant 0 : i32
    %c0_i32_0 = arith.constant 0 : i32
    return %arg0, %c0_i32 : i32, i32
  }
  func.func @transform_1(%arg0: i32) -> (i32, i32) {
    %c0_i32 = arith.constant 0 : i32
    %c0_i32_0 = arith.constant 0 : i32
    %c0_i32_1 = arith.constant 0 : i32
    return %c0_i32, %c0_i32_0 : i32, i32
  }
  func.func @transform_2(%arg0: i32) -> (i32, i32) {
    %c0_i32 = arith.constant 0 : i32
    %c0_i32_0 = arith.constant 0 : i32
    return %arg0, %c0_i32 : i32, i32
  }
  func.func @transform_3(%arg0: i32) -> (i32, i32) {
    %c0_i32 = arith.constant 0 : i32
    %c0_i32_0 = arith.constant 0 : i32
    return %arg0, %c0_i32 : i32, i32
  }
  func.func @transform_4(%arg0: i32) -> (i32, i32) {
    %c0_i32 = arith.constant 0 : i32
    %c0_i32_0 = arith.constant 0 : i32
    return %arg0, %c0_i32 : i32, i32
  }
}

module attributes {stable_mosaic.version = 11 : i64} {
  func.func @_attn_apply_kernel(%arg0: i32, %arg1: memref<16x96xbf16, #tpu.memory_space<vmem>>, %arg2: memref<16x2xf32, #tpu.memory_space<vmem>>, %arg3: memref<54x96xbf16, #tpu.memory_space<vmem>>, %arg4: memref<54x1xf32, #tpu.memory_space<vmem>>, %arg5: memref<16x96xbf16, #tpu.memory_space<vmem>>) attributes {dimension_semantics = [#tpu.dimension_semantics<arbitrary>], iteration_bounds = array<i64: 1>, scalar_prefetch = 0 : i64, scratch_operands = 0 : i64, tpu.core_type = #tpu.core_type<tc>, window_params = [{pipeline_mode = #tpu.pipeline_mode<synchronous>, transform_indices = @transform_0, window_bounds = array<i64: 16, 96>}, {pipeline_mode = #tpu.pipeline_mode<synchronous>, transform_indices = @transform_1, window_bounds = array<i64: 16, 2>}, {pipeline_mode = #tpu.pipeline_mode<synchronous>, transform_indices = @transform_2, window_bounds = array<i64: 54, 96>}, {pipeline_mode = #tpu.pipeline_mode<synchronous>, transform_indices = @transform_3, window_bounds = array<i64: 54, 1>}, {pipeline_mode = #tpu.pipeline_mode<synchronous>, transform_indices = @transform_4, window_bounds = array<i64: 16, 96>}]} {
    %c0 = arith.constant 0 : index
    %c0_0 = arith.constant 0 : index
    %0 = vector.load %arg3[%c0, %c0_0] : memref<54x96xbf16, #tpu.memory_space<vmem>>, vector<54x96xbf16>
    %1 = arith.extf %0 : vector<54x96xbf16> to vector<54x96xf32>
    %c0_1 = arith.constant 0 : index
    %c0_2 = arith.constant 0 : index
    %2 = vector.load %arg4[%c0_1, %c0_2] : memref<54x1xf32, #tpu.memory_space<vmem>>, vector<54x1xf32>
    %3 = vector.broadcast %2 : vector<54x1xf32> to vector<54x96xf32>
    %4 = arith.mulf %1, %3 : vector<54x96xf32>
    %cst = arith.constant dense<0.000000e+00> : vector<96xf32>
    %5 = vector.multi_reduction <add>, %4, %cst [0] : vector<54x96xf32> to vector<96xf32>
    %6 = vector.shape_cast %5 : vector<96xf32> to vector<1x96xf32>
    %cst_3 = arith.constant 0.000000e+00 : f32
    %7 = vector.broadcast %cst_3 : f32 to vector<1x96xf32>
    %8 = arith.subf %7, %6 : vector<1x96xf32>
    %9 = math.exp %8 : vector<1x96xf32>
    %cst_4 = arith.constant 1.000000e+00 : f32
    %10 = vector.broadcast %cst_4 : f32 to vector<1x96xf32>
    %11 = arith.addf %10, %9 : vector<1x96xf32>
    %cst_5 = arith.constant 1.000000e+00 : f32
    %12 = vector.broadcast %cst_5 : f32 to vector<1x96xf32>
    %13 = arith.divf %12, %11 : vector<1x96xf32>
    %14 = tpu.iota {dimensions = array<i32: 1>} : vector<16x96xi32>
    %c0_6 = arith.constant 0 : index
    %c0_7 = arith.constant 0 : index
    %15 = vector.load %arg2[%c0_6, %c0_7] : memref<16x2xf32, #tpu.memory_space<vmem>>, vector<16x1xf32>
    %16 = vector.shape_cast %15 : vector<16x1xf32> to vector<16x1xf32>
    %17 = vector.broadcast %16 : vector<16x1xf32> to vector<16x96xf32>
    %c0_8 = arith.constant 0 : index
    %c1 = arith.constant 1 : index
    %18 = vector.load %arg2[%c0_8, %c1] : memref<16x2xf32, #tpu.memory_space<vmem>>, vector<16x1xf32>
    %19 = vector.shape_cast %18 : vector<16x1xf32> to vector<16x1xf32>
    %20 = vector.broadcast %19 : vector<16x1xf32> to vector<16x96xf32>
    %c48_i32 = arith.constant 48 : i32
    %21 = vector.broadcast %c48_i32 : i32 to vector<16x96xi32>
    %22 = arith.cmpi sge, %14, %21 : vector<16x96xi32>
    %23 = arith.select %22, %20, %17 : vector<16x96xi1>, vector<16x96xf32>
    %c0_9 = arith.constant 0 : index
    %c0_10 = arith.constant 0 : index
    %24 = vector.load %arg1[%c0_9, %c0_10] : memref<16x96xbf16, #tpu.memory_space<vmem>>, vector<16x96xbf16>
    %25 = arith.extf %24 : vector<16x96xbf16> to vector<16x96xf32>
    %26 = arith.mulf %25, %23 : vector<16x96xf32>
    %27 = vector.broadcast %13 : vector<1x96xf32> to vector<16x96xf32>
    %28 = arith.mulf %26, %27 : vector<16x96xf32>
    %29 = arith.truncf %28 : vector<16x96xf32> to vector<16x96xbf16>
    %c0_11 = arith.constant 0 : index
    %c0_12 = arith.constant 0 : index
    %30 = vector.load %arg5[%c0_11, %c0_12] : memref<16x96xbf16, #tpu.memory_space<vmem>>, vector<16x96xbf16>
    tpu.vector_store %arg5[%c0_11, %c0_12], %29 {strides = array<i32>} : memref<16x96xbf16, #tpu.memory_space<vmem>>, vector<16x96xbf16>,
    return
  }
  func.func @transform_0(%arg0: i32) -> (i32, i32) {
    %c0_i32 = arith.constant 0 : i32
    %c0_i32_0 = arith.constant 0 : i32
    %c0_i32_1 = arith.constant 0 : i32
    return %c0_i32, %c0_i32_0 : i32, i32
  }
  func.func @transform_1(%arg0: i32) -> (i32, i32) {
    %c0_i32 = arith.constant 0 : i32
    %c0_i32_0 = arith.constant 0 : i32
    %c0_i32_1 = arith.constant 0 : i32
    return %c0_i32, %c0_i32_0 : i32, i32
  }
  func.func @transform_2(%arg0: i32) -> (i32, i32) {
    %c0_i32 = arith.constant 0 : i32
    %c0_i32_0 = arith.constant 0 : i32
    %c0_i32_1 = arith.constant 0 : i32
    return %c0_i32, %c0_i32_0 : i32, i32
  }
  func.func @transform_3(%arg0: i32) -> (i32, i32) {
    %c0_i32 = arith.constant 0 : i32
    %c0_i32_0 = arith.constant 0 : i32
    %c0_i32_1 = arith.constant 0 : i32
    return %c0_i32, %c0_i32_0 : i32, i32
  }
  func.func @transform_4(%arg0: i32) -> (i32, i32) {
    %c0_i32 = arith.constant 0 : i32
    %c0_i32_0 = arith.constant 0 : i32
    %c0_i32_1 = arith.constant 0 : i32
    return %c0_i32, %c0_i32_0 : i32, i32
  }
}

</mosaic_0001>

<bundles_post_ra>
// kernel: parallel_model.6
= control target key start
LH: loop header
LB: loop body
LE: loop exit
PB: predicated region body
PF: predicated region fallthrough
CT: control target
= control target key end

     0   :  { %vm199_vm0 = vcmask 1044480   ;;  %vm200_vm1 = vcmask 1045504   ;;  %v1041_v3 = vmov 65535   ;;  %v1042_v5 = vmov 0   ;;  %s1464_s1 = inlined_call_operand.vmem [shape: bf16[27,2048], index: 1, kind: input, shape index: {}]   ;;  %s1465_s0 = inlined_call_operand.vmem [shape: bf16[4,27], index: 0, kind: input, shape index: {}]   ;;  %s1466_s2 = inlined_call_operand.vmem [shape: f32[4,1], index: 2, kind: input, shape index: {}]   ;;  %s1467_s3 = inlined_call_operand.vmem [shape: f32[4,1], index: 3, kind: input, shape index: {}]   ;;  %s1468_s4 = inlined_call_operand.vmem [shape: bf16[4,2048], index: 4, kind: output, shape index: {}]  }
   0x1   :  { %v19_v0 = vld [vmem:[%s1464_s1] sm:$0xff]  ;;  %v20_v2 = vld [vmem:[%s1464_s1 + $0x8] sm:$0xff]  ;;  %v201_v4 = vsel %vm199_vm0, 4294967295, %v1041_v3  ;;  %283 = vmatprep.mubr.bf16.mxu0 %v1042_v5  ;;  %324 = vmatprep.mubr.bf16.mxu1 %v1042_v5  ;;  %v21_v20 = vld [vmem:[%s1464_s1 + $0x10] sm:$0xff]  ;;  %vm195_vm2 = vcmask 220160   ;;  %vm579_vm3 = vcmask 1043456  }
   0x2   :  { %v27_v1 = vld [vmem:[%s1464_s1 + $0x40] sm:$0xff]  ;;  %v28_v8 = vld [vmem:[%s1464_s1 + $0x48] sm:$0xff]  ;;  %v1089_v11 = vsel %vm200_vm1, %v201_v4, 0  ;;  %1005 = vset.pattern.permute.xlu1 %v1042_v5  ;;  %1006 = vset.pattern.permute.xlu0 %v1042_v5  ;;  %v29_v21 = vld [vmem:[%s1464_s1 + $0x50] sm:$0xff] }
   0x3   :  { %v939_v6 = vcombine.high %v19_v0, %v27_v1  ;;  %v938_v7 = vcombine.low %v19_v0, %v27_v1  ;;  %v35_v9 = vld [vmem:[%s1464_s1 + $0x80] sm:$0xff]  ;;  %v941_v12 = vcombine.high %v20_v2, %v28_v8  ;;  %v940_v13 = vcombine.low %v20_v2, %v28_v8  ;;  %v36_v16 = vld [vmem:[%s1464_s1 + $0x88] sm:$0xff]  ;;  %v22_v22 = vld [vmem:[%s1464_s1 + $0x18] sm:$0xff] }
   0x4   :  { %v43_v10 = vld [vmem:[%s1464_s1 + $0xc0] sm:$0x33]  ;;  %v44_v17 = vld [vmem:[%s1464_s1 + $0xc8] sm:$0x33]  ;;  %v30_v25 = vld [vmem:[%s1464_s1 + $0x58] sm:$0xff]  ;;  %v943_v30 = vcombine.high %v21_v20, %v29_v21  ;;  %v942_v37 = vcombine.low %v21_v20, %v29_v21 }
   0x5   :  { %v955_v14 = vcombine.high %v35_v9, %v43_v10  ;;  %v954_v15 = vcombine.low %v35_v9, %v43_v10  ;;  %251 = vmatprep.subr.bf16.mxu0 %v939_v6  ;;  %v957_v18 = vcombine.high %v36_v16, %v44_v17  ;;  %v956_v19 = vcombine.low %v36_v16, %v44_v17  ;;  %v37_v26 = vld [vmem:[%s1464_s1 + $0x90] sm:$0xff]  ;;  %v38_v31 = vld [vmem:[%s1464_s1 + $0x98] sm:$0xff]  ;;  %v1130_v36 = vld [vmem:[%s1465_s0] sm:$0x3] }
   0x6   :  { %252 = vmatpush1.bf16.msra.mxu0 %v938_v7  ;;  %292 = vmatprep.subr.bf16.mxu1 %v941_v12  ;;  %v45_v27 = vld [vmem:[%s1464_s1 + $0xd0] sm:$0x33]  ;;  %v46_v32 = vld [vmem:[%s1464_s1 + $0xd8] sm:$0x33]  ;;  %v945_v33 = vcombine.high %v22_v22, %v30_v25  ;;  %v944_v39 = vcombine.low %v22_v22, %v30_v25  ;;  %v23_v42 = vld [vmem:[%s1464_s1 + $0x20] sm:$0xff] }
   0x7   :  { %v207_v23 = vand.u32 %v955_v14, %v1089_v11  ;;  %v204_v24 = vand.u32 %v954_v15, %v1089_v11  ;;  %293 = vmatpush1.bf16.msra.mxu1 %v940_v13  ;;  %v213_v28 = vand.u32 %v957_v18, %v1089_v11  ;;  %v210_v29 = vand.u32 %v956_v19, %v1089_v11  ;;  %v31_v43 = vld [vmem:[%s1464_s1 + $0x60] sm:$0xff]  ;;  %v24_v45 = vld [vmem:[%s1464_s1 + $0x28] sm:$0xff]  ;;  %v25_v62 = vld [vmem:[%s1464_s1 + $0x30] sm:$0xff] }
   0x8   :  { %v959_v34 = vcombine.high %v37_v26, %v45_v27  ;;  %v961_v35 = vcombine.high %v38_v31, %v46_v32  ;;  %v958_v38 = vcombine.low %v37_v26, %v45_v27  ;;  %v960_v41 = vcombine.low %v38_v31, %v46_v32  ;;  %v39_v46 = vld [vmem:[%s1464_s1 + $0xa0] sm:$0xff]  ;;  %v32_v48 = vld [vmem:[%s1464_s1 + $0x68] sm:$0xff]  ;;  %v33_v63 = vld [vmem:[%s1464_s1 + $0x70] sm:$0xff] }
   0x9   :  { %253 = vmatprep.subr.bf16.mxu0 %v207_v23  ;;  %294 = vmatprep.subr.bf16.mxu1 %v213_v28  ;;  %v47_v47 = vld [vmem:[%s1464_s1 + $0xe0] sm:$0x33]  ;;  %v40_v49 = vld [vmem:[%s1464_s1 + $0xa8] sm:$0xff]  ;;  %v947_v53 = vcombine.high %v23_v42, %v31_v43  ;;  %v949_v55 = vcombine.high %v24_v45, %v32_v48  ;;  %v946_v57 = vcombine.low %v23_v42, %v31_v43  ;;  %v26_v1 = vld [vmem:[%s1464_s1 + $0x38] sm:$0xff] }
   0xa   :  { %254 = vmatpush1.bf16.msra.mxu0 %v204_v24  ;;  %v219_v40 = vand.u32 %v959_v34, %v1089_v11  ;;  %v225_v44 = vand.u32 %v961_v35, %v1089_v11  ;;  %v48_v50 = vld [vmem:[%s1464_s1 + $0xe8] sm:$0x33]  ;;  %v216_v51 = vand.u32 %v958_v38, %v1089_v11  ;;  %v222_v52 = vand.u32 %v960_v41, %v1089_v11  ;;  %v41_v2 = vld [vmem:[%s1464_s1 + $0xb0] sm:$0xff]  ;;  %v34_v4 = vld [vmem:[%s1464_s1 + $0x78] sm:$0xff] }
   0xb   :  { %295 = vmatpush1.bf16.msra.mxu1 %v210_v29  ;;  %333 = vmatprep.subr.bf16.mxu0 %v943_v30  ;;  %v963_v54 = vcombine.high %v39_v46, %v47_v47  ;;  %v965_v56 = vcombine.high %v40_v49, %v48_v50  ;;  %v962_v58 = vcombine.low %v39_v46, %v47_v47  ;;  %v49_v3 = vld [vmem:[%s1464_s1 + $0xf0] sm:$0x33]  ;;  %v42_v6 = vld [vmem:[%s1464_s1 + $0xb8] sm:$0xff] }
   0xc   :  { %374 = vmatprep.subr.bf16.mxu1 %v945_v33  ;;  %v948_v59 = vcombine.low %v24_v45, %v32_v48  ;;  %v964_v61 = vcombine.low %v40_v49, %v48_v50  ;;  %v50_v7 = vld [vmem:[%s1464_s1 + $0xf8] sm:$0x33]  ;;  %v951_v10 = vcombine.high %v25_v62, %v33_v63  ;;  %v967_v12 = vcombine.high %v41_v2, %v49_v3 }
   0xd   :  { %970 = vmatmul.mubr.msk.bf16.vlgmr.msra.gmra.mrb[0].mxu0 %vm195_vm2, %v1130_v36  ;;  %v231_v60 = vand.u32 %v963_v54, %v1089_v11  ;;  %v237_v0 = vand.u32 %v965_v56, %v1089_v11  ;;  %v228_v8 = vand.u32 %v962_v58, %v1089_v11  ;;  %v953_v13 = vcombine.high %v26_v1, %v34_v4 }
   0xe   :  { %334 = vmatpush1.bf16.msra.mxu0 %v942_v37  ;;  %971 = vmatmul.mubr.msk.bf16.vlgmr.msra.gmra.mrb[0].mxu1 %vm195_vm2, %v1130_v36  ;;  %v234_v9 = vand.u32 %v964_v61, %v1089_v11  ;;  %v969_v14 = vcombine.high %v42_v6, %v50_v7  ;;  %v950_v15 = vcombine.low %v25_v62, %v33_v63 }
   0xf   :  { %375 = vmatpush1.bf16.msra.mxu1 %v944_v39  ;;  %335 = vmatprep.subr.bf16.mxu0 %v219_v40  ;;  %v966_v16 = vcombine.low %v41_v2, %v49_v3  ;;  %v952_v17 = vcombine.low %v26_v1, %v34_v4  ;;  %v243_v18 = vand.u32 %v967_v12, %v1089_v11 }
  0x10   :  { %376 = vmatprep.subr.bf16.mxu1 %v225_v44  ;;  %365 = vmatprep.mubr.bf16.mxu0 %v1042_v5  ;;  %v968_v19 = vcombine.low %v42_v6, %v50_v7  ;;  %v249_v20 = vand.u32 %v969_v14, %v1089_v11 }
  0x11   :  { %406 = vmatprep.mubr.bf16.mxu1 %v1042_v5  ;;  %v240_v21 = vand.u32 %v966_v16, %v1089_v11 }
  0x12   :  { %336 = vmatpush1.bf16.msra.mxu0 %v216_v51  ;;  %v246_v22 = vand.u32 %v968_v19, %v1089_v11 }
  0x13   :  { %377 = vmatpush1.bf16.msra.mxu1 %v222_v52  ;;  %415 = vmatprep.subr.bf16.mxu0 %v947_v53 }
  0x14   :  { %456 = vmatprep.subr.bf16.mxu1 %v949_v55 }
  0x15   :  { %972 = vmatmul.mubr.msk.bf16.vlgmr.msra.gmra.mrb[4].mxu0 %vm195_vm2, %v1130_v36 }
  0x16   :  { %416 = vmatpush1.bf16.msra.mxu0 %v946_v57  ;;  %973 = vmatmul.mubr.msk.bf16.vlgmr.msra.gmra.mrb[4].mxu1 %vm195_vm2, %v1130_v36 }
  0x17   :  { %457 = vmatpush1.bf16.msra.mxu1 %v948_v59  ;;  %417 = vmatprep.subr.bf16.mxu0 %v231_v60 }
  0x18   :  { %458 = vmatprep.subr.bf16.mxu1 %v237_v0  ;;  %447 = vmatprep.mubr.bf16.mxu0 %v1042_v5 }
  0x19   :  { %488 = vmatprep.mubr.bf16.mxu1 %v1042_v5 }
  0x1a   :  { %418 = vmatpush1.bf16.msra.mxu0 %v228_v8 }
  0x1b   :  { %459 = vmatpush1.bf16.msra.mxu1 %v234_v9  ;;  %497 = vmatprep.subr.bf16.mxu0 %v951_v10 }
  0x1c   :  { %538 = vmatprep.subr.bf16.mxu1 %v953_v13 }
  0x1d   :  { %974 = vmatmul.mubr.msk.bf16.vlgmr.msra.gmra.mrb[8].mxu0 %vm195_vm2, %v1130_v36 }
  0x1e   :  { %498 = vmatpush1.bf16.msra.mxu0 %v950_v15  ;;  %975 = vmatmul.mubr.msk.bf16.vlgmr.msra.gmra.mrb[8].mxu1 %vm195_vm2, %v1130_v36 }
  0x1f   :  { %539 = vmatpush1.bf16.msra.mxu1 %v952_v17  ;;  %499 = vmatprep.subr.bf16.mxu0 %v243_v18 }
  0x20   :  { %540 = vmatprep.subr.bf16.mxu1 %v249_v20  ;;  %529 = vmatprep.mubr.bf16.mxu0 %v1042_v5 }
  0x21   :  { %570 = vmatprep.mubr.bf16.mxu1 %v1042_v5 }
  0x22   :  { %500 = vmatpush1.bf16.msra.mxu0 %v240_v21 }
  0x23   :  { %541 = vmatpush1.bf16.msra.mxu1 %v246_v22 }
  0x25   :  { %976 = vmatmul.mubr.msk.bf16.vlgmr.msra.gmra.mrb[12].mxu0 %vm195_vm2, %v1130_v36 }
  0x26   :  { %977 = vmatmul.mubr.msk.bf16.vlgmr.msra.gmra.mrb[12].mxu1 %vm195_vm2, %v1130_v36 }
  0xe0   :  { %v1214_v23 = vpop.f32.mrb[0].mxu0 }
  0xe1   :  { %v580_v24 = vsel %vm579_vm3, %v1214_v23, 0.0  ;;  %v1218_v11 = vpop.f32.mrb[1].mxu0  ;;  %v1220_v25 = vpop.f32.mrb[0].mxu1 }
  0xe2   :  { %v581_v5 = vsel %vm579_vm3, %v1218_v11, 0.0  ;;  %v289_v26 = vpop.f32.mrb[2].mxu0  ;;  %v583_v27 = vsel %vm579_vm3, %v1220_v25, 0.0  ;;  %v1226_v28 = vpop.f32.mrb[1].mxu1 }
  0xe3   :  { %v582_v29 = vadd.f32 %v581_v5, %v580_v24  ;;  %v290_v30 = vpop.f32.mrb[3].mxu0  ;;  %v330_v31 = vpop.f32.mrb[2].mxu1  ;;  %v585_v32 = vsel %vm579_vm3, %v1226_v28, 0.0 }
  0xe4   :  { %v331_v33 = vpop.f32.mrb[3].mxu1 }
  0xe5   :  { %v584_v34 = vadd.f32 %v583_v27, %v582_v29 }
  0xe7   :  { %v586_v35 = vadd.f32 %v585_v32, %v584_v34 }
  0xe8   :  { %v1230_v36 = vpop.f32.mrb[4].mxu0 }
  0xe9   :  { %v587_v37 = vsel %vm579_vm3, %v1230_v36, 0.0  ;;  %v1234_v38 = vpop.f32.mrb[5].mxu0  ;;  %v1236_v39 = vpop.f32.mrb[4].mxu1 }
  0xea   :  { %v588_v40 = vadd.f32 %v587_v37, %v586_v35  ;;  %v589_v41 = vsel %vm579_vm3, %v1234_v38, 0.0  ;;  %v371_v42 = vpop.f32.mrb[6].mxu0  ;;  %v1240_v43 = vpop.f32.mrb[5].mxu1  ;;  %v591_v44 = vsel %vm579_vm3, %v1236_v39, 0.0 }
  0xeb   :  { %v372_v45 = vpop.f32.mrb[7].mxu0  ;;  %v412_v46 = vpop.f32.mrb[6].mxu1  ;;  %v593_v50 = vsel %vm579_vm3, %v1240_v43, 0.0 }
  0xec   :  { %v590_v47 = vadd.f32 %v589_v41, %v588_v40  ;;  %v413_v48 = vpop.f32.mrb[7].mxu1 }
  0xee   :  { %v592_v49 = vadd.f32 %v591_v44, %v590_v47 }
  0xf0   :  { %v594_v51 = vadd.f32 %v593_v50, %v592_v49  ;;  %v1246_v52 = vpop.f32.mrb[8].mxu0 }
  0xf1   :  { %v595_v53 = vsel %vm579_vm3, %v1246_v52, 0.0  ;;  %v1250_v54 = vpop.f32.mrb[9].mxu0  ;;  %v1252_v55 = vpop.f32.mrb[8].mxu1 }
  0xf2   :  { %v596_v56 = vadd.f32 %v595_v53, %v594_v51  ;;  %v597_v57 = vsel %vm579_vm3, %v1250_v54, 0.0  ;;  %v453_v58 = vpop.f32.mrb[10].mxu0  ;;  %v1256_v59 = vpop.f32.mrb[9].mxu1  ;;  %v599_v60 = vsel %vm579_vm3, %v1252_v55, 0.0 }
  0xf3   :  { %v454_v61 = vpop.f32.mrb[11].mxu0  ;;  %v494_v62 = vpop.f32.mrb[10].mxu1  ;;  %v601_v2 = vsel %vm579_vm3, %v1256_v59, 0.0 }
  0xf4   :  { %v598_v63 = vadd.f32 %v597_v57, %v596_v56  ;;  %v495_v0 = vpop.f32.mrb[11].mxu1 }
  0xf6   :  { %v600_v1 = vadd.f32 %v599_v60, %v598_v63 }
  0xf8   :  { %v602_v3 = vadd.f32 %v601_v2, %v600_v1  ;;  %v1262_v4 = vpop.f32.mrb[12].mxu0 }
  0xf9   :  { %v603_v6 = vsel %vm579_vm3, %v1262_v4, 0.0  ;;  %v1266_v7 = vpop.f32.mrb[13].mxu0  ;;  %v1268_v8 = vpop.f32.mrb[12].mxu1 }
  0xfa   :  { %v604_v9 = vadd.f32 %v603_v6, %v602_v3  ;;  %v605_v10 = vsel %vm579_vm3, %v1266_v7, 0.0  ;;  %v535_v12 = vpop.f32.mrb[14].mxu0  ;;  %v1272_v13 = vpop.f32.mrb[13].mxu1  ;;  %v607_v16 = vsel %vm579_vm3, %v1268_v8, 0.0 }
  0xfb   :  { %v536_v14 = vpop.f32.mrb[15].mxu0  ;;  %v576_v15 = vpop.f32.mrb[14].mxu1  ;;  %v609_v20 = vsel %vm579_vm3, %v1272_v13, 0.0 }
  0xfc   :  { %v577_v17 = vpop.f32.mrb[15].mxu1  ;;  %v606_v18 = vadd.f32 %v605_v10, %v604_v9 }
  0xfe   :  { %v608_v19 = vadd.f32 %v607_v16, %v606_v18 }
 0x100   :  { %v610_v21 = vadd.f32 %v609_v20, %v608_v19 }
 0x102   :  { %611 = vadd.xlane.f32.xlu0 %v610_v21 }
 0x18f   :  { %v612_v22 = vpop.xlane.xlu0 %611 }
 0x190   :  { %v1278_v24 = vmul.f32 0.00048828125, %v612_v22 }
 0x192   :  { %v615_v5 = vsub.f32 %v1214_v23, %v1278_v24  ;;  %v616_v26 = vsub.f32 %v1218_v11, %v1278_v24  ;;  %v617_v27 = vsub.f32 %v1220_v25, %v1278_v24  ;;  %v618_v29 = vsub.f32 %v1226_v28, %v1278_v24 }
 0x193   :  { %v619_v32 = vsub.f32 %v1230_v36, %v1278_v24  ;;  %v620_v34 = vsub.f32 %v1234_v38, %v1278_v24  ;;  %v621_v42 = vsub.f32 %v1236_v39, %v1278_v24  ;;  %v622_v47 = vsub.f32 %v1240_v43, %v1278_v24 }
 0x194   :  { %v631_v30 = vmul.f32 %v615_v5, %v615_v5  ;;  %v632_v31 = vmul.f32 %v616_v26, %v616_v26  ;;  %v633_v33 = vmul.f32 %v617_v27, %v617_v27  ;;  %v634_v35 = vmul.f32 %v618_v29, %v618_v29 }
 0x195   :  { %v635_v44 = vmul.f32 %v619_v32, %v619_v32  ;;  %v636_v48 = vmul.f32 %v620_v34, %v620_v34  ;;  %v623_v51 = vsub.f32 %v1246_v52, %v1278_v24  ;;  %v637_v53 = vmul.f32 %v621_v42, %v621_v42 }
 0x196   :  { %v647_v37 = vsel %vm579_vm3, %v631_v30, 0.0  ;;  %v648_v40 = vsel %vm579_vm3, %v632_v31, 0.0  ;;  %v650_v45 = vsel %vm579_vm3, %v633_v33, 0.0  ;;  %v652_v49 = vsel %vm579_vm3, %v634_v35, 0.0 }
 0x197   :  { %v649_v41 = vadd.f32 %v648_v40, %v647_v37  ;;  %v654_v56 = vsel %vm579_vm3, %v635_v44, 0.0  ;;  %v624_v58 = vsub.f32 %v1250_v54, %v1278_v24  ;;  %v638_v60 = vmul.f32 %v622_v47, %v622_v47 }
 0x198   :  { %v656_v61 = vsel %vm579_vm3, %v636_v48, 0.0  ;;  %v625_v63 = vsub.f32 %v1252_v55, %v1278_v24  ;;  %v639_v0 = vmul.f32 %v623_v51, %v623_v51  ;;  %v658_v1 = vsel %vm579_vm3, %v637_v53, 0.0  ;;  %v685_v53 = vld [vmem:[%s1467_s3] sm:$0xf] }
 0x199   :  { %v651_v46 = vadd.f32 %v650_v45, %v649_v41  ;;  %v626_v3 = vsub.f32 %v1256_v59, %v1278_v24  ;;  %v640_v6 = vmul.f32 %v624_v58, %v624_v58  ;;  %v660_v9 = vsel %vm579_vm3, %v638_v60, 0.0 }
 0x19a   :  { %v627_v12 = vsub.f32 %v1262_v4, %v1278_v24  ;;  %v641_v14 = vmul.f32 %v625_v63, %v625_v63  ;;  %v662_v15 = vsel %vm579_vm3, %v639_v0, 0.0  ;;  %v628_v17 = vsub.f32 %v1266_v7, %v1278_v24 }
 0x19b   :  { %v653_v50 = vadd.f32 %v652_v49, %v651_v46  ;;  %v642_v18 = vmul.f32 %v626_v3, %v626_v3  ;;  %v664_v19 = vsel %vm579_vm3, %v640_v6, 0.0  ;;  %v629_v21 = vsub.f32 %v1268_v8, %v1278_v24  ;;  %v681_v49 = vld [vmem:[%s1466_s2] sm:$0xf] }
 0x19c   :  { %v643_v22 = vmul.f32 %v627_v12, %v627_v12  ;;  %v666_v5 = vsel %vm579_vm3, %v641_v14, 0.0  ;;  %v630_v27 = vsub.f32 %v1272_v13, %v1278_v24  ;;  %v644_v29 = vmul.f32 %v628_v17, %v628_v17 }
 0x19d   :  { %v655_v57 = vadd.f32 %v654_v56, %v653_v50  ;;  %v668_v30 = vsel %vm579_vm3, %v642_v18, 0.0  ;;  %v645_v32 = vmul.f32 %v629_v21, %v629_v21 }
 0x19e   :  { %v670_v33 = vsel %vm579_vm3, %v643_v22, 0.0  ;;  %v646_v35 = vmul.f32 %v630_v27, %v630_v27  ;;  %v672_v37 = vsel %vm579_vm3, %v644_v29, 0.0 }
 0x19f   :  { %v657_v62 = vadd.f32 %v656_v61, %v655_v57  ;;  %v674_v41 = vsel %vm579_vm3, %v645_v32, 0.0 }
 0x1a0   :  { %v676_v44 = vsel %vm579_vm3, %v646_v35, 0.0 }
 0x1a1   :  { %v659_v2 = vadd.f32 %v658_v1, %v657_v62 }
 0x1a3   :  { %v661_v10 = vadd.f32 %v660_v9, %v659_v2 }
 0x1a5   :  { %v663_v16 = vadd.f32 %v662_v15, %v661_v10 }
 0x1a7   :  { %v665_v20 = vadd.f32 %v664_v19, %v663_v16 }
 0x1a9   :  { %v667_v26 = vadd.f32 %v666_v5, %v665_v20 }
 0x1ab   :  { %v669_v31 = vadd.f32 %v668_v30, %v667_v26 }
 0x1ad   :  { %v671_v34 = vadd.f32 %v670_v33, %v669_v31 }
 0x1af   :  { %v673_v40 = vadd.f32 %v672_v37, %v671_v34 }
 0x1b1   :  { %v675_v42 = vadd.f32 %v674_v41, %v673_v40 }
 0x1b3   :  { %v677_v45 = vadd.f32 %v676_v44, %v675_v42 }
 0x1b5   :  { %678 = vadd.xlane.f32.xlu0 %v677_v45 }
 0x242   :  { %v679_v46 = vpop.xlane.xlu0 %678 }
 0x243   :  { %v680_v47 = vmul.f32 0.00048828125, %v679_v46 }
 0x245   :  { %v682_v48 = vadd.f32 1e-05, %v680_v47 }
 0x247   :  { %1007 = vrsqrt.f32 %v682_v48 }
 0x251   :  { %v1008_v50 = vpop.eup %1007 }
 0x252   :  { %v684_v51 = vmul.f32 %v1008_v50, %v681_v49 }
 0x254   :  { %690 = vperm.xlu1 %1005, %v684_v51   ;;  %v686_v56 = vmul.f32 %v684_v51, %v1278_v24 }
 0x256   :  { %v687_v57 = vsub.f32 %v685_v53, %v686_v56 }
 0x258   :  { %711 = vperm.xlu1 %1005, %v687_v57  }
 0x2d3   :  { %v691_v58 = vpop.permute.xlu1 %690 }
 0x2d4   :  { %v693_v61 = vmul.f32 %v691_v58, %v1214_v23  ;;  %v694_v62 = vmul.f32 %v691_v58, %v1218_v11  ;;  %v695_v63 = vmul.f32 %v691_v58, %v1220_v25  ;;  %v696_v0 = vmul.f32 %v691_v58, %v1226_v28 }
 0x2d5   :  { %v697_v1 = vmul.f32 %v691_v58, %v1230_v36  ;;  %v698_v24 = vmul.f32 %v691_v58, %v1234_v38  ;;  %v699_v9 = vmul.f32 %v691_v58, %v1236_v39  ;;  %v1043_v23 = vmov 1983009808  }
 0x2d6   :  { %v1350_v11 = vunpack.c.l.s4 %v1043_v23  ;;  %v863_v25 = vlaneseq  ;;  %v700_v28 = vmul.f32 %v691_v58, %v1240_v43  ;;  %v701_v36 = vmul.f32 %v691_v58, %v1246_v52 }
 0x2d7   :  { %v712_v60 = vpop.permute.xlu1 %711  ;;  %v702_v38 = vmul.f32 %v691_v58, %v1250_v54  ;;  %v703_v18 = vmul.f32 %v691_v58, %v1252_v55  ;;  %v704_v19 = vmul.f32 %v691_v58, %v1256_v59  ;;  %v705_v52 = vmul.f32 %v691_v58, %v1262_v4 }
 0x2d8   :  { %v1340_v2 = vadd.f32 %v712_v60, %v693_v61  ;;  %v1342_v3 = vadd.f32 %v712_v60, %v694_v62  ;;  %v1344_v6 = vadd.f32 %v712_v60, %v695_v63  ;;  %v1348_v10 = vadd.f32 %v712_v60, %v696_v0 }
 0x2d9   :  { %v1352_v12 = vadd.f32 %v712_v60, %v697_v1  ;;  %v1356_v14 = vadd.f32 %v712_v60, %v698_v24  ;;  %v1358_v15 = vadd.f32 %v712_v60, %v699_v9  ;;  %v1366_v20 = vadd.f32 %v712_v60, %v700_v28 }
 0x2da   :  { %v746_v39 = vmin.f32 %v1340_v2, 0.0  ;;  %v747_v16 = vmin.f32 %v1342_v3, 0.0  ;;  %v748_v17 = vmin.f32 %v1344_v6, 0.0  ;;  %v749_v43 = vmin.f32 %v1348_v10, 0.0 }
 0x2db   :  { %v706_v21 = vmul.f32 %v691_v58, %v1266_v7  ;;  %v1371_v22 = vadd.f32 %v712_v60, %v701_v36  ;;  %v750_v54 = vmin.f32 %v1352_v12, 0.0  ;;  %v707_v5 = vmul.f32 %v691_v58, %v1268_v8 }
 0x2dc   :  { %v1375_v26 = vadd.f32 %v712_v60, %v702_v38  ;;  %v751_v55 = vmin.f32 %v1356_v14, 0.0  ;;  %v752_v59 = vmin.f32 %v1358_v15, 0.0  ;;  %v1379_v27 = vadd.f32 %v712_v60, %v703_v18 }
 0x2dd   :  { %v762_v29 = vmul.f32 1.442695, %v746_v39  ;;  %v764_v30 = vmul.f32 1.442695, %v747_v16  ;;  %v766_v31 = vmul.f32 1.442695, %v748_v17  ;;  %v708_v4 = vmul.f32 %v691_v58, %v1272_v13 }
 0x2de   :  { %v1382_v7 = vadd.f32 %v712_v60, %v704_v19  ;;  %v753_v32 = vmin.f32 %v1366_v20, 0.0  ;;  %v768_v33 = vmul.f32 1.442695, %v749_v43  ;;  %v1385_v34 = vadd.f32 %v712_v60, %v705_v52 }
 0x2df   :  { %v754_v8 = vmin.f32 %v1371_v22, 0.0  ;;  %1009 = vpow2.f32 %v762_v29  ;;  %v770_v35 = vmul.f32 1.442695, %v750_v54  ;;  %v1388_v37 = vadd.f32 %v712_v60, %v706_v21 }
 0x2e0   :  { %v755_v40 = vmin.f32 %v1375_v26, 0.0  ;;  %1011 = vpow2.f32 %v764_v30  ;;  %v772_v41 = vmul.f32 1.442695, %v751_v55  ;;  %v1391_v42 = vadd.f32 %v712_v60, %v707_v5 }
 0x2e1   :  { %v756_v13 = vmin.f32 %v1379_v27, 0.0  ;;  %1013 = vpow2.f32 %v766_v31  ;;  %v774_v44 = vmul.f32 1.442695, %v752_v59  ;;  %v1394_v45 = vadd.f32 %v712_v60, %v708_v4 }
 0x2e2   :  { %v757_v46 = vmin.f32 %v1382_v7, 0.0  ;;  %1015 = vpow2.f32 %v768_v33  ;;  %v776_v47 = vmul.f32 1.442695, %v753_v32  ;;  %v758_v48 = vmin.f32 %v1385_v34, 0.0 }
 0x2e3   :  { %1017 = vpow2.f32 %v770_v35  ;;  %v778_v49 = vmul.f32 1.442695, %v754_v8  ;;  %v864_v50 = vshrl.u32 %v863_v25, 7  ;;  %v759_v51 = vmin.f32 %v1388_v37, 0.0 }
 0x2e4   :  { %1019 = vpow2.f32 %v772_v41  ;;  %v780_v53 = vmul.f32 1.442695, %v755_v40  ;;  %v862_v56 = vunpack.c.0.s8 %v1350_v11  ;;  %v760_v57 = vmin.f32 %v1391_v42, 0.0 }
 0x2e5   :  { %1021 = vpow2.f32 %v774_v44  ;;  %v782_v58 = vmul.f32 1.442695, %v756_v13  ;;  %v761_v60 = vmin.f32 %v1394_v45, 0.0  ;;  %v784_v61 = vmul.f32 1.442695, %v757_v46 }
 0x2e6   :  { %1023 = vpow2.f32 %v776_v47  ;;  %v786_v62 = vmul.f32 1.442695, %v758_v48  ;;  %v788_v63 = vmul.f32 1.442695, %v759_v51  ;;  %v1402_v1 = vsub.s32 %v862_v56, %v864_v50 }
 0x2e7   :  { %1025 = vpow2.f32 %v778_v49  ;;  %v790_v24 = vmul.f32 1.442695, %v760_v57  ;;  %vm730_vm4 = vcmp.gt.f32.partialorder %v1340_v2, 0.0  ;;  %v792_v23 = vmul.f32 1.442695, %v761_v60 }
 0x2e8   :  { %1027 = vpow2.f32 %v780_v53  ;;  %vm731_vm5 = vcmp.gt.f32.partialorder %v1342_v3, 0.0  ;;  %vm732_vm6 = vcmp.gt.f32.partialorder %v1344_v6, 0.0  ;;  %vm733_vm7 = vcmp.gt.f32.partialorder %v1348_v10, 0.0 }
 0x2e9   :  { %v1010_v0 = vpop.eup %1009  ;;  %1029 = vpow2.f32 %v782_v58  ;;  %vm734_vm8 = vcmp.gt.f32.partialorder %v1352_v12, 0.0  ;;  %vm735_vm9 = vcmp.gt.f32.partialorder %v1356_v14, 0.0  ;;  %vm736_vm10 = vcmp.gt.f32.partialorder %v1358_v15, 0.0 }
 0x2ea   :  { %v1012_v9 = vpop.eup %1011  ;;  %1031 = vpow2.f32 %v784_v61  ;;  %v978_v11 = vadd.f32 -1.0, %v1010_v0  ;;  %vm737_vm11 = vcmp.gt.f32.partialorder %v1366_v20, 0.0  ;;  %vm738_vm12 = vcmp.gt.f32.partialorder %v1371_v22, 0.0 }
 0x2eb   :  { %v1014_v25 = vpop.eup %1013  ;;  %1033 = vpow2.f32 %v786_v62  ;;  %v979_v28 = vadd.f32 -1.0, %v1012_v9  ;;  %vm739_vm13 = vcmp.gt.f32.partialorder %v1375_v26, 0.0  ;;  %vm740_vm14 = vcmp.gt.f32.partialorder %v1379_v27, 0.0 }
 0x2ec   :  { %v1016_v36 = vpop.eup %1015  ;;  %1035 = vpow2.f32 %v788_v63  ;;  %v980_v38 = vadd.f32 -1.0, %v1014_v25  ;;  %v810_v39 = vsel %vm730_vm4, %v1340_v2, %v978_v11  ;;  %vm741_vm15 = vcmp.gt.f32.partialorder %v1382_v7, 0.0 }
 0x2ed   :  { %v1018_v16 = vpop.eup %1017  ;;  %1037 = vpow2.f32 %v790_v24  ;;  %v981_v17 = vadd.f32 -1.0, %v1016_v36  ;;  %v811_v18 = vsel %vm731_vm5, %v1342_v3, %v979_v28  ;;  %vm742_vm0 = vcmp.gt.f32.partialorder %v1385_v34, 0.0 }
 0x2ee   :  { %v1020_v19 = vpop.eup %1019  ;;  %1039 = vpow2.f32 %v792_v23  ;;  %v982_v43 = vadd.f32 -1.0, %v1018_v16  ;;  %v812_v52 = vsel %vm732_vm6, %v1344_v6, %v980_v38  ;;  %v994_v21 = vpack.c.bf16 %v811_v18, %v810_v39 }
 0x2ef   :  { %v1022_v54 = vpop.eup %1021  ;;  %v983_v2 = vadd.f32 -1.0, %v1020_v19  ;;  %v813_v5 = vsel %vm733_vm7, %v1348_v10, %v981_v17  ;;  %vm743_vm1 = vcmp.gt.f32.partialorder %v1388_v37, 0.0  ;;  %vm744_vm2 = vcmp.gt.f32.partialorder %v1391_v42, 0.0 }
 0x2f0   :  { %v1024_v55 = vpop.eup %1023  ;;  %v984_v3 = vadd.f32 -1.0, %v1022_v54  ;;  %v814_v59 = vsel %vm734_vm8, %v1352_v12, %v982_v43  ;;  %v995_v29 = vpack.c.bf16 %v813_v5, %v812_v52  ;;  %v866_v6 = vrot.slane %v994_v21, %v1402_v1 }
 0x2f1   :  { %v1026_v30 = vpop.eup %1025  ;;  %v985_v31 = vadd.f32 -1.0, %v1024_v55  ;;  %v815_v4 = vsel %vm735_vm9, %v1356_v14, %v983_v2  ;;  %vm745_vm3 = vcmp.gt.f32.partialorder %v1394_v45, 0.0 }
 0x2f2   :  { %v1028_v32 = vpop.eup %1027  ;;  %v986_v33 = vadd.f32 -1.0, %v1026_v30  ;;  %v816_v10 = vsel %vm736_vm10, %v1358_v15, %v984_v3  ;;  %v873_v8 = vrot.slane %v995_v29, %v1402_v1  ;;  %v996_v35 = vpack.c.bf16 %v815_v4, %v814_v59 }
 0x2f3   :  { %v1030_v40 = vpop.eup %1029  ;;  %v987_v12 = vadd.f32 -1.0, %v1028_v32  ;;  %v817_v41 = vsel %vm737_vm11, %v1366_v20, %v985_v31 }
 0x2f4   :  { %v1032_v13 = vpop.eup %1031  ;;  %v988_v44 = vadd.f32 -1.0, %v1030_v40  ;;  %v818_v14 = vsel %vm738_vm12, %v1371_v22, %v986_v33  ;;  %v874_v46 = vcombine.low %v866_v6, %v873_v8  ;;  %v997_v47 = vpack.c.bf16 %v817_v41, %v816_v10 }
 0x2f5   :  { %v1034_v15 = vpop.eup %1033  ;;  %v989_v48 = vadd.f32 -1.0, %v1032_v13  ;;  %v819_v49 = vsel %vm739_vm13, %v1375_v26, %v987_v12  ;;  %v883_v50 = vrot.slane %v996_v35, %v1402_v1 }
 0x2f6   :  { %v1036_v51 = vpop.eup %1035  ;;  %v990_v53 = vadd.f32 -1.0, %v1034_v15  ;;  %v820_v20 = vsel %vm740_vm14, %v1379_v27, %v988_v44  ;;  %v890_v56 = vrot.slane %v997_v47, %v1402_v1  ;;  %v998_v57 = vpack.c.bf16 %v819_v49, %v818_v14  ;;  %930 = vst [vmem:[%s1468_s4] sm:$0xff] %v874_v46 }
 0x2f7   :  { %v1038_v22 = vpop.eup %1037  ;;  %v991_v58 = vadd.f32 -1.0, %v1036_v51  ;;  %v821_v26 = vsel %vm741_vm15, %v1382_v7, %v989_v48 }
 0x2f8   :  { %v1040_v60 = vpop.eup %1039  ;;  %v992_v61 = vadd.f32 -1.0, %v1038_v22  ;;  %v822_v62 = vsel %vm742_vm0, %v1385_v34, %v990_v53  ;;  %v891_v27 = vcombine.low %v883_v50, %v890_v56  ;;  %v999_v63 = vpack.c.bf16 %v821_v26, %v820_v20 }
 0x2f9   :  { %v993_v0 = vadd.f32 -1.0, %v1040_v60  ;;  %v823_v24 = vsel %vm743_vm1, %v1388_v37, %v991_v58  ;;  %v900_v9 = vrot.slane %v998_v57, %v1402_v1 }
 0x2fa   :  { %v824_v23 = vsel %vm744_vm2, %v1391_v42, %v992_v61  ;;  %v907_v11 = vrot.slane %v999_v63, %v1402_v1  ;;  %v1000_v7 = vpack.c.bf16 %v823_v24, %v822_v62  ;;  %931 = vst [vmem:[%s1468_s4 + $0x8] sm:$0xff] %v891_v27 }
 0x2fb   :  { %v825_v34 = vsel %vm745_vm3, %v1394_v45, %v993_v0 }
 0x2fc   :  { %v908_v25 = vcombine.low %v900_v9, %v907_v11  ;;  %v1001_v28 = vpack.c.bf16 %v825_v34, %v824_v23  ;;  %v917_v36 = vrot.slane %v1000_v7, %v1402_v1 }
 0x2fe   :  { %v924_v37 = vrot.slane %v1001_v28, %v1402_v1  ;;  %932 = vst [vmem:[%s1468_s4 + $0x10] sm:$0xff] %v908_v25 }
 0x300   :  { %v925_v42 = vcombine.low %v917_v36, %v924_v37 }
 0x302   :  { %933 = vst [vmem:[%s1468_s4 + $0x18] sm:$0xff] %v925_v42 }

// kernel: parallel_model.7
= control target key start
LH: loop header
LB: loop body
LE: loop exit
PB: predicated region body
PF: predicated region fallthrough
CT: control target
= control target key end

     0   :  { %v1009_v0 = vmov 0   ;;  %v1010_v9 = vmov 1   ;;  %v1011_v45 = vmov 1983009808   ;;  %v856_v42 = vlaneseq  ;;  %s2076_s3 = inlined_call_operand.vmem [shape: f32[54,1], index: 3, kind: input, shape index: {}]   ;;  %s2077_s1 = inlined_call_operand.vmem [shape: f32[4,2], index: 1, kind: input, shape index: {}]   ;;  %s2078_s2 = inlined_call_operand.vmem [shape: bf16[54,2048], index: 2, kind: input, shape index: {}]   ;;  %s2079_s0 = inlined_call_operand.vmem [shape: bf16[4,2048], index: 0, kind: input, shape index: {}]   ;;  %s2080_s4 = inlined_call_operand.vmem [shape: bf16[4,2048], index: 4, kind: output, shape index: {}]  }
   0x1   :  { %943 = vset.pattern.permute.xlu1 %v1009_v0  ;;  %942 = vset.pattern.permute.xlu0 %v1009_v0  ;;  %v187_v1 = vld [vmem:[%s2076_s3 + $0x10] sm:$0xff]  ;;  %v185_v2 = vld [vmem:[%s2076_s3] sm:$0xff]  ;;  %v188_v3 = vld [vmem:[%s2076_s3 + $0x18] sm:$0xff]  ;;  %v854_v51 = vunpack.c.l.s4 %v1011_v45  ;;  %vm344_vm0 = vcmask 1045504  }
   0x2   :  { %204 = vperm.xlu1 %943, %v187_v1   ;;  %194 = vperm.xlu0 %942, %v185_v2   ;;  %v186_v4 = vld [vmem:[%s2076_s3 + $0x8] sm:$0xff]  ;;  %v189_v6 = vld [vmem:[%s2076_s3 + $0x20] sm:$0xff]  ;;  %v191_v7 = vld [vmem:[%s2076_s3 + $0x30] sm:$0x3f]  ;;  %v857_v27 = vshrl.u32 %v856_v42, 7 }
   0x3   :  { %v190_v5 = vld [vmem:[%s2076_s3 + $0x28] sm:$0xff]  ;;  %v661_v8 = vld [vmem:[%s2077_s1] sm:$0xf]  ;;  %v1074_v12 = vld [vmem:[%s2078_s2 + $0x10] sm:$0xff]  ;;  %v855_v18 = vunpack.c.0.s8 %v854_v51 }
   0x4   :  { %v1064_v10 = vld [vmem:[%s2078_s2] sm:$0xff]  ;;  %v1069_v11 = vld [vmem:[%s2078_s2 + $0x8] sm:$0xff]  ;;  %v1079_v13 = vld [vmem:[%s2078_s2 + $0x18] sm:$0xff]  ;;  %v2191_v46 = vunpack.c.l.bf16 %v1074_v12 }
   0x5   :  { %v1084_v14 = vld [vmem:[%s2078_s2 + $0x40] sm:$0xff]  ;;  %v1089_v15 = vld [vmem:[%s2078_s2 + $0x48] sm:$0xff]  ;;  %v1094_v16 = vld [vmem:[%s2078_s2 + $0x50] sm:$0xff]  ;;  %v2188_v42 = vunpack.c.h.bf16 %v1064_v10 }
   0x6   :  { %209 = vperm.xlu1 %943, %v188_v3   ;;  %199 = vperm.xlu0 %942, %v186_v4   ;;  %v1101_v19 = vld [vmem:[%s2078_s2 + $0x58] sm:$0xff]  ;;  %v1106_v20 = vld [vmem:[%s2078_s2 + $0x80] sm:$0xff]  ;;  %v1115_v25 = vld [vmem:[%s2078_s2 + $0x88] sm:$0xff] }
   0x7   :  { %v1120_v26 = vld [vmem:[%s2078_s2 + $0x90] sm:$0xff]  ;;  %v1129_v31 = vld [vmem:[%s2078_s2 + $0x98] sm:$0xff]  ;;  %v1134_v32 = vld [vmem:[%s2078_s2 + $0xc0] sm:$0xff] }
   0x8   :  { %v1143_v37 = vld [vmem:[%s2078_s2 + $0xc8] sm:$0xff]  ;;  %v1148_v38 = vld [vmem:[%s2078_s2 + $0xd0] sm:$0xff]  ;;  %v1157_v43 = vld [vmem:[%s2078_s2 + $0xd8] sm:$0xff] }
   0x9   :  { %v1162_v44 = vld [vmem:[%s2078_s2 + $0x100] sm:$0xff]  ;;  %v1171_v49 = vld [vmem:[%s2078_s2 + $0x108] sm:$0xff]  ;;  %v1176_v50 = vld [vmem:[%s2078_s2 + $0x110] sm:$0xff] }
   0xa   :  { %219 = vperm.xlu1 %943, %v190_v5   ;;  %214 = vperm.xlu0 %942, %v189_v6   ;;  %v1185_v55 = vld [vmem:[%s2078_s2 + $0x118] sm:$0xff]  ;;  %v1190_v56 = vld [vmem:[%s2078_s2 + $0x140] sm:$0xff]  ;;  %v1199_v61 = vld [vmem:[%s2078_s2 + $0x148] sm:$0xff] }
   0xb   :  { %v1204_v62 = vld [vmem:[%s2078_s2 + $0x150] sm:$0xff]  ;;  %v1213_v3 = vld [vmem:[%s2078_s2 + $0x158] sm:$0xff]  ;;  %v1218_v4 = vld [vmem:[%s2078_s2 + $0x180] sm:$0x77] }
   0xc   :  { %v1232_v2 = vld [vmem:[%s2078_s2 + $0x190] sm:$0x77]  ;;  %v1250_v5 = vld [vmem:[%s2079_s0] sm:$0xff]  ;;  %v1259_v63 = vld [vmem:[%s2079_s0 + $0x8] sm:$0xff] }
   0xd   :  { %2154 = vst [vmem:[#allocation2_spill] sm:$0xff] %v1250_v5  ;;  %2155 = vst [vmem:[#allocation3_spill] sm:$0xff] %v1259_v63  ;;  %v1264_v59 = vld [vmem:[%s2078_s2 + $0x20] sm:$0xff]  ;;  %v1273_v58 = vld [vmem:[%s2078_s2 + $0x28] sm:$0xff] }
   0xe   :  { %224 = vperm.xlu0 %942, %v191_v7   ;;  %664 = vperm.xlu1 %943, %v661_v8   ;;  %2156 = vst [vmem:[#allocation4_spill] sm:$0xff] %v1264_v59  ;;  %2157 = vst [vmem:[#allocation5_spill] sm:$0xff] %v1273_v58  ;;  %v1278_v0 = vld [vmem:[%s2078_s2 + $0x30] sm:$0xff]  ;;  %v1287_v1 = vld [vmem:[%s2078_s2 + $0x38] sm:$0xff]  ;;  %v2237_v58 = vunpack.c.h.bf16 %v1199_v61 }
   0xf   :  { %2158 = vst [vmem:[#allocation6_spill] sm:$0xff] %v1278_v0  ;;  %2159 = vst [vmem:[#allocation7_spill] sm:$0xff] %v1287_v1  ;;  %v1292_v54 = vld [vmem:[%s2078_s2 + $0x60] sm:$0xff]  ;;  %v1299_v7 = vld [vmem:[%s2078_s2 + $0x68] sm:$0xff]  ;;  %v2232_v1 = vunpack.c.h.bf16 %v1185_v55  ;;  %v2235_v0 = vunpack.c.h.bf16 %v1190_v56 }
  0x10   :  { %2160 = vst [vmem:[#allocation8_spill] sm:$0xff] %v1292_v54  ;;  %2161 = vst [vmem:[#allocation9_spill] sm:$0xff] %v1299_v7  ;;  %v1304_v6 = vld [vmem:[%s2078_s2 + $0x70] sm:$0xff]  ;;  %v1311_v53 = vld [vmem:[%s2078_s2 + $0x78] sm:$0xff]  ;;  %v2228_v54 = vunpack.c.h.bf16 %v1171_v49 }
  0x11   :  { %2162 = vst [vmem:[#allocation10_spill] sm:$0xff] %v1304_v6  ;;  %2163 = vst [vmem:[#allocation11_spill] sm:$0xff] %v1311_v53  ;;  %v1316_v57 = vld [vmem:[%s2078_s2 + $0xa0] sm:$0xff]  ;;  %v1325_v40 = vld [vmem:[%s2078_s2 + $0xa8] sm:$0xff]  ;;  %v2222_v53 = vunpack.c.l.bf16 %v1157_v43  ;;  %v2225_v6 = vunpack.c.l.bf16 %v1162_v44 }
  0x12   :  { %944 = vset.pattern.permute.xlu0 %v1010_v9  ;;  %v1227_v9 = vld [vmem:[%s2078_s2 + $0x188] sm:$0x77]  ;;  %2164 = vst [vmem:[#allocation12_spill] sm:$0xff] %v1316_v57  ;;  %2165 = vst [vmem:[#allocation13_spill] sm:$0xff] %v1325_v40  ;;  %v1330_v34 = vld [vmem:[%s2078_s2 + $0xb0] sm:$0xff]  ;;  %v2215_v40 = vunpack.c.h.bf16 %v1134_v32  ;;  %v2220_v57 = vunpack.c.l.bf16 %v1148_v38 }
  0x13   :  { %668 = vperm.xlu0 %944, %v661_v8   ;;  %v1241_v8 = vld [vmem:[%s2078_s2 + $0x198] sm:$0x77]  ;;  %2166 = vst [vmem:[#allocation14_spill] sm:$0xff] %v1330_v34  ;;  %v1344_v30 = vld [vmem:[%s2078_s2 + $0xe0] sm:$0xff]  ;;  %v1353_v35 = vld [vmem:[%s2078_s2 + $0xe8] sm:$0xff]  ;;  %v2213_v34 = vunpack.c.h.bf16 %v1101_v19  ;;  %v2246_v59 = vunpack.c.h.bf16 %v1227_v9 }
  0x14   :  { %v1339_v60 = vld [vmem:[%s2078_s2 + $0xb8] sm:$0xff]  ;;  %2168 = vst [vmem:[#allocation16_spill] sm:$0xff] %v1344_v30  ;;  %2169 = vst [vmem:[#allocation17_spill] sm:$0xff] %v1353_v35  ;;  %v1361_v29 = vld [vmem:[%s2078_s2 + $0xf0] sm:$0xff] }
  0x15   :  { %2167 = vst [vmem:[#allocation15_spill] sm:$0xff] %v1339_v60  ;;  %2170 = vst [vmem:[#allocation18_spill] sm:$0xff] %v1361_v29  ;;  %v1366_v36 = vld [vmem:[%s2078_s2 + $0xf8] sm:$0xff]  ;;  %v1375_v48 = vld [vmem:[%s2078_s2 + $0x120] sm:$0xff]  ;;  %v2211_v60 = vunpack.c.h.bf16 %v1094_v16 }
  0x16   :  { %2171 = vst [vmem:[#allocation19_spill] sm:$0xff] %v1366_v36  ;;  %2172 = vst [vmem:[#allocation20_spill] sm:$0xff] %v1375_v48  ;;  %v1380_v47 = vld [vmem:[%s2078_s2 + $0x128] sm:$0xff]  ;;  %v1389_v41 = vld [vmem:[%s2078_s2 + $0x130] sm:$0xff] }
  0x17   :  { %2173 = vst [vmem:[#allocation21_spill] sm:$0xff] %v1380_v47  ;;  %2174 = vst [vmem:[#allocation22_spill] sm:$0xff] %v1389_v41  ;;  %v1394_v28 = vld [vmem:[%s2078_s2 + $0x138] sm:$0xff]  ;;  %v1401_v52 = vld [vmem:[%s2078_s2 + $0x160] sm:$0xff]  ;;  %v1468_v41 = vsub.s32 %v855_v18, %v857_v27  ;;  %v2189_v47 = vunpack.c.l.bf16 %v1069_v11  ;;  %v2190_v27 = vunpack.c.h.bf16 %v1069_v11  ;;  %v2194_v11 = vunpack.c.h.bf16 %v1079_v13 }
  0x18   :  { %2175 = vst [vmem:[#allocation23_spill] sm:$0xff] %v1394_v28  ;;  %2176 = vst [vmem:[#allocation24_spill] sm:$0xff] %v1401_v52  ;;  %v1410_v23 = vld [vmem:[%s2078_s2 + $0x168] sm:$0xff]  ;;  %v1415_v39 = vld [vmem:[%s2078_s2 + $0x170] sm:$0xff]  ;;  %v2187_v28 = vunpack.c.l.bf16 %v1064_v10  ;;  %v2192_v10 = vunpack.c.h.bf16 %v1074_v12 }
  0x19   :  { %2177 = vst [vmem:[#allocation25_spill] sm:$0xff] %v1410_v23  ;;  %2178 = vst [vmem:[#allocation26_spill] sm:$0xff] %v1415_v39  ;;  %v1424_v24 = vld [vmem:[%s2078_s2 + $0x178] sm:$0xff]  ;;  %v1429_v22 = vld [vmem:[%s2078_s2 + $0x1a0] sm:$0x77]  ;;  %v2206_v39 = vunpack.c.l.bf16 %v1084_v14  ;;  %v2208_v23 = vunpack.c.l.bf16 %v1089_v15 }
  0x1a   :  { %2179 = vst [vmem:[#allocation27_spill] sm:$0xff] %v1424_v24  ;;  %2180 = vst [vmem:[#allocation28_spill] sm:$0xff] %v1429_v22  ;;  %v1438_v17 = vld [vmem:[%s2078_s2 + $0x1a8] sm:$0x77]  ;;  %v1443_v48 = vld [vmem:[%s2078_s2 + $0x1b0] sm:$0x77] }
  0x1b   :  { %2181 = vst [vmem:[#allocation29_spill] sm:$0xff] %v1438_v17  ;;  %2182 = vst [vmem:[#allocation30_spill] sm:$0xff] %v1443_v48  ;;  %v1450_v33 = vld [vmem:[%s2078_s2 + $0x1b8] sm:$0x77] }
  0x1c   :  { %2183 = vst [vmem:[#allocation31_spill] sm:$0xff] %v1450_v33  ;;  %2186 = vst [vmem:[#allocation34_spill] sm:$0xff] %v1468_v41  ;;  %v2195_v41 = vunpack.c.l.bf16 %v1106_v20  ;;  %v2196_v33 = vunpack.c.h.bf16 %v1106_v20 }
  0x81   :  { %v1464_v52 = vpop.permute.xlu1 %204  ;;  %v1466_v45 = vpop.permute.xlu0 %194 }
  0x82   :  { %2184 = vst [vmem:[#allocation32_spill] sm:$0xff] %v1464_v52  ;;  %2185 = vst [vmem:[#allocation33_spill] sm:$0xff] %v1466_v45  ;;  %v227_v29 = vmul.f32 %v1466_v45, %v2187_v28  ;;  %v1479_v51 = vmul.f32 %v1466_v45, %v2188_v42  ;;  %v1484_v18 = vmul.f32 %v1466_v45, %v2189_v47  ;;  %v2193_v42 = vunpack.c.l.bf16 %v1079_v13 }
  0x83   :  { %v1489_v21 = vmul.f32 %v1466_v45, %v2190_v27  ;;  %v1494_v36 = vmul.f32 %v1466_v45, %v2191_v46  ;;  %v1499_v28 = vmul.f32 %v1466_v45, %v2192_v10  ;;  %v1509_v27 = vmul.f32 %v1466_v45, %v2194_v11 }
  0x84   :  { %v1504_v47 = vmul.f32 %v1466_v45, %v2193_v42  ;;  %v259_v46 = vmul.f32 %v1464_v52, %v2195_v41  ;;  %v260_v12 = vmul.f32 %v1464_v52, %v2196_v33  ;;  %v2197_v10 = vunpack.c.l.bf16 %v1115_v25 }
  0x85   :  { %v2198_v42 = vunpack.c.h.bf16 %v1115_v25  ;;  %v1527_v11 = vpop.permute.xlu1 %209  ;;  %v1529_v17 = vpop.permute.xlu0 %199  ;;  %v2201_v41 = vunpack.c.l.bf16 %v1120_v26  ;;  %v2202_v33 = vunpack.c.h.bf16 %v1120_v26  ;;  %v2207_v26 = vunpack.c.h.bf16 %v1084_v14 }
  0x86   :  { %v1520_v48 = vmul.f32 %v1464_v52, %v2197_v10  ;;  %2199 = vst [vmem:[#allocation35_spill] sm:$0xff] %v1527_v11  ;;  %2200 = vst [vmem:[#allocation36_spill] sm:$0xff] %v1529_v17  ;;  %v2203_v10 = vunpack.c.l.bf16 %v1129_v31  ;;  %v245_v35 = vmul.f32 %v1529_v17, %v2208_v23  ;;  %v2212_v14 = vunpack.c.l.bf16 %v1101_v19 }
  0x87   :  { %v1525_v13 = vmul.f32 %v1464_v52, %v2198_v42  ;;  %v1534_v20 = vmul.f32 %v1464_v52, %v2201_v41  ;;  %v1539_v22 = vmul.f32 %v1464_v52, %v2202_v33  ;;  %v2204_v42 = vunpack.c.h.bf16 %v1129_v31 }
  0x88   :  { %v1544_v25 = vmul.f32 %v1464_v52, %v2203_v10  ;;  %v243_v41 = vmul.f32 %v1529_v17, %v2206_v39  ;;  %v244_v33 = vmul.f32 %v1529_v17, %v2207_v26  ;;  %v2209_v10 = vunpack.c.h.bf16 %v1089_v15 }
  0x89   :  { %v1549_v24 = vmul.f32 %v1464_v52, %v2204_v42  ;;  %v2210_v42 = vunpack.c.l.bf16 %v1094_v16  ;;  %v248_v39 = vmul.f32 %v1529_v17, %v2211_v60  ;;  %v249_v26 = vmul.f32 %v1529_v17, %v2212_v14  ;;  %v1589_v19 = vpop.permute.xlu1 %219 }
  0x8a   :  { %v246_v31 = vmul.f32 %v1529_v17, %v2209_v10  ;;  %v1575_v23 = vmul.f32 %v1529_v17, %v2213_v34  ;;  %v2214_v15 = vunpack.c.l.bf16 %v1134_v32  ;;  %v2216_v16 = vunpack.c.l.bf16 %v1143_v37  ;;  %2218 = vst [vmem:[#allocation38_spill] sm:$0xff] %v1589_v19  ;;  %v1591_v34 = vpop.permute.xlu0 %214 }
  0x8b   :  { %2205 = vst [vmem:[#allocation37_spill] sm:$0xff] %v1549_v24  ;;  %v247_v30 = vmul.f32 %v1529_v17, %v2210_v42  ;;  %v276_v42 = vmul.f32 %v1527_v11, %v2215_v40  ;;  %v2217_v52 = vunpack.c.h.bf16 %v1143_v37  ;;  %2219 = vst [vmem:[#allocation39_spill] sm:$0xff] %v1591_v34  ;;  %v2221_v32 = vunpack.c.h.bf16 %v1148_v38 }
  0x8c   :  { %v275_v10 = vmul.f32 %v1527_v11, %v2214_v15  ;;  %v277_v60 = vmul.f32 %v1527_v11, %v2216_v16  ;;  %v279_v15 = vmul.f32 %v1527_v11, %v2220_v57  ;;  %v281_v16 = vmul.f32 %v1527_v11, %v2222_v53 }
  0x8d   :  { %v278_v14 = vmul.f32 %v1527_v11, %v2217_v52  ;;  %v280_v40 = vmul.f32 %v1527_v11, %v2221_v32  ;;  %v2223_v37 = vunpack.c.h.bf16 %v1157_v43  ;;  %v291_v7 = vmul.f32 %v1591_v34, %v2225_v6 }
  0x8e   :  { %v2226_v17 = vunpack.c.h.bf16 %v1162_v44  ;;  %v2227_v38 = vunpack.c.l.bf16 %v1171_v49  ;;  %v294_v53 = vmul.f32 %v1591_v34, %v2228_v54  ;;  %v2229_v43 = vunpack.c.l.bf16 %v1176_v50 }
  0x8f   :  { %v1605_v52 = vmul.f32 %v1527_v11, %v2223_v37  ;;  %v2230_v11 = vunpack.c.h.bf16 %v1176_v50  ;;  %v2231_v44 = vunpack.c.l.bf16 %v1185_v55  ;;  %v2234_v49 = vunpack.c.l.bf16 %v1190_v56  ;;  %v1645_v55 = vpop.permute.xlu0 %224 }
  0x90   :  { %v292_v57 = vmul.f32 %v1591_v34, %v2226_v17  ;;  %v293_v32 = vmul.f32 %v1591_v34, %v2227_v38  ;;  %v295_v37 = vmul.f32 %v1591_v34, %v2229_v43  ;;  %v1631_v38 = vmul.f32 %v1591_v34, %v2232_v1 }
  0x91   :  { %2224 = vst [vmem:[#allocation40_spill] sm:$0xff] %v1605_v52  ;;  %v296_v6 = vmul.f32 %v1591_v34, %v2230_v11  ;;  %v297_v17 = vmul.f32 %v1591_v34, %v2231_v44  ;;  %v307_v54 = vmul.f32 %v1589_v19, %v2234_v49  ;;  %v308_v43 = vmul.f32 %v1589_v19, %v2235_v0 }
  0x92   :  { %2233 = vst [vmem:[#allocation41_spill] sm:$0xff] %v1631_v38  ;;  %v2236_v50 = vunpack.c.l.bf16 %v1199_v61  ;;  %v310_v44 = vmul.f32 %v1589_v19, %v2237_v58  ;;  %v2238_v1 = vunpack.c.l.bf16 %v1204_v62  ;;  %v2239_v49 = vunpack.c.h.bf16 %v1204_v62 }
  0x93   :  { %v2240_v0 = vunpack.c.l.bf16 %v1213_v3  ;;  %v2243_v58 = vunpack.c.l.bf16 %v1218_v4  ;;  %v2244_v45 = vunpack.c.h.bf16 %v1218_v4  ;;  %v2245_v62 = vunpack.c.l.bf16 %v1227_v9 }
  0x94   :  { %v309_v11 = vmul.f32 %v1589_v19, %v2236_v50  ;;  %v311_v34 = vmul.f32 %v1589_v19, %v2238_v1  ;;  %v312_v56 = vmul.f32 %v1589_v19, %v2239_v49  ;;  %v2241_v50 = vunpack.c.h.bf16 %v1213_v3 }
  0x95   :  { %v313_v63 = vmul.f32 %v1589_v19, %v2240_v0  ;;  %v323_v5 = vmul.f32 %v1645_v55, %v2243_v58  ;;  %v324_v1 = vmul.f32 %v1645_v55, %v2244_v45  ;;  %v325_v49 = vmul.f32 %v1645_v55, %v2245_v62 }
  0x96   :  { %v1659_v61 = vmul.f32 %v1589_v19, %v2241_v50  ;;  %v326_v0 = vmul.f32 %v1645_v55, %v2246_v59  ;;  %v2247_v3 = vunpack.c.l.bf16 %v1232_v2  ;;  %v2248_v19 = vunpack.c.h.bf16 %v1232_v2 }
  0x97   :  { %v2249_v4 = vunpack.c.l.bf16 %v1241_v8  ;;  %v339_v9 = vadd.f32 %v243_v41, %v227_v29  ;;  %v345_v59 = vsel %vm344_vm0, %v323_v5, 0.0  ;;  %v353_v38 = vadd.f32 %v244_v33, %v1479_v51 }
  0x98   :  { %2242 = vst [vmem:[#allocation42_spill] sm:$0xff] %v1659_v61  ;;  %v327_v50 = vmul.f32 %v1645_v55, %v2247_v3  ;;  %v328_v58 = vmul.f32 %v1645_v55, %v2248_v19  ;;  %v2250_v61 = vunpack.c.h.bf16 %v1241_v8  ;;  %v358_v3 = vsel %vm344_vm0, %v324_v1, 0.0 }
  0x99   :  { %v329_v45 = vmul.f32 %v1645_v55, %v2249_v4  ;;  %v366_v2 = vadd.f32 %v245_v35, %v1484_v18  ;;  %v371_v19 = vsel %vm344_vm0, %v325_v49, 0.0  ;;  %v379_v52 = vadd.f32 %v246_v31, %v1489_v21 }
  0x9a   :  { %v1685_v62 = vmul.f32 %v1645_v55, %v2250_v61  ;;  %v384_v4 = vsel %vm344_vm0, %v326_v0, 0.0  ;;  %v340_v24 = vadd.f32 %v339_v9, %v259_v46  ;;  %v354_v8 = vadd.f32 %v353_v38, %v260_v12 }
  0x9b   :  { %v392_v61 = vadd.f32 %v247_v30, %v1494_v36  ;;  %v397_v29 = vsel %vm344_vm0, %v327_v50, 0.0  ;;  %v367_v5 = vadd.f32 %v366_v2, %v1520_v48  ;;  %v380_v51 = vadd.f32 %v379_v52, %v1525_v13 }
  0x9c   :  { %v405_v41 = vadd.f32 %v248_v39, %v1499_v28  ;;  %v410_v35 = vsel %vm344_vm0, %v328_v58, 0.0  ;;  %v341_v18 = vadd.f32 %v340_v24, %v275_v10  ;;  %v355_v33 = vadd.f32 %v354_v8, %v276_v42 }
  0x9d   :  { %v393_v21 = vadd.f32 %v392_v61, %v1534_v20  ;;  %v418_v31 = vadd.f32 %v249_v26, %v1504_v47  ;;  %v368_v46 = vadd.f32 %v367_v5, %v277_v60  ;;  %v381_v12 = vadd.f32 %v380_v51, %v278_v14  ;;  %v2251_v14 = vld [vmem:[#allocation37_spill] sm:$0xff] }
  0x9e   :  { %v406_v30 = vadd.f32 %v405_v41, %v1539_v22  ;;  %v423_v36 = vsel %vm344_vm0, %v329_v45, 0.0  ;;  %v342_v38 = vadd.f32 %v341_v18, %v291_v7  ;;  %v356_v48 = vadd.f32 %v355_v33, %v292_v57 }
  0x9f   :  { %v394_v1 = vadd.f32 %v393_v21, %v279_v15  ;;  %v419_v13 = vadd.f32 %v418_v31, %v1544_v25  ;;  %v369_v28 = vadd.f32 %v368_v46, %v293_v32  ;;  %v382_v39 = vadd.f32 %v381_v12, %v294_v53  ;;  %v2254_v2 = vld [vmem:[#allocation42_spill] sm:$0xff] }
  0xa0   :  { %v407_v52 = vadd.f32 %v406_v30, %v280_v40  ;;  %v431_v24 = vadd.f32 %v1575_v23, %v1509_v27  ;;  %v343_v20 = vadd.f32 %v342_v38, %v307_v54  ;;  %v357_v10 = vadd.f32 %v356_v48, %v308_v43  ;;  %v2252_v40 = vld [vmem:[#allocation40_spill] sm:$0xff] }
  0xa1   :  { %v395_v47 = vadd.f32 %v394_v1, %v295_v37  ;;  %v420_v26 = vadd.f32 %v419_v13, %v281_v16  ;;  %v370_v42 = vadd.f32 %v369_v28, %v309_v11  ;;  %v383_v60 = vadd.f32 %v382_v39, %v310_v44  ;;  %v2253_v11 = vld [vmem:[#allocation41_spill] sm:$0xff] }
  0xa2   :  { %v408_v22 = vadd.f32 %v407_v52, %v296_v6  ;;  %v432_v49 = vadd.f32 %v431_v24, %v2251_v14  ;;  %v346_v7 = vadd.f32 %v345_v59, %v343_v20  ;;  %v359_v57 = vadd.f32 %v358_v3, %v357_v10 }
  0xa3   :  { %v396_v15 = vadd.f32 %v395_v47, %v311_v34  ;;  %v421_v0 = vadd.f32 %v420_v26, %v297_v17  ;;  %v372_v25 = vadd.f32 %v371_v19, %v370_v42  ;;  %v385_v32 = vadd.f32 %v384_v4, %v383_v60 }
  0xa4   :  { %v409_v53 = vadd.f32 %v408_v22, %v312_v56  ;;  %v433_v50 = vadd.f32 %v432_v49, %v2252_v40  ;;  %v347_v58 = vrot.slane %v346_v7, 4  ;;  %v360_v27 = vrot.slane %v359_v57, 4 }
  0xa5   :  { %v398_v23 = vadd.f32 %v397_v29, %v396_v15  ;;  %v422_v54 = vadd.f32 %v421_v0, %v313_v63  ;;  %v373_v37 = vrot.slane %v372_v25, 4  ;;  %v386_v16 = vrot.slane %v385_v32, 4 }
  0xa6   :  { %v411_v43 = vadd.f32 %v410_v35, %v409_v53  ;;  %v434_v6 = vadd.f32 %v433_v50, %v2253_v11  ;;  %v348_v44 = vadd.f32 %v347_v58, %v346_v7  ;;  %v361_v45 = vadd.f32 %v360_v27, %v359_v57 }
  0xa7   :  { %v399_v9 = vrot.slane %v398_v23, 4  ;;  %v424_v59 = vadd.f32 %v423_v36, %v422_v54  ;;  %v374_v34 = vadd.f32 %v373_v37, %v372_v25  ;;  %v387_v17 = vadd.f32 %v386_v16, %v385_v32  ;;  %v665_v25 = vpop.permute.xlu1 %664 }
  0xa8   :  { %v412_v3 = vrot.slane %v411_v43, 4  ;;  %v435_v56 = vadd.f32 %v434_v6, %v2254_v2  ;;  %v349_v19 = vrot.slane %v348_v44, 2  ;;  %v362_v4 = vrot.slane %v361_v45, 2 }
  0xa9   :  { %v400_v8 = vadd.f32 %v399_v9, %v398_v23  ;;  %v425_v61 = vrot.slane %v424_v59, 4  ;;  %v375_v29 = vrot.slane %v374_v34, 2  ;;  %v388_v63 = vrot.slane %v387_v17, 2  ;;  %v2257_v9 = vld [vmem:[#allocation33_spill] sm:$0xff] }
  0xaa   :  { %v413_v5 = vadd.f32 %v412_v3, %v411_v43  ;;  %v436_v51 = vsel %vm344_vm0, %v1685_v62, 0.0  ;;  %v350_v41 = vadd.f32 %v349_v19, %v348_v44  ;;  %v363_v35 = vadd.f32 %v362_v4, %v361_v45  ;;  %v2255_v44 = vld [vmem:[#allocation4_spill] sm:$0xff] }
  0xab   :  { %v401_v18 = vrot.slane %v400_v8, 2  ;;  %v426_v33 = vadd.f32 %v425_v61, %v424_v59  ;;  %v376_v21 = vadd.f32 %v375_v29, %v374_v34  ;;  %v389_v31 = vadd.f32 %v388_v63, %v387_v17  ;;  %v2258_v17 = vld [vmem:[#allocation2_spill] sm:$0xff] }
  0xac   :  { %v414_v46 = vrot.slane %v413_v5, 2  ;;  %v437_v12 = vadd.f32 %v436_v51, %v435_v56  ;;  %v351_v30 = vrot.slane %v350_v41, 1  ;;  %v364_v36 = vrot.slane %v363_v35, 1 }
  0xad   :  { %v402_v38 = vadd.f32 %v401_v18, %v400_v8  ;;  %v427_v48 = vrot.slane %v426_v33, 2  ;;  %v377_v1 = vrot.slane %v376_v21, 1  ;;  %v390_v13 = vrot.slane %v389_v31, 1  ;;  %v2261_v8 = vld [vmem:[#allocation3_spill] sm:$0xff] }
  0xae   :  { %v415_v28 = vadd.f32 %v414_v46, %v413_v5  ;;  %v438_v39 = vrot.slane %v437_v12, 4  ;;  %v352_v52 = vadd.f32 %v351_v30, %v350_v41  ;;  %v365_v24 = vadd.f32 %v364_v36, %v363_v35  ;;  %v2265_v35 = vld [vmem:[#allocation5_spill] sm:$0xff] }
  0xaf   :  { %v403_v20 = vrot.slane %v402_v38, 1  ;;  %v428_v62 = vadd.f32 %v427_v48, %v426_v33  ;;  %v378_v10 = vadd.f32 %v377_v1, %v376_v21  ;;  %v391_v47 = vadd.f32 %v390_v13, %v389_v31  ;;  %v2271_v1 = vld [vmem:[#allocation7_spill] sm:$0xff] }
  0xb0   :  { %v416_v26 = vrot.slane %v415_v28, 1  ;;  %v439_v42 = vadd.f32 %v438_v39, %v437_v12  ;;  %v548_v14 = vsub.f32 0.0, %v352_v52  ;;  %v549_v49 = vsub.f32 0.0, %v365_v24  ;;  %v2268_v12 = vld [vmem:[#allocation6_spill] sm:$0xff]  ;;  %v2274_v24 = vld [vmem:[#allocation8_spill] sm:$0xff] }
  0xb1   :  { %v404_v60 = vadd.f32 %v403_v20, %v402_v38  ;;  %v429_v22 = vrot.slane %v428_v62, 1  ;;  %v550_v15 = vsub.f32 0.0, %v378_v10  ;;  %v551_v0 = vsub.f32 0.0, %v391_v47 }
  0xb2   :  { %v417_v7 = vadd.f32 %v416_v26, %v415_v28  ;;  %v440_v57 = vrot.slane %v439_v42, 2  ;;  %v564_v40 = vmul.f32 1.442695, %v548_v14  ;;  %v566_v50 = vmul.f32 1.442695, %v549_v49 }
  0xb3   :  { %v430_v32 = vadd.f32 %v429_v22, %v428_v62  ;;  %v552_v53 = vsub.f32 0.0, %v404_v60  ;;  %v568_v23 = vmul.f32 1.442695, %v550_v15  ;;  %v570_v54 = vmul.f32 1.442695, %v551_v0  ;;  %v2276_v62 = vld [vmem:[#allocation36_spill] sm:$0xff] }
  0xb4   :  { %v441_v58 = vadd.f32 %v440_v57, %v439_v42  ;;  %v553_v27 = vsub.f32 0.0, %v417_v7  ;;  %945 = vpow2.f32 %v564_v40  ;;  %v731_v43 = vcombine.low %v665_v25, %v665_v25  ;;  %v2278_v60 = vld [vmem:[#allocation9_spill] sm:$0xff]  ;;  %v2281_v57 = vld [vmem:[#allocation10_spill] sm:$0xff] }
  0xb5   :  { %v554_v37 = vsub.f32 0.0, %v430_v32  ;;  %v572_v16 = vmul.f32 1.442695, %v552_v53  ;;  %947 = vpow2.f32 %v566_v50  ;;  %v2256_v45 = vunpack.c.l.bf16 %v2255_v44  ;;  %v2284_v53 = vld [vmem:[#allocation11_spill] sm:$0xff] }
  0xb6   :  { %v442_v11 = vrot.slane %v441_v58, 1  ;;  %v574_v6 = vmul.f32 1.442695, %v553_v27  ;;  %949 = vpow2.f32 %v568_v23  ;;  %v2259_v3 = vunpack.c.l.bf16 %v2258_v17  ;;  %v2288_v23 = vld [vmem:[#allocation12_spill] sm:$0xff] }
  0xb7   :  { %v1716_v59 = vmul.f32 %v2257_v9, %v2256_v45  ;;  %v576_v34 = vmul.f32 1.442695, %v554_v37  ;;  %v2260_v56 = vunpack.c.h.bf16 %v2258_v17  ;;  %951 = vpow2.f32 %v570_v54  ;;  %v2290_v37 = vld [vmem:[#allocation32_spill] sm:$0xff] }
  0xb8   :  { %v1720_v2 = vmul.f32 %v731_v43, %v2259_v3  ;;  %v443_v4 = vadd.f32 %v442_v11, %v441_v58  ;;  %v2262_v61 = vunpack.c.l.bf16 %v2261_v8  ;;  %v2263_v63 = vunpack.c.h.bf16 %v2261_v8  ;;  %v2295_v3 = vld [vmem:[#allocation14_spill] sm:$0xff] }
  0xb9   :  { %v1724_v19 = vmul.f32 %v731_v43, %v2260_v56  ;;  %953 = vpow2.f32 %v572_v16  ;;  %v2264_v51 = vunpack.c.h.bf16 %v2255_v44  ;;  %v2266_v18 = vunpack.c.l.bf16 %v2265_v35 }
  0xba   :  { %v1728_v29 = vmul.f32 %v731_v43, %v2262_v61  ;;  %v1732_v5 = vmul.f32 %v731_v43, %v2263_v63  ;;  %v2267_v21 = vunpack.c.h.bf16 %v2265_v35  ;;  %v555_v46 = vsub.f32 0.0, %v443_v4  ;;  %v2298_v63 = vld [vmem:[#allocation15_spill] sm:$0xff] }
  0xbb   :  { %v1737_v41 = vmul.f32 %v2257_v9, %v2264_v51  ;;  %v1742_v33 = vmul.f32 %v2257_v9, %v2266_v18  ;;  %955 = vpow2.f32 %v574_v6  ;;  %v2269_v30 = vunpack.c.l.bf16 %v2268_v12  ;;  %v2292_v6 = vld [vmem:[#allocation13_spill] sm:$0xff] }
  0xbc   :  { %v1747_v31 = vmul.f32 %v2257_v9, %v2267_v21  ;;  %v2270_v38 = vunpack.c.h.bf16 %v2268_v12  ;;  %957 = vpow2.f32 %v576_v34  ;;  %v2272_v13 = vunpack.c.l.bf16 %v2271_v1 }
  0xbd   :  { %v1752_v36 = vmul.f32 %v2257_v9, %v2269_v30  ;;  %v2273_v39 = vunpack.c.h.bf16 %v2271_v1  ;;  %v2275_v20 = vunpack.c.l.bf16 %v2274_v24  ;;  %v578_v47 = vmul.f32 1.442695, %v555_v46  ;;  %v2302_v30 = vld [vmem:[#allocation16_spill] sm:$0xff]  ;;  %v2304_v1 = vld [vmem:[#allocation35_spill] sm:$0xff] }
  0xbe   :  { %v1757_v48 = vmul.f32 %v2257_v9, %v2270_v38  ;;  %v1762_v28 = vmul.f32 %v2257_v9, %v2272_v13  ;;  %v2277_v26 = vunpack.c.h.bf16 %v2274_v24  ;;  %v2279_v22 = vunpack.c.l.bf16 %v2278_v60 }
  0xbf   :  { %v1767_v52 = vmul.f32 %v2257_v9, %v2273_v39  ;;  %v1772_v10 = vmul.f32 %v2276_v62, %v2275_v20  ;;  %v2280_v49 = vunpack.c.h.bf16 %v2278_v60  ;;  %v2282_v15 = vunpack.c.l.bf16 %v2281_v57  ;;  %v946_v9 = vpop.eup %945 }
  0xc0   :  { %v1777_v42 = vmul.f32 %v2276_v62, %v2277_v26  ;;  %v1782_v14 = vmul.f32 %v2276_v62, %v2279_v22  ;;  %v2283_v25 = vunpack.c.h.bf16 %v2281_v57  ;;  %v2285_v40 = vunpack.c.l.bf16 %v2284_v53  ;;  %v948_v18 = vpop.eup %947  ;;  %v2309_v57 = vld [vmem:[#allocation18_spill] sm:$0xff] }
  0xc1   :  { %v1787_v7 = vmul.f32 %v2276_v62, %v2280_v49  ;;  %v1792_v0 = vmul.f32 %v2276_v62, %v2282_v15  ;;  %v2286_v58 = vunpack.c.h.bf16 %v2284_v53  ;;  %959 = vpow2.f32 %v578_v47  ;;  %v950_v20 = vpop.eup %949  ;;  %v2306_v47 = vld [vmem:[#allocation17_spill] sm:$0xff] }
  0xc2   :  { %v1797_v32 = vmul.f32 %v2276_v62, %v2283_v25  ;;  %v1802_v50 = vmul.f32 %v2276_v62, %v2285_v40  ;;  %v2289_v54 = vunpack.c.l.bf16 %v2288_v23  ;;  %v2291_v43 = vunpack.c.h.bf16 %v2288_v23  ;;  %v952_v53 = vpop.eup %951 }
  0xc3   :  { %v1807_v27 = vmul.f32 %v2276_v62, %v2286_v58  ;;  %v2293_v44 = vunpack.c.l.bf16 %v2292_v6  ;;  %v2294_v34 = vunpack.c.h.bf16 %v2292_v6  ;;  %v2296_v56 = vunpack.c.l.bf16 %v2295_v3  ;;  %v954_v6 = vpop.eup %953 }
  0xc4   :  { %v1812_v16 = vmul.f32 %v2290_v37, %v2289_v54  ;;  %v1817_v11 = vmul.f32 %v2290_v37, %v2291_v43  ;;  %v2297_v8 = vunpack.c.h.bf16 %v2295_v3  ;;  %v2299_v51 = vunpack.c.l.bf16 %v2298_v63  ;;  %v2312_v54 = vld [vmem:[#allocation19_spill] sm:$0xff]  ;;  %v2316_v3 = vld [vmem:[#allocation20_spill] sm:$0xff] }
  0xc5   :  { %2287 = vst [vmem:[#allocation37_spill] sm:$0xff] %v1807_v27  ;;  %v1822_v45 = vmul.f32 %v2290_v37, %v2293_v44  ;;  %v1827_v17 = vmul.f32 %v2290_v37, %v2294_v34  ;;  %v1832_v4 = vmul.f32 %v2290_v37, %v2296_v56  ;;  %v596_v21 = vadd.f32 1.0, %v946_v9 }
  0xc6   :  { %v1837_v61 = vmul.f32 %v2290_v37, %v2297_v8  ;;  %v1842_v35 = vmul.f32 %v2290_v37, %v2299_v51  ;;  %v2300_v46 = vunpack.c.h.bf16 %v2298_v63  ;;  %v2303_v38 = vunpack.c.l.bf16 %v2302_v30  ;;  %v2318_v8 = vld [vmem:[#allocation39_spill] sm:$0xff]  ;;  %v956_v51 = vpop.eup %955 }
  0xc7   :  { %v2305_v39 = vunpack.c.h.bf16 %v2302_v30  ;;  %v597_v62 = vadd.f32 1.0, %v948_v18  ;;  %v2307_v26 = vunpack.c.l.bf16 %v2306_v47  ;;  %v2308_v22 = vunpack.c.h.bf16 %v2306_v47  ;;  %v2320_v30 = vld [vmem:[#allocation21_spill] sm:$0xff] }
  0xc8   :  { %v1847_v12 = vmul.f32 %v2290_v37, %v2300_v46  ;;  %v1852_v13 = vmul.f32 %v2304_v1, %v2303_v38  ;;  %v2310_v15 = vunpack.c.l.bf16 %v2309_v57  ;;  %v598_v40 = vadd.f32 1.0, %v950_v20 }
  0xc9   :  { %v1857_v24 = vmul.f32 %v2304_v1, %v2305_v39  ;;  %v1862_v60 = vmul.f32 %v2304_v1, %v2307_v26  ;;  %v1867_v49 = vmul.f32 %v2304_v1, %v2308_v22  ;;  %961 = vrcp.f32 %v596_v21  ;;  %v2323_v26 = vld [vmem:[#allocation22_spill] sm:$0xff] }
  0xca   :  { %2301 = vst [vmem:[#allocation40_spill] sm:$0xff] %v1847_v12  ;;  %v1872_v25 = vmul.f32 %v2304_v1, %v2310_v15  ;;  %v2311_v58 = vunpack.c.h.bf16 %v2309_v57  ;;  %v2313_v37 = vunpack.c.l.bf16 %v2312_v54  ;;  %v599_v44 = vadd.f32 1.0, %v952_v53 }
  0xcb   :  { %963 = vrcp.f32 %v597_v62  ;;  %v2314_v9 = vunpack.c.h.bf16 %v2312_v54  ;;  %v2317_v56 = vunpack.c.l.bf16 %v2316_v3  ;;  %v600_v18 = vadd.f32 1.0, %v954_v6 }
  0xcc   :  { %v1877_v23 = vmul.f32 %v2304_v1, %v2311_v58  ;;  %v1882_v43 = vmul.f32 %v2304_v1, %v2313_v37  ;;  %965 = vrcp.f32 %v598_v40  ;;  %v2319_v21 = vunpack.c.h.bf16 %v2316_v3  ;;  %v2326_v58 = vld [vmem:[#allocation23_spill] sm:$0xff] }
  0xcd   :  { %v1887_v34 = vmul.f32 %v2304_v1, %v2314_v9  ;;  %v1892_v63 = vmul.f32 %v2318_v8, %v2317_v56  ;;  %v2321_v38 = vunpack.c.l.bf16 %v2320_v30  ;;  %v958_v1 = vpop.eup %957  ;;  %v601_v20 = vadd.f32 1.0, %v956_v51  ;;  %v2330_v9 = vld [vmem:[#allocation24_spill] sm:$0xff]  ;;  %v2332_v56 = vld [vmem:[#allocation38_spill] sm:$0xff] }
  0xce   :  { %v1897_v46 = vmul.f32 %v2318_v8, %v2319_v21  ;;  %967 = vrcp.f32 %v599_v44  ;;  %v2322_v62 = vunpack.c.h.bf16 %v2320_v30  ;;  %v2324_v22 = vunpack.c.l.bf16 %v2323_v26  ;;  %v960_v30 = vpop.eup %959 }
  0xcf   :  { %2315 = vst [vmem:[#allocation41_spill] sm:$0xff] %v1887_v34  ;;  %v1902_v39 = vmul.f32 %v2318_v8, %v2321_v38  ;;  %v602_v15 = vadd.f32 1.0, %v958_v1  ;;  %969 = vrcp.f32 %v600_v18  ;;  %v2325_v53 = vunpack.c.h.bf16 %v2323_v26  ;;  %v2334_v38 = vld [vmem:[#allocation25_spill] sm:$0xff] }
  0xd0   :  { %v1907_v47 = vmul.f32 %v2318_v8, %v2322_v62  ;;  %v1912_v57 = vmul.f32 %v2318_v8, %v2324_v22  ;;  %v2327_v54 = vunpack.c.l.bf16 %v2326_v58  ;;  %971 = vrcp.f32 %v601_v20 }
  0xd1   :  { %v1917_v40 = vmul.f32 %v2318_v8, %v2325_v53  ;;  %v2328_v6 = vunpack.c.h.bf16 %v2326_v58  ;;  %v2331_v3 = vunpack.c.l.bf16 %v2330_v9  ;;  %v2333_v18 = vunpack.c.h.bf16 %v2330_v9 }
  0xd2   :  { %v1922_v37 = vmul.f32 %v2318_v8, %v2327_v54  ;;  %973 = vrcp.f32 %v602_v15  ;;  %v2335_v1 = vunpack.c.l.bf16 %v2334_v38  ;;  %v2336_v20 = vunpack.c.h.bf16 %v2334_v38  ;;  %v2340_v15 = vld [vmem:[#allocation27_spill] sm:$0xff] }
  0xd3   :  { %v1927_v44 = vmul.f32 %v2318_v8, %v2328_v6  ;;  %v315_v51 = vmul.f32 %v2332_v56, %v2331_v3  ;;  %v316_v21 = vmul.f32 %v2332_v56, %v2333_v18  ;;  %v2337_v8 = vld [vmem:[#allocation26_spill] sm:$0xff]  ;;  %v603_v58 = vadd.f32 1.0, %v960_v30 }
  0xd4   :  { %v317_v62 = vmul.f32 %v2332_v56, %v2335_v1  ;;  %v318_v26 = vmul.f32 %v2332_v56, %v2336_v20  ;;  %v2338_v22 = vunpack.c.l.bf16 %v2337_v8  ;;  %v2339_v54 = vunpack.c.h.bf16 %v2337_v8  ;;  %v2345_v1 = vld [vmem:[#allocation28_spill] sm:$0xff] }
  0xd5   :  { %2329 = vst [vmem:[#allocation42_spill] sm:$0xff] %v1927_v44  ;;  %v2341_v9 = vunpack.c.l.bf16 %v2340_v15  ;;  %v2343_v18 = vunpack.c.h.bf16 %v2340_v15  ;;  %v2346_v20 = vunpack.c.l.bf16 %v2345_v1  ;;  %v2347_v30 = vunpack.c.h.bf16 %v2345_v1  ;;  %v2351_v15 = vld [vmem:[#allocation30_spill] sm:$0xff]  ;;  %v2354_v1 = vld [vmem:[#allocation31_spill] sm:$0xff] }
  0xd6   :  { %v1944_v53 = vmul.f32 %v2332_v56, %v2338_v22  ;;  %v1949_v6 = vmul.f32 %v2332_v56, %v2339_v54  ;;  %v2348_v54 = vld [vmem:[#allocation29_spill] sm:$0xff]  ;;  %975 = vrcp.f32 %v603_v58  ;;  %v444_v58 = vadd.f32 %v1772_v10, %v1716_v59 }
  0xd7   :  { %v1954_v3 = vmul.f32 %v2332_v56, %v2341_v9  ;;  %v1959_v38 = vmul.f32 %v2332_v56, %v2343_v18  ;;  %v331_v22 = vmul.f32 %v1645_v55, %v2346_v20  ;;  %v332_v8 = vmul.f32 %v1645_v55, %v2347_v30 }
  0xd8   :  { %v2349_v44 = vunpack.c.l.bf16 %v2348_v54  ;;  %v2350_v9 = vunpack.c.h.bf16 %v2348_v54  ;;  %v2352_v56 = vunpack.c.l.bf16 %v2351_v15  ;;  %v2355_v30 = vunpack.c.l.bf16 %v2354_v1 }
  0xd9   :  { %2342 = vst [vmem:[#allocation4_spill] sm:$0xff] %v1954_v3  ;;  %2344 = vst [vmem:[#allocation33_spill] sm:$0xff] %v1959_v38  ;;  %v2353_v38 = vunpack.c.h.bf16 %v2351_v15  ;;  %v2357_v54 = vunpack.c.h.bf16 %v2354_v1  ;;  %v462_v27 = vsel %vm344_vm0, %v332_v8, 0.0  ;;  %v445_v59 = vadd.f32 %v444_v58, %v1812_v16 }
  0xda   :  { %v333_v34 = vmul.f32 %v1645_v55, %v2349_v44  ;;  %v334_v12 = vmul.f32 %v1645_v55, %v2350_v9  ;;  %v335_v18 = vmul.f32 %v1645_v55, %v2352_v56  ;;  %v1984_v3 = vmul.f32 %v1645_v55, %v2355_v30  ;;  %v962_v44 = vpop.eup %961 }
  0xdb   :  { %v1979_v20 = vmul.f32 %v1645_v55, %v2353_v38  ;;  %v1989_v9 = vmul.f32 %v1645_v55, %v2357_v54  ;;  %v449_v56 = vsel %vm344_vm0, %v331_v22, 0.0  ;;  %v457_v38 = vadd.f32 %v1777_v42, %v1737_v41  ;;  %v964_v15 = vpop.eup %963 }
  0xdc   :  { %2356 = vst [vmem:[#allocation2_spill] sm:$0xff] %v1984_v3  ;;  %v470_v30 = vadd.f32 %v1782_v14, %v1742_v33  ;;  %v475_v3 = vsel %vm344_vm0, %v333_v34, 0.0  ;;  %v483_v55 = vadd.f32 %v1787_v7, %v1747_v31  ;;  %v966_v1 = vpop.eup %965  ;;  %v771_v54 = vcombine.low %v962_v44, %v964_v15 }
  0xdd   :  { %v458_v10 = vadd.f32 %v457_v38, %v1817_v11  ;;  %v488_v22 = vsel %vm344_vm0, %v334_v12, 0.0  ;;  %v968_v41 = vpop.eup %967  ;;  %v496_v33 = vadd.f32 %v1792_v0, %v1752_v36  ;;  %v501_v14 = vsel %vm344_vm0, %v335_v18, 0.0 }
  0xde   :  { %v471_v42 = vadd.f32 %v470_v30, %v1822_v45  ;;  %v484_v8 = vadd.f32 %v483_v55, %v1827_v17  ;;  %v970_v34 = vpop.eup %969  ;;  %v772_v31 = vcombine.low %v966_v1, %v968_v41  ;;  %v787_v7 = vmul.f32 %v771_v54, %v1720_v2 }
  0xdf   :  { %v446_v16 = vadd.f32 %v445_v59, %v1852_v13  ;;  %v459_v11 = vadd.f32 %v458_v10, %v1857_v24  ;;  %v972_v44 = vpop.eup %971  ;;  %v497_v17 = vadd.f32 %v496_v33, %v1832_v4  ;;  %v509_v36 = vadd.f32 %v1797_v32, %v1757_v48  ;;  %v2358_v10 = vld [vmem:[#allocation34_spill] sm:$0xff] }
  0xe0   :  { %v472_v12 = vadd.f32 %v471_v42, %v1862_v60  ;;  %v485_v45 = vadd.f32 %v484_v8, %v1867_v49  ;;  %v974_v0 = vpop.eup %973  ;;  %v773_v18 = vcombine.low %v970_v34, %v972_v44  ;;  %v788_v58 = vmul.f32 %v772_v31, %v1724_v19 }
  0xe1   :  { %v803_v38 = vcombine.high %v787_v7, %v787_v7  ;;  %v447_v2 = vadd.f32 %v446_v16, %v1892_v63  ;;  %v460_v13 = vadd.f32 %v459_v11, %v1897_v46  ;;  %v498_v49 = vadd.f32 %v497_v17, %v1872_v25  ;;  %v976_v32 = vpop.eup %975 }
  0xe2   :  { %v473_v24 = vadd.f32 %v472_v12, %v1902_v39  ;;  %v486_v60 = vadd.f32 %v485_v45, %v1907_v47  ;;  %v789_v4 = vmul.f32 %v773_v18, %v1728_v29  ;;  %v804_v15 = vcombine.high %v788_v58, %v788_v58 }
  0xe3   :  { %v931_v30 = vpack.c.bf16 %v803_v38, %v787_v7  ;;  %v448_v48 = vadd.f32 %v447_v2, %v315_v51  ;;  %v461_v55 = vadd.f32 %v460_v13, %v316_v21  ;;  %v499_v54 = vadd.f32 %v498_v49, %v1912_v57 }
  0xe4   :  { %v474_v1 = vadd.f32 %v473_v24, %v317_v62  ;;  %v487_v19 = vadd.f32 %v486_v60, %v318_v26  ;;  %v774_v63 = vcombine.low %v974_v0, %v976_v32  ;;  %v805_v59 = vcombine.high %v789_v4, %v789_v4 }
  0xe5   :  { %v932_v46 = vpack.c.bf16 %v804_v15, %v788_v58  ;;  %v859_v39 = vrot.slane %v931_v30, %v2358_v10  ;;  %v450_v41 = vadd.f32 %v449_v56, %v448_v48  ;;  %v463_v47 = vadd.f32 %v462_v27, %v461_v55 }
  0xe6   :  { %v476_v42 = vadd.f32 %v475_v3, %v474_v1  ;;  %v489_v25 = vadd.f32 %v488_v22, %v487_v19  ;;  %v790_v29 = vmul.f32 %v774_v63, %v1732_v5  ;;  %v933_v51 = vpack.c.bf16 %v805_v59, %v789_v4  ;;  %v2359_v63 = vld [vmem:[#allocation37_spill] sm:$0xff] }
  0xe7   :  { %v866_v8 = vrot.slane %v932_v46, %v2358_v10  ;;  %v500_v21 = vadd.f32 %v499_v54, %v1944_v53  ;;  %v451_v62 = vrot.slane %v450_v41, 4  ;;  %v464_v26 = vrot.slane %v463_v47, 4  ;;  %v2360_v46 = vld [vmem:[#allocation2_spill] sm:$0xff] }
  0xe8   :  { %v477_v33 = vrot.slane %v476_v42, 4  ;;  %v490_v57 = vrot.slane %v489_v25, 4  ;;  %v806_v34 = vcombine.high %v790_v29, %v790_v29  ;;  %v876_v7 = vrot.slane %v933_v51, %v2358_v10 }
  0xe9   :  { %v867_v31 = vcombine.low %v859_v39, %v866_v8  ;;  %v502_v16 = vadd.f32 %v501_v14, %v500_v21  ;;  %v452_v56 = vadd.f32 %v451_v62, %v450_v41  ;;  %v465_v27 = vadd.f32 %v464_v26, %v463_v47  ;;  %v2362_v8 = vld [vmem:[#allocation40_spill] sm:$0xff] }
  0xea   :  { %v478_v3 = vadd.f32 %v477_v33, %v476_v42  ;;  %v491_v22 = vadd.f32 %v490_v57, %v489_v25  ;;  %v934_v11 = vpack.c.bf16 %v806_v34, %v790_v29  ;;  %v510_v53 = vadd.f32 %v509_v36, %v1837_v61  ;;  %v2363_v57 = vld [vmem:[#allocation41_spill] sm:$0xff] }
  0xeb   :  { %923 = vst [vmem:[%s2080_s4] sm:$0xff] %v867_v31  ;;  %v503_v5 = vrot.slane %v502_v16, 4  ;;  %v514_v44 = vsel %vm344_vm0, %v1979_v20, 0.0  ;;  %v453_v12 = vrot.slane %v452_v56, 2  ;;  %v466_v45 = vrot.slane %v465_v27, 2 }
  0xec   :  { %v479_v17 = vrot.slane %v478_v3, 2  ;;  %v492_v0 = vrot.slane %v491_v22, 2  ;;  %v883_v14 = vrot.slane %v934_v11, %v2358_v10  ;;  %v511_v58 = vadd.f32 %v510_v53, %v1877_v23 }
  0xed   :  { %v504_v18 = vadd.f32 %v503_v5, %v502_v16  ;;  %v522_v38 = vadd.f32 %v1802_v50, %v1762_v28  ;;  %v454_v2 = vadd.f32 %v453_v12, %v452_v56  ;;  %v467_v13 = vadd.f32 %v466_v45, %v465_v27  ;;  %v2364_v27 = vld [vmem:[#allocation42_spill] sm:$0xff] }
  0xee   :  { %v480_v24 = vadd.f32 %v479_v17, %v478_v3  ;;  %v493_v60 = vadd.f32 %v492_v0, %v491_v22  ;;  %v884_v61 = vcombine.low %v876_v7, %v883_v14  ;;  %v512_v20 = vadd.f32 %v511_v58, %v1917_v40 }
  0xef   :  { %v505_v36 = vrot.slane %v504_v18, 2  ;;  %v523_v49 = vadd.f32 %v522_v38, %v1842_v35  ;;  %v455_v4 = vrot.slane %v454_v2, 1  ;;  %v468_v15 = vrot.slane %v467_v13, 1 }
  0xf0   :  { %v481_v30 = vrot.slane %v480_v24, 1  ;;  %v494_v48 = vrot.slane %v493_v60, 1  ;;  %924 = vst [vmem:[%s2080_s4 + $0x8] sm:$0xff] %v884_v61  ;;  %v513_v28 = vadd.f32 %v512_v20, %v1949_v6  ;;  %v535_v59 = vadd.f32 %v2359_v63, %v1767_v52 }
  0xf1   :  { %v506_v23 = vadd.f32 %v505_v36, %v504_v18  ;;  %v524_v50 = vadd.f32 %v523_v49, %v1882_v43  ;;  %v456_v32 = vadd.f32 %v455_v4, %v454_v2  ;;  %v469_v55 = vadd.f32 %v468_v15, %v467_v13  ;;  %v2361_v43 = vld [vmem:[#allocation4_spill] sm:$0xff] }
  0xf2   :  { %v482_v1 = vadd.f32 %v481_v30, %v480_v24  ;;  %v495_v19 = vadd.f32 %v494_v48, %v493_v60  ;;  %v515_v54 = vadd.f32 %v514_v44, %v513_v28  ;;  %v527_v39 = vsel %vm344_vm0, %v2360_v46, 0.0  ;;  %v2365_v44 = vld [vmem:[#allocation33_spill] sm:$0xff] }
  0xf3   :  { %v507_v40 = vrot.slane %v506_v23, 1  ;;  %v525_v35 = vadd.f32 %v524_v50, %v1922_v37  ;;  %v556_v41 = vsub.f32 0.0, %v456_v32  ;;  %v557_v47 = vsub.f32 0.0, %v469_v55 }
  0xf4   :  { %v558_v42 = vsub.f32 0.0, %v482_v1  ;;  %v516_v25 = vrot.slane %v515_v54, 4  ;;  %v536_v51 = vadd.f32 %v535_v59, %v2362_v8  ;;  %v559_v21 = vsub.f32 0.0, %v495_v19  ;;  %v669_v19 = vpop.permute.xlu0 %668 }
  0xf5   :  { %v508_v6 = vadd.f32 %v507_v40, %v506_v23  ;;  %v526_v29 = vadd.f32 %v525_v35, %v2361_v43  ;;  %v580_v62 = vmul.f32 1.442695, %v556_v41  ;;  %v582_v26 = vmul.f32 1.442695, %v557_v47  ;;  %v705_v40 = vld [vmem:[%s2079_s0 + $0x10] sm:$0xff] }
  0xf6   :  { %v517_v33 = vadd.f32 %v516_v25, %v515_v54  ;;  %v537_v34 = vadd.f32 %v536_v51, %v2363_v57  ;;  %v584_v31 = vmul.f32 1.442695, %v558_v42  ;;  %v586_v7 = vmul.f32 1.442695, %v559_v21 }
  0xf7   :  { %v528_v37 = vadd.f32 %v527_v39, %v526_v29  ;;  %v560_v52 = vsub.f32 0.0, %v508_v6  ;;  %977 = vpow2.f32 %v580_v62  ;;  %v540_v22 = vsel %vm344_vm0, %v1989_v9, 0.0 }
  0xf8   :  { %v518_v16 = vrot.slane %v517_v33, 2  ;;  %v538_v3 = vadd.f32 %v537_v34, %v2364_v27  ;;  %979 = vpow2.f32 %v582_v26  ;;  %v711_v63 = vunpack.c.l.bf16 %v705_v40 }
  0xf9   :  { %v529_v56 = vrot.slane %v528_v37, 4  ;;  %981 = vpow2.f32 %v584_v31  ;;  %v588_v11 = vmul.f32 1.442695, %v560_v52  ;;  %v735_v59 = vcombine.low %v669_v19, %v669_v19 }
  0xfa   :  { %v519_v5 = vadd.f32 %v518_v16, %v517_v33  ;;  %v539_v12 = vadd.f32 %v538_v3, %v2365_v44  ;;  %983 = vpow2.f32 %v586_v7  ;;  %v712_v41 = vunpack.c.h.bf16 %v705_v40 }
  0xfb   :  { %v530_v53 = vadd.f32 %v529_v56, %v528_v37  ;;  %985 = vpow2.f32 %v588_v11  ;;  %v751_v6 = vmul.f32 %v735_v59, %v711_v63  ;;  %v706_v37 = vld [vmem:[%s2079_s0 + $0x18] sm:$0xff] }
  0xfc   :  { %v520_v45 = vrot.slane %v519_v5, 1  ;;  %v541_v0 = vadd.f32 %v540_v22, %v539_v12  ;;  %v752_v51 = vmul.f32 %v735_v59, %v712_v41  ;;  %v713_v7 = vunpack.c.l.bf16 %v706_v37 }
  0xfd   :  { %v531_v17 = vrot.slane %v530_v53, 2 }
  0xfe   :  { %v521_v14 = vadd.f32 %v520_v45, %v519_v5  ;;  %v542_v58 = vrot.slane %v541_v0, 4  ;;  %v714_v45 = vunpack.c.h.bf16 %v706_v37 }
  0xff   :  { %v532_v18 = vadd.f32 %v531_v17, %v530_v53  ;;  %v753_v53 = vmul.f32 %v735_v59, %v713_v7 }
 0x100   :  { %v543_v2 = vadd.f32 %v542_v58, %v541_v0  ;;  %v561_v13 = vsub.f32 0.0, %v521_v14  ;;  %v754_v14 = vmul.f32 %v735_v59, %v714_v45 }
 0x101   :  { %v533_v38 = vrot.slane %v532_v18, 1  ;;  %v978_v24 = vpop.eup %977 }
 0x102   :  { %v980_v60 = vpop.eup %979  ;;  %v544_v61 = vrot.slane %v543_v2, 2  ;;  %v590_v36 = vmul.f32 1.442695, %v561_v13  ;;  %v604_v20 = vadd.f32 1.0, %v978_v24 }
 0x103   :  { %v534_v9 = vadd.f32 %v533_v38, %v532_v18  ;;  %v982_v49 = vpop.eup %981  ;;  %v605_v4 = vadd.f32 1.0, %v980_v60 }
 0x104   :  { %v984_v15 = vpop.eup %983  ;;  %v545_v30 = vadd.f32 %v544_v61, %v543_v2  ;;  %987 = vpow2.f32 %v590_v36  ;;  %v606_v23 = vadd.f32 1.0, %v982_v49 }
 0x105   :  { %v562_v48 = vsub.f32 0.0, %v534_v9  ;;  %v607_v28 = vadd.f32 1.0, %v984_v15  ;;  %989 = vrcp.f32 %v604_v20  ;;  %v986_v55 = vpop.eup %985 }
 0x106   :  { %v546_v50 = vrot.slane %v545_v30, 1  ;;  %991 = vrcp.f32 %v605_v4  ;;  %v608_v35 = vadd.f32 1.0, %v986_v55 }
 0x107   :  { %v592_v32 = vmul.f32 1.442695, %v562_v48  ;;  %993 = vrcp.f32 %v606_v23 }
 0x108   :  { %v547_v1 = vadd.f32 %v546_v50, %v545_v30 }
 0x109   :  { %995 = vpow2.f32 %v592_v32 }
 0x10a   :  { %997 = vrcp.f32 %v607_v28  ;;  %v563_v54 = vsub.f32 0.0, %v547_v1 }
 0x10c   :  { %v594_v46 = vmul.f32 1.442695, %v563_v54 }
 0x10e   :  { %v988_v39 = vpop.eup %987  ;;  %999 = vpow2.f32 %v594_v46 }
 0x10f   :  { %v990_v47 = vpop.eup %989  ;;  %v609_v42 = vadd.f32 1.0, %v988_v39  ;;  %1001 = vrcp.f32 %v608_v35 }
 0x110   :  { %v992_v25 = vpop.eup %991 }
 0x111   :  { %v994_v43 = vpop.eup %993  ;;  %1003 = vrcp.f32 %v609_v42  ;;  %v775_v29 = vcombine.low %v990_v47, %v992_v25 }
 0x113   :  { %v996_v8 = vpop.eup %995  ;;  %v791_v62 = vmul.f32 %v775_v29, %v751_v6 }
 0x114   :  { %v998_v21 = vpop.eup %997  ;;  %v610_v33 = vadd.f32 1.0, %v996_v8 }
 0x115   :  { %v776_v26 = vcombine.low %v994_v43, %v998_v21  ;;  %v807_v57 = vcombine.high %v791_v62, %v791_v62 }
 0x116   :  { %1005 = vrcp.f32 %v610_v33 }
 0x117   :  { %v792_v34 = vmul.f32 %v776_v26, %v752_v51  ;;  %v935_v52 = vpack.c.bf16 %v807_v57, %v791_v62 }
 0x118   :  { %v1000_v31 = vpop.eup %999 }
 0x119   :  { %v808_v16 = vcombine.high %v792_v34, %v792_v34  ;;  %v1002_v56 = vpop.eup %1001  ;;  %v611_v27 = vadd.f32 1.0, %v1000_v31  ;;  %v893_v22 = vrot.slane %v935_v52, %v2358_v10 }
 0x11b   :  { %v936_v3 = vpack.c.bf16 %v808_v16, %v792_v34  ;;  %v1004_v11 = vpop.eup %1003  ;;  %1007 = vrcp.f32 %v611_v27 }
 0x11c   :  { %v777_v5 = vcombine.low %v1002_v56, %v1004_v11 }
 0x11d   :  { %v900_v44 = vrot.slane %v936_v3, %v2358_v10 }
 0x11e   :  { %v793_v17 = vmul.f32 %v777_v5, %v753_v53 }
 0x11f   :  { %v901_v12 = vcombine.low %v893_v22, %v900_v44 }
 0x120   :  { %v1006_v0 = vpop.eup %1005  ;;  %v809_v18 = vcombine.high %v793_v17, %v793_v17 }
 0x121   :  { %925 = vst [vmem:[%s2080_s4 + $0x10] sm:$0xff] %v901_v12 }
 0x122   :  { %v937_v13 = vpack.c.bf16 %v809_v18, %v793_v17 }
 0x124   :  { %v910_v9 = vrot.slane %v937_v13, %v2358_v10 }
 0x125   :  { %v1008_v58 = vpop.eup %1007 }
 0x126   :  { %v778_v38 = vcombine.low %v1006_v0, %v1008_v58 }
 0x128   :  { %v794_v2 = vmul.f32 %v778_v38, %v754_v14 }
 0x12a   :  { %v810_v24 = vcombine.high %v794_v2, %v794_v2 }
 0x12c   :  { %v938_v60 = vpack.c.bf16 %v810_v24, %v794_v2 }
 0x12e   :  { %v917_v61 = vrot.slane %v938_v60, %v2358_v10 }
 0x130   :  { %v918_v36 = vcombine.low %v910_v9, %v917_v61 }
 0x132   :  { %926 = vst [vmem:[%s2080_s4 + $0x18] sm:$0xff] %v918_v36 }

// kernel: parallel_model.8
= control target key start
LH: loop header
LB: loop body
LE: loop exit
PB: predicated region body
PF: predicated region fallthrough
CT: control target
= control target key end

     0   :  { %v475_v1 = vmov 0   ;;  %vm187_vm0 = vcmask 1045504   ;;  %vm183_vm1 = vcmask 883712   ;;  %vm284_vm2 = vcmask 982016   ;;  %s603_s1 = inlined_call_operand.vmem [shape: bf16[108,504], index: 1, kind: input, shape index: {}]   ;;  %s604_s0 = inlined_call_operand.vmem [shape: bf16[8,108], index: 0, kind: input, shape index: {}]   ;;  %s605_s2 = inlined_call_operand.vmem [shape: f32[8,1], index: 2, kind: input, shape index: {}]   ;;  %s606_s3 = inlined_call_operand.vmem [shape: f32[8,1], index: 3, kind: input, shape index: {}]   ;;  %s607_s4 = inlined_call_operand.vmem [shape: bf16[8,504], index: 4, kind: output, shape index: {}]  }
   0x1   :  { %v423_v0 = vld [vmem:[%s603_s1 + $0x4] ss:$16 sps:$4 sm:$0xff]   ;;  %232 = vmatprep.mubr.bf16.mxu0 %v475_v1  ;;  %273 = vmatprep.mubr.bf16.mxu1 %v475_v1  ;;  %v425_v2 = vld [vmem:[%s603_s1 + $0xc] ss:$16 sps:$4 sm:$0xff]   ;;  %v427_v3 = vld [vmem:[%s603_s1] ss:$16 sps:$4 sm:$0xff]  }
   0x2   :  { %421 = vset.pattern.permute.xlu1 %v475_v1  ;;  %422 = vset.pattern.permute.xlu0 %v475_v1  ;;  %v428_v4 = vld [vmem:[%s603_s1 + $0x8] ss:$16 sps:$4 sm:$0xff]   ;;  %v429_v5 = vld [vmem:[%s603_s1 + $0x24] ss:$16 sps:$4 sm:$0xff]   ;;  %v431_v6 = vld [vmem:[%s603_s1 + $0x2c] ss:$16 sps:$4 sm:$0xff]  }
   0x3   :  { %200 = vmatprep.subr.bf16.mxu0 %v423_v0  ;;  %241 = vmatprep.subr.bf16.mxu1 %v425_v2  ;;  %v433_v7 = vld [vmem:[%s603_s1 + $0x20] ss:$16 sps:$4 sm:$0xff]   ;;  %v434_v8 = vld [vmem:[%s603_s1 + $0x28] ss:$16 sps:$4 sm:$0xff]   ;;  %v435_v9 = vld [vmem:[%s603_s1 + $0x44] ss:$16 sps:$4 sm:$0xff]  }
   0x4   :  { %201 = vmatpush1.bf16.msra.mxu0 %v427_v3  ;;  %242 = vmatpush1.bf16.msra.mxu1 %v428_v4  ;;  %v437_v10 = vld [vmem:[%s603_s1 + $0x4c] ss:$16 sps:$4 sm:$0xff]   ;;  %v439_v11 = vld [vmem:[%s603_s1 + $0x40] ss:$16 sps:$4 sm:$0xff]   ;;  %v440_v12 = vld [vmem:[%s603_s1 + $0x48] ss:$16 sps:$4 sm:$0xff]  }
   0x5   :  { %202 = vmatprep.subr.bf16.mxu0 %v429_v5  ;;  %243 = vmatprep.subr.bf16.mxu1 %v431_v6  ;;  %v441_v13 = vld [vmem:[%s603_s1 + $0x64] ss:$16 sps:$4 sm:$0xff]   ;;  %v443_v14 = vld [vmem:[%s603_s1 + $0x6c] ss:$16 sps:$4 sm:$0xff]   ;;  %v445_v15 = vld [vmem:[%s603_s1 + $0x60] ss:$16 sps:$4 sm:$0xff]  }
   0x6   :  { %v446_v16 = vld [vmem:[%s603_s1 + $0x68] ss:$16 sps:$4 sm:$0xff]   ;;  %v447_v17 = vld [vmem:[%s603_s1 + $0x84] ss:$16 sps:$4 sm:$0xff]   ;;  %v449_v18 = vld [vmem:[%s603_s1 + $0x8c] ss:$16 sps:$4 sm:$0xff]  }
   0x7   :  { %v451_v19 = vld [vmem:[%s603_s1 + $0x80] ss:$16 sps:$4 sm:$0xff]   ;;  %v452_v20 = vld [vmem:[%s603_s1 + $0x88] ss:$16 sps:$4 sm:$0xff]   ;;  %v453_v21 = vld [vmem:[%s603_s1 + $0xa4] ss:$16 sps:$4 sm:$0xff]  }
   0x8   :  { %203 = vmatpush1.bf16.msra.mxu0 %v433_v7  ;;  %244 = vmatpush1.bf16.msra.mxu1 %v434_v8  ;;  %v455_v22 = vld [vmem:[%s603_s1 + $0xac] ss:$16 sps:$4 sm:$0xff]   ;;  %v457_v23 = vld [vmem:[%s603_s1 + $0xa0] ss:$16 sps:$4 sm:$0xff]   ;;  %v458_v24 = vld [vmem:[%s603_s1 + $0xa8] ss:$16 sps:$4 sm:$0xff]  }
   0x9   :  { %204 = vmatprep.subr.bf16.mxu0 %v435_v9  ;;  %245 = vmatprep.subr.bf16.mxu1 %v437_v10  ;;  %v459_v25 = vld [vmem:[%s603_s1 + $0xc4] ss:$16 sps:$4 sm:$0x3f]   ;;  %v461_v26 = vld [vmem:[%s603_s1 + $0xcc] ss:$16 sps:$4 sm:$0x3f]  }
   0xa   :  { %v463_v27 = vld [vmem:[%s603_s1 + $0xc0] ss:$16 sps:$4 sm:$0x3f]   ;;  %v464_v28 = vld [vmem:[%s603_s1 + $0xc8] ss:$16 sps:$4 sm:$0x3f]  }
   0xb   :  { %v189_v29 = vsel %vm187_vm0, %v463_v27, 0  ;;  %v195_v30 = vsel %vm187_vm0, %v464_v28, 0  ;;  %v18_v31 = vld [vmem:[%s604_s0] sm:$0xf]  ;;  %vm372_vm3 = vcmask 1043456   ;;  %vm373_vm5 = vcmask 982020  }
   0xc   :  { %205 = vmatpush1.bf16.msra.mxu0 %v439_v11  ;;  %246 = vmatpush1.bf16.msra.mxu1 %v440_v12  ;;  %v306_v61 = vld [vmem:[%s605_s2] sm:$0xff]  ;;  %vm374_vm9 = vmor %vm373_vm5, %vm372_vm3 }
   0xd   :  { %206 = vmatprep.subr.bf16.mxu0 %v441_v13  ;;  %247 = vmatprep.subr.bf16.mxu1 %v443_v14  ;;  %v310_v0 = vld [vmem:[%s606_s3] sm:$0xff] }
  0x10   :  { %207 = vmatpush1.bf16.msra.mxu0 %v445_v15  ;;  %248 = vmatpush1.bf16.msra.mxu1 %v446_v16 }
  0x11   :  { %208 = vmatprep.subr.bf16.mxu0 %v447_v17  ;;  %249 = vmatprep.subr.bf16.mxu1 %v449_v18 }
  0x14   :  { %209 = vmatpush1.bf16.msra.mxu0 %v451_v19  ;;  %250 = vmatpush1.bf16.msra.mxu1 %v452_v20 }
  0x15   :  { %210 = vmatprep.subr.bf16.mxu0 %v453_v21  ;;  %251 = vmatprep.subr.bf16.mxu1 %v455_v22 }
  0x18   :  { %211 = vmatpush1.bf16.msra.mxu0 %v457_v23  ;;  %252 = vmatpush1.bf16.msra.mxu1 %v458_v24 }
  0x19   :  { %408 = vmatprep.subr.msk.bf16.mxu0 %vm187_vm0, %v459_v25  ;;  %410 = vmatprep.subr.msk.bf16.mxu1 %vm187_vm0, %v461_v26 }
  0x1c   :  { %213 = vmatpush1.bf16.msra.mxu0 %v189_v29  ;;  %254 = vmatpush1.bf16.msra.mxu1 %v195_v30 }
  0x1f   :  { %409 = vmatmul.mubr.msk.bf16.vlgmr.msra.gmra.mrb[0].mxu0 %vm183_vm1, %v18_v31  ;;  %411 = vmatmul.mubr.msk.bf16.vlgmr.msra.gmra.mrb[0].mxu1 %vm183_vm1, %v18_v31 }
  0xf2   :  { %v234_v32 = vpop.f32.mrb[0].mxu0  ;;  %v275_v33 = vpop.f32.mrb[0].mxu1 }
  0xf3   :  { %v236_v34 = vpop.f32.mrb[1].mxu0  ;;  %v277_v35 = vpop.f32.mrb[1].mxu1 }
  0xf4   :  { %v282_v36 = vadd.f32 %v236_v34, %v234_v32  ;;  %v238_v37 = vpop.f32.mrb[2].mxu0  ;;  %v279_v38 = vpop.f32.mrb[2].mxu1  ;;  %v285_v41 = vsel %vm284_vm2, %v277_v35, 0.0 }
  0xf5   :  { %v239_v39 = vpop.f32.mrb[3].mxu0  ;;  %v280_v40 = vpop.f32.mrb[3].mxu1 }
  0xf6   :  { %v283_v42 = vadd.f32 %v282_v36, %v275_v33 }
  0xf8   :  { %v286_v43 = vadd.f32 %v285_v41, %v283_v42 }
  0xfa   :  { %287 = vadd.xlane.f32.xlu0 %v286_v43 }
 0x187   :  { %v288_v44 = vpop.xlane.xlu0 %287 }
 0x188   :  { %v290_v45 = vmul.f32 0.001984127, %v288_v44 }
 0x18a   :  { %v291_v46 = vsub.f32 %v234_v32, %v290_v45  ;;  %v292_v47 = vsub.f32 %v236_v34, %v290_v45  ;;  %v293_v48 = vsub.f32 %v275_v33, %v290_v45  ;;  %v294_v49 = vsub.f32 %v277_v35, %v290_v45 }
 0x18c   :  { %v295_v50 = vmul.f32 %v291_v46, %v291_v46  ;;  %v296_v51 = vmul.f32 %v292_v47, %v292_v47  ;;  %v298_v52 = vmul.f32 %v294_v49, %v294_v49  ;;  %v297_v53 = vmul.f32 %v293_v48, %v293_v48 }
 0x18e   :  { %v299_v54 = vadd.f32 %v296_v51, %v295_v50  ;;  %v301_v56 = vsel %vm284_vm2, %v298_v52, 0.0 }
 0x190   :  { %v300_v55 = vadd.f32 %v299_v54, %v297_v53 }
 0x192   :  { %v302_v57 = vadd.f32 %v301_v56, %v300_v55 }
 0x194   :  { %303 = vadd.xlane.f32.xlu0 %v302_v57 }
 0x221   :  { %v304_v58 = vpop.xlane.xlu0 %303 }
 0x222   :  { %v305_v59 = vmul.f32 0.001984127, %v304_v58 }
 0x224   :  { %v307_v60 = vadd.f32 1e-05, %v305_v59 }
 0x226   :  { %465 = vrsqrt.f32 %v307_v60 }
 0x230   :  { %v466_v62 = vpop.eup %465 }
 0x231   :  { %v309_v63 = vmul.f32 %v466_v62, %v306_v61 }
 0x233   :  { %315 = vperm.xlu1 %421, %v309_v63   ;;  %v311_v1 = vmul.f32 %v309_v63, %v290_v45 }
 0x235   :  { %v312_v2 = vsub.f32 %v310_v0, %v311_v1 }
 0x237   :  { %324 = vperm.xlu1 %421, %v312_v2  }
 0x2b2   :  { %v316_v3 = vpop.permute.xlu1 %315 }
 0x2b3   :  { %v318_v4 = vmul.f32 %v316_v3, %v234_v32  ;;  %v319_v5 = vmul.f32 %v316_v3, %v236_v34  ;;  %v320_v6 = vmul.f32 %v316_v3, %v275_v33  ;;  %v321_v7 = vmul.f32 %v316_v3, %v277_v35 }
 0x2b6   :  { %v325_v8 = vpop.permute.xlu1 %324 }
 0x2b7   :  { %v327_v9 = vadd.f32 %v325_v8, %v318_v4  ;;  %v328_v10 = vadd.f32 %v325_v8, %v319_v5  ;;  %v329_v11 = vadd.f32 %v325_v8, %v320_v6  ;;  %v330_v12 = vadd.f32 %v325_v8, %v321_v7 }
 0x2b9   :  { %v335_v13 = vmin.f32 %v327_v9, 0.0  ;;  %v336_v14 = vmin.f32 %v328_v10, 0.0  ;;  %v337_v15 = vmin.f32 %v329_v11, 0.0  ;;  %v338_v16 = vmin.f32 %v330_v12, 0.0 }
 0x2ba   :  { %vm331_vm4 = vcmp.gt.f32.partialorder %v327_v9, 0.0  ;;  %vm332_vm6 = vcmp.gt.f32.partialorder %v328_v10, 0.0  ;;  %vm333_vm7 = vcmp.gt.f32.partialorder %v329_v11, 0.0  ;;  %vm334_vm8 = vcmp.gt.f32.partialorder %v330_v12, 0.0 }
 0x2bb   :  { %v339_v17 = vmul.f32 1.442695, %v335_v13  ;;  %v341_v18 = vmul.f32 1.442695, %v336_v14  ;;  %v343_v19 = vmul.f32 1.442695, %v337_v15 }
 0x2bc   :  { %v345_v20 = vmul.f32 1.442695, %v338_v16 }
 0x2bd   :  { %467 = vpow2.f32 %v339_v17 }
 0x2be   :  { %469 = vpow2.f32 %v341_v18 }
 0x2bf   :  { %471 = vpow2.f32 %v343_v19 }
 0x2c0   :  { %473 = vpow2.f32 %v345_v20 }
 0x2c7   :  { %v468_v21 = vpop.eup %467 }
 0x2c8   :  { %v470_v22 = vpop.eup %469  ;;  %v412_v23 = vadd.f32 -1.0, %v468_v21 }
 0x2c9   :  { %v472_v24 = vpop.eup %471  ;;  %v413_v25 = vadd.f32 -1.0, %v470_v22 }
 0x2ca   :  { %v474_v26 = vpop.eup %473  ;;  %v414_v27 = vadd.f32 -1.0, %v472_v24  ;;  %v351_v28 = vsel %vm331_vm4, %v327_v9, %v412_v23 }
 0x2cb   :  { %v415_v29 = vadd.f32 -1.0, %v474_v26  ;;  %v352_v30 = vsel %vm332_vm6, %v328_v10, %v413_v25 }
 0x2cc   :  { %v353_v31 = vsel %vm333_vm7, %v329_v11, %v414_v27  ;;  %v418_v32 = vpack.c.bf16 %v352_v30, %v351_v28 }
 0x2cd   :  { %v354_v33 = vsel %vm334_vm8, %v330_v12, %v415_v29 }
 0x2ce   :  { %v419_v34 = vpack.c.bf16 %v354_v33, %v353_v31  ;;  %371 = vst [vmem:[%s607_s4] sm:$0xff] %v418_v32 }
 0x2d0   :  { %375 = vst.msk [vmem:[%s607_s4 + $0x8] sm:$0xff] %vm374_vm9, %v419_v34 }

// kernel: parallel_model.9
= control target key start
LH: loop header
LB: loop body
LE: loop exit
PB: predicated region body
PF: predicated region fallthrough
CT: control target
= control target key end

     0   :  { %v301_v0 = vmov 0   ;;  %v302_v9 = vmov 1   ;;  %vm169_vm0 = vcmask 982016   ;;  %vm134_vm1 = vcmask 1045504   ;;  %s432_s3 = inlined_call_operand.vmem [shape: f32[54,1], index: 3, kind: input, shape index: {}]   ;;  %s433_s1 = inlined_call_operand.vmem [shape: f32[8,2], index: 1, kind: input, shape index: {}]   ;;  %s434_s2 = inlined_call_operand.vmem [shape: bf16[54,504], index: 2, kind: input, shape index: {}]   ;;  %s435_s0 = inlined_call_operand.vmem [shape: bf16[8,504], index: 0, kind: input, shape index: {}]   ;;  %s436_s4 = inlined_call_operand.vmem [shape: bf16[8,504], index: 4, kind: output, shape index: {}]  }
   0x1   :  { %283 = vset.pattern.permute.xlu1 %v301_v0  ;;  %282 = vset.pattern.permute.xlu0 %v301_v0  ;;  %v61_v1 = vld [vmem:[%s432_s3 + $0x10] sm:$0xff]  ;;  %v59_v2 = vld [vmem:[%s432_s3] sm:$0xff]  ;;  %v62_v3 = vld [vmem:[%s432_s3 + $0x18] sm:$0xff]  ;;  %vm181_vm2 = vcmask 979968   ;;  %vm268_vm4 = vcmask 1043456   ;;  %vm269_vm5 = vcmask 982020  }
   0x2   :  { %78 = vperm.xlu1 %283, %v61_v1   ;;  %68 = vperm.xlu0 %282, %v59_v2   ;;  %v60_v4 = vld [vmem:[%s432_s3 + $0x8] sm:$0xff]  ;;  %v63_v6 = vld [vmem:[%s432_s3 + $0x20] sm:$0xff]  ;;  %v65_v7 = vld [vmem:[%s432_s3 + $0x30] sm:$0x3f] }
   0x3   :  { %v64_v5 = vld [vmem:[%s432_s3 + $0x28] sm:$0xff]  ;;  %v219_v8 = vld [vmem:[%s433_s1] sm:$0xff]  ;;  %v23_v14 = vld [vmem:[%s434_s2 + $0x30] sm:$0xff] }
   0x4   :  { %v21_v10 = vld [vmem:[%s434_s2 + $0x20] sm:$0xff]  ;;  %v22_v11 = vld [vmem:[%s434_s2 + $0x28] sm:$0xff]  ;;  %v24_v15 = vld [vmem:[%s434_s2 + $0x38] sm:$0xff]  ;;  %v43_v28 = vunpack.c.l.bf16 %v23_v14  ;;  %v44_v29 = vunpack.c.h.bf16 %v23_v14 }
   0x5   :  { %v17_v12 = vld [vmem:[%s434_s2] sm:$0xff]  ;;  %v18_v13 = vld [vmem:[%s434_s2 + $0x8] sm:$0xff]  ;;  %v39_v16 = vunpack.c.l.bf16 %v21_v10  ;;  %v40_v17 = vunpack.c.h.bf16 %v21_v10  ;;  %v41_v18 = vunpack.c.l.bf16 %v22_v11  ;;  %v19_v19 = vld [vmem:[%s434_s2 + $0x10] sm:$0xff]  ;;  %v42_v21 = vunpack.c.h.bf16 %v22_v11 }
   0x6   :  { %83 = vperm.xlu1 %283, %v62_v3   ;;  %73 = vperm.xlu0 %282, %v60_v4   ;;  %v20_v20 = vld [vmem:[%s434_s2 + $0x18] sm:$0xff]  ;;  %v31_v22 = vunpack.c.l.bf16 %v17_v12  ;;  %v32_v23 = vunpack.c.h.bf16 %v17_v12  ;;  %v33_v24 = vunpack.c.l.bf16 %v18_v13  ;;  %v27_v25 = vld [vmem:[%s434_s2 + $0x50] sm:$0xff]  ;;  %v34_v27 = vunpack.c.h.bf16 %v18_v13  ;;  %v387_v31 = vld [vmem:[%s434_s2 + $0x40] sm:$0xff] }
   0x7   :  { %v382_v26 = vld [vmem:[%s434_s2 + $0x58] sm:$0xff]  ;;  %v45_v30 = vunpack.c.l.bf16 %v24_v15  ;;  %v46_v32 = vunpack.c.h.bf16 %v24_v15  ;;  %v35_v33 = vunpack.c.l.bf16 %v19_v19  ;;  %v36_v34 = vunpack.c.h.bf16 %v19_v19  ;;  %v26_v36 = vld [vmem:[%s434_s2 + $0x48] sm:$0xff]  ;;  %v395_v37 = vld [vmem:[%s434_s2 + $0x60] sm:$0x77] }
   0x8   :  { %v37_v35 = vunpack.c.l.bf16 %v20_v20  ;;  %v38_v40 = vunpack.c.h.bf16 %v20_v20  ;;  %v51_v41 = vunpack.c.l.bf16 %v27_v25  ;;  %v52_v42 = vunpack.c.h.bf16 %v27_v25  ;;  %v401_v44 = vld [vmem:[%s434_s2 + $0x68] sm:$0x77]  ;;  %vm270_vm6 = vmor %vm269_vm5, %vm268_vm4 }
   0x9   :  { %v53_v43 = vunpack.c.l.bf16 %v382_v26  ;;  %v54_v46 = vunpack.c.h.bf16 %v382_v26  ;;  %v47_v47 = vunpack.c.l.bf16 %v387_v31  ;;  %v48_v48 = vunpack.c.h.bf16 %v387_v31 }
   0xa   :  { %93 = vperm.xlu1 %283, %v64_v5   ;;  %88 = vperm.xlu0 %282, %v63_v6   ;;  %v49_v50 = vunpack.c.l.bf16 %v26_v36  ;;  %v50_v51 = vunpack.c.h.bf16 %v26_v36  ;;  %v55_v52 = vunpack.c.l.bf16 %v395_v37  ;;  %v56_v54 = vunpack.c.h.bf16 %v395_v37 }
   0xb   :  { %v57_v55 = vunpack.c.l.bf16 %v401_v44  ;;  %v58_v56 = vunpack.c.h.bf16 %v401_v44 }
   0xe   :  { %98 = vperm.xlu0 %282, %v65_v7   ;;  %222 = vperm.xlu1 %283, %v219_v8  }
  0x12   :  { %284 = vset.pattern.permute.xlu0 %v302_v9 }
  0x13   :  { %226 = vperm.xlu0 %284, %v219_v8  }
  0x81   :  { %v79_v38 = vpop.permute.xlu1 %78  ;;  %v69_v39 = vpop.permute.xlu0 %68 }
  0x82   :  { %v112_v45 = vmul.f32 %v79_v38, %v42_v21  ;;  %v104_v49 = vmul.f32 %v69_v39, %v34_v27  ;;  %v109_v53 = vmul.f32 %v79_v38, %v39_v16  ;;  %v110_v57 = vmul.f32 %v79_v38, %v40_v17 }
  0x83   :  { %v111_v58 = vmul.f32 %v79_v38, %v41_v18  ;;  %v101_v59 = vmul.f32 %v69_v39, %v31_v22  ;;  %v102_v60 = vmul.f32 %v69_v39, %v32_v23  ;;  %v103_v0 = vmul.f32 %v69_v39, %v33_v24 }
  0x84   :  { %v173_v63 = vsel %vm169_vm0, %v112_v45, 0.0  ;;  %v170_v1 = vsel %vm169_vm0, %v104_v49, 0.0 }
  0x85   :  { %v84_v61 = vpop.permute.xlu1 %83  ;;  %v74_v62 = vpop.permute.xlu0 %73 }
  0x86   :  { %v116_v2 = vmul.f32 %v84_v61, %v46_v32  ;;  %v105_v3 = vmul.f32 %v74_v62, %v35_v33  ;;  %v106_v4 = vmul.f32 %v74_v62, %v36_v34  ;;  %v107_v5 = vmul.f32 %v74_v62, %v37_v35 }
  0x87   :  { %v108_v6 = vmul.f32 %v74_v62, %v38_v40  ;;  %v113_v7 = vmul.f32 %v84_v61, %v43_v28  ;;  %v114_v8 = vmul.f32 %v84_v61, %v44_v29  ;;  %v115_v9 = vmul.f32 %v84_v61, %v45_v30 }
  0x88   :  { %v175_v10 = vsel %vm169_vm0, %v116_v2, 0.0  ;;  %v129_v11 = vadd.f32 %v105_v3, %v101_v59  ;;  %v143_v12 = vadd.f32 %v106_v4, %v102_v60  ;;  %v156_v13 = vadd.f32 %v107_v5, %v103_v0 }
  0x89   :  { %v171_v14 = vsel %vm169_vm0, %v108_v6, 0.0  ;;  %v94_v15 = vpop.permute.xlu1 %93  ;;  %v89_v16 = vpop.permute.xlu0 %88 }
  0x8a   :  { %v172_v17 = vadd.f32 %v171_v14, %v170_v1  ;;  %v121_v18 = vmul.f32 %v94_v15, %v51_v41  ;;  %v122_v19 = vmul.f32 %v94_v15, %v52_v42  ;;  %v123_v20 = vmul.f32 %v94_v15, %v53_v43 }
  0x8b   :  { %v130_v21 = vadd.f32 %v129_v11, %v109_v53  ;;  %v144_v22 = vadd.f32 %v143_v12, %v110_v57  ;;  %v157_v23 = vadd.f32 %v156_v13, %v111_v58  ;;  %v124_v24 = vmul.f32 %v94_v15, %v54_v46 }
  0x8c   :  { %v174_v25 = vadd.f32 %v173_v63, %v172_v17  ;;  %v117_v26 = vmul.f32 %v89_v16, %v47_v47  ;;  %v118_v27 = vmul.f32 %v89_v16, %v48_v48  ;;  %v119_v28 = vmul.f32 %v89_v16, %v49_v50 }
  0x8d   :  { %v179_v29 = vsel %vm169_vm0, %v124_v24, 0.0  ;;  %v120_v30 = vmul.f32 %v89_v16, %v50_v51  ;;  %v131_v31 = vadd.f32 %v130_v21, %v113_v7  ;;  %v145_v32 = vadd.f32 %v144_v22, %v114_v8  ;;  %v99_v33 = vpop.permute.xlu0 %98 }
  0x8e   :  { %v158_v34 = vadd.f32 %v157_v23, %v115_v9  ;;  %v176_v35 = vadd.f32 %v175_v10, %v174_v25  ;;  %v125_v36 = vmul.f32 %v99_v33, %v55_v52  ;;  %v126_v37 = vmul.f32 %v99_v33, %v56_v54 }
  0x8f   :  { %v132_v38 = vadd.f32 %v131_v31, %v117_v26  ;;  %v146_v39 = vadd.f32 %v145_v32, %v118_v27  ;;  %v177_v40 = vsel %vm169_vm0, %v120_v30, 0.0  ;;  %v127_v41 = vmul.f32 %v99_v33, %v57_v55 }
  0x90   :  { %v159_v42 = vadd.f32 %v158_v34, %v119_v28  ;;  %v178_v43 = vadd.f32 %v177_v40, %v176_v35  ;;  %v128_v44 = vmul.f32 %v99_v33, %v58_v56  ;;  %v135_v45 = vsel %vm134_vm1, %v125_v36, 0.0  ;;  %v237_v36 = vld [vmem:[%s435_s0] sm:$0xff] }
  0x91   :  { %v133_v46 = vadd.f32 %v132_v38, %v121_v18  ;;  %v147_v47 = vadd.f32 %v146_v39, %v122_v19  ;;  %v148_v48 = vsel %vm134_vm1, %v126_v37, 0.0  ;;  %v161_v49 = vsel %vm134_vm1, %v127_v41, 0.0  ;;  %v238_v37 = vld [vmem:[%s435_s0 + $0x8] sm:$0xff]  ;;  %v223_v41 = vpop.permute.xlu1 %222 }
  0x92   :  { %v160_v50 = vadd.f32 %v159_v42, %v123_v20  ;;  %v180_v51 = vadd.f32 %v179_v29, %v178_v43  ;;  %v182_v54 = vsel %vm181_vm2, %v128_v44, 0.0  ;;  %v214_v25 = vlaneseq  ;;  %v227_v38 = vpop.permute.xlu0 %226 }
  0x93   :  { %v136_v52 = vadd.f32 %v135_v45, %v133_v46  ;;  %v149_v53 = vadd.f32 %v148_v48, %v147_v47  ;;  %v239_v39 = vunpack.c.l.bf16 %v237_v36  ;;  %v241_v40 = vunpack.c.l.bf16 %v238_v37 }
  0x94   :  { %v162_v57 = vadd.f32 %v161_v49, %v160_v50  ;;  %v183_v58 = vadd.f32 %v182_v54, %v180_v51  ;;  %v215_v26 = vand.u32 127, %v214_v25  ;;  %v240_v42 = vunpack.c.h.bf16 %v237_v36 }
  0x95   :  { %v137_v55 = vrot.slane %v136_v52, 4  ;;  %v150_v59 = vrot.slane %v149_v53, 4  ;;  %v242_v43 = vunpack.c.h.bf16 %v238_v37  ;;  %v243_v45 = vmul.f32 %v239_v39, %v223_v41 }
  0x96   :  { %v163_v60 = vrot.slane %v162_v57, 4  ;;  %v184_v56 = vrot.slane %v183_v58, 4  ;;  %v216_v34 = vadd.s32 128, %v215_v26  ;;  %v245_v46 = vmul.f32 %v241_v40, %v227_v38 }
  0x97   :  { %v138_v61 = vadd.f32 %v137_v55, %v136_v52  ;;  %v151_v62 = vadd.f32 %v150_v59, %v149_v53  ;;  %v246_v49 = vmul.f32 %v242_v43, %v227_v38 }
  0x98   :  { %v164_v63 = vadd.f32 %v163_v60, %v162_v57  ;;  %v185_v0 = vadd.f32 %v184_v56, %v183_v58  ;;  %vm230_vm3 = vcmp.ge.s32.totalorder %v216_v34, 252 }
  0x99   :  { %v139_v1 = vrot.slane %v138_v61, 2  ;;  %v152_v2 = vrot.slane %v151_v62, 2  ;;  %v234_v44 = vsel %vm230_vm3, %v227_v38, %v223_v41 }
  0x9a   :  { %v165_v3 = vrot.slane %v164_v63, 2  ;;  %v186_v4 = vrot.slane %v185_v0, 2  ;;  %v244_v48 = vmul.f32 %v240_v42, %v234_v44 }
  0x9b   :  { %v140_v5 = vadd.f32 %v139_v1, %v138_v61  ;;  %v153_v6 = vadd.f32 %v152_v2, %v151_v62 }
  0x9c   :  { %v166_v7 = vadd.f32 %v165_v3, %v164_v63  ;;  %v187_v8 = vadd.f32 %v186_v4, %v185_v0 }
  0x9d   :  { %v141_v9 = vrot.slane %v140_v5, 1  ;;  %v154_v10 = vrot.slane %v153_v6, 1 }
  0x9e   :  { %v167_v11 = vrot.slane %v166_v7, 1  ;;  %v188_v12 = vrot.slane %v187_v8, 1 }
  0x9f   :  { %v142_v13 = vadd.f32 %v141_v9, %v140_v5  ;;  %v155_v14 = vadd.f32 %v154_v10, %v153_v6 }
  0xa0   :  { %v168_v15 = vadd.f32 %v167_v11, %v166_v7  ;;  %v189_v16 = vadd.f32 %v188_v12, %v187_v8 }
  0xa1   :  { %v190_v17 = vsub.f32 0.0, %v142_v13  ;;  %v191_v18 = vsub.f32 0.0, %v155_v14 }
  0xa2   :  { %v192_v19 = vsub.f32 0.0, %v168_v15  ;;  %v193_v20 = vsub.f32 0.0, %v189_v16 }
  0xa3   :  { %v194_v21 = vmul.f32 1.442695, %v190_v17  ;;  %v196_v22 = vmul.f32 1.442695, %v191_v18 }
  0xa4   :  { %v198_v23 = vmul.f32 1.442695, %v192_v19  ;;  %v200_v24 = vmul.f32 1.442695, %v193_v20 }
  0xa5   :  { %285 = vpow2.f32 %v194_v21 }
  0xa6   :  { %287 = vpow2.f32 %v196_v22 }
  0xa7   :  { %289 = vpow2.f32 %v198_v23 }
  0xa8   :  { %291 = vpow2.f32 %v200_v24 }
  0xaf   :  { %v286_v27 = vpop.eup %285 }
  0xb0   :  { %v288_v28 = vpop.eup %287  ;;  %v202_v29 = vadd.f32 1.0, %v286_v27 }
  0xb1   :  { %v290_v30 = vpop.eup %289  ;;  %v203_v31 = vadd.f32 1.0, %v288_v28 }
  0xb2   :  { %v292_v32 = vpop.eup %291  ;;  %293 = vrcp.f32 %v202_v29  ;;  %v204_v33 = vadd.f32 1.0, %v290_v30 }
  0xb3   :  { %v205_v35 = vadd.f32 1.0, %v292_v32  ;;  %295 = vrcp.f32 %v203_v31 }
  0xb4   :  { %297 = vrcp.f32 %v204_v33 }
  0xb5   :  { %299 = vrcp.f32 %v205_v35 }
  0xbc   :  { %v294_v47 = vpop.eup %293 }
  0xbd   :  { %v296_v50 = vpop.eup %295  ;;  %v247_v51 = vmul.f32 %v294_v47, %v243_v45 }
  0xbe   :  { %v298_v52 = vpop.eup %297  ;;  %v248_v53 = vmul.f32 %v296_v50, %v244_v48 }
  0xbf   :  { %v300_v54 = vpop.eup %299  ;;  %v249_v57 = vmul.f32 %v298_v52, %v245_v46 }
  0xc0   :  { %v250_v58 = vmul.f32 %v300_v54, %v246_v49  ;;  %v278_v55 = vpack.c.bf16 %v248_v53, %v247_v51 }
  0xc2   :  { %v279_v59 = vpack.c.bf16 %v250_v58, %v249_v57  ;;  %267 = vst [vmem:[%s436_s4] sm:$0xff] %v278_v55 }
  0xc4   :  { %271 = vst.msk [vmem:[%s436_s4 + $0x8] sm:$0xff] %vm270_vm6, %v279_v59 }

// kernel: parallel_model.10
= control target key start
LH: loop header
LB: loop body
LE: loop exit
PB: predicated region body
PF: predicated region fallthrough
CT: control target
= control target key end

     0   :  { %v324_v0 = vmov 0   ;;  %vm137_vm0 = vcmask 719872   ;;  %vm141_vm1 = vcmask 1043456   ;;  %vm186_vm2 = vcmask 785408   ;;  %s420_s1 = inlined_call_operand.vmem [shape: bf16[216,96], index: 1, kind: input, shape index: {}]   ;;  %s421_s0 = inlined_call_operand.vmem [shape: bf16[16,216], index: 0, kind: input, shape index: {}]   ;;  %s422_s2 = inlined_call_operand.vmem [shape: f32[16,1], index: 2, kind: input, shape index: {}]   ;;  %s423_s3 = inlined_call_operand.vmem [shape: f32[16,1], index: 3, kind: input, shape index: {}]   ;;  %s424_s4 = inlined_call_operand.vmem [shape: bf16[16,96], index: 4, kind: output, shape index: {}]  }
   0x1   :  { %145 = vmatprep.subr.bf16.mxu0 %v324_v0  ;;  %v299_v1 = vld [vmem:[%s420_s1] sm:$0xff]   ;;  %297 = vset.pattern.permute.xlu0 %v324_v0  ;;  %v300_v2 = vld [vmem:[%s420_s1 + $0x8] sm:$0xff]   ;;  %v301_v3 = vld [vmem:[%s420_s1 + $0x10] sm:$0xff]   ;;  %vm266_vm4 = vcmask 781312  }
   0x2   :  { %298 = vset.pattern.permute.xlu1 %v324_v0  ;;  %146 = vmatpush1.bf16.msra.mxu0 %v299_v1  ;;  %v302_v4 = vld [vmem:[%s420_s1 + $0x18] sm:$0xff]   ;;  %v303_v5 = vld [vmem:[%s420_s1 + $0x20] sm:$0xff]   ;;  %v304_v7 = vld [vmem:[%s420_s1 + $0x28] sm:$0xff]  }
   0x3   :  { %147 = vmatprep.subr.bf16.mxu0 %v324_v0  ;;  %v315_v6 = vld [vmem:[%s421_s0 + $0x4] ss:$8 sps:$4 sm:$0xff]   ;;  %v305_v8 = vld [vmem:[%s420_s1 + $0x30] sm:$0xff]   ;;  %v306_v9 = vld [vmem:[%s420_s1 + $0x38] sm:$0xff]  }
   0x4   :  { %289 = vmatprep.mubr.msk.bf16.mxu0 %vm137_vm0, %v315_v6  ;;  %v307_v10 = vld [vmem:[%s420_s1 + $0x40] sm:$0xff]   ;;  %v308_v11 = vld [vmem:[%s420_s1 + $0x48] sm:$0xff]   ;;  %v309_v12 = vld [vmem:[%s420_s1 + $0x50] sm:$0xff]  }
   0x5   :  { %v310_v13 = vld [vmem:[%s420_s1 + $0x58] sm:$0xff]   ;;  %v311_v14 = vld [vmem:[%s420_s1 + $0x60] sm:$0xff]   ;;  %v312_v15 = vld [vmem:[%s420_s1 + $0x68] ss:$0 sps:$4 sm:$0xff]  }
   0x6   :  { %148 = vmatpush1.bf16.msra.mxu0 %v300_v2  ;;  %v143_v16 = vsel %vm141_vm1, %v312_v15, 0  ;;  %v313_v17 = vld [vmem:[%s421_s0] ss:$8 sps:$4 sm:$0xff]  }
   0x7   :  { %149 = vmatprep.subr.bf16.mxu0 %v324_v0  ;;  %v208_v40 = vld [vmem:[%s422_s2] sm:$0xff]  ;;  %v209_v43 = vld [vmem:[%s422_s2 + $0x8] sm:$0xff] }
   0x8   :  { %v216_v47 = vld [vmem:[%s423_s3] sm:$0xff]  ;;  %v217_v50 = vld [vmem:[%s423_s3 + $0x8] sm:$0xff] }
   0xa   :  { %150 = vmatpush1.bf16.msra.mxu0 %v301_v3 }
   0xb   :  { %151 = vmatprep.subr.bf16.mxu0 %v324_v0 }
   0xe   :  { %152 = vmatpush1.bf16.msra.mxu0 %v302_v4 }
   0xf   :  { %153 = vmatprep.subr.bf16.mxu0 %v324_v0 }
  0x12   :  { %154 = vmatpush1.bf16.msra.mxu0 %v303_v5 }
  0x13   :  { %155 = vmatprep.subr.bf16.mxu0 %v324_v0 }
  0x16   :  { %156 = vmatpush1.bf16.msra.mxu0 %v304_v7 }
  0x17   :  { %157 = vmatprep.subr.bf16.mxu0 %v324_v0 }
  0x1a   :  { %158 = vmatpush1.bf16.msra.mxu0 %v305_v8 }
  0x1b   :  { %159 = vmatprep.subr.bf16.mxu0 %v324_v0 }
  0x1e   :  { %160 = vmatpush1.bf16.msra.mxu0 %v306_v9 }
  0x1f   :  { %161 = vmatprep.subr.bf16.mxu0 %v324_v0 }
  0x22   :  { %162 = vmatpush1.bf16.msra.mxu0 %v307_v10 }
  0x23   :  { %163 = vmatprep.subr.bf16.mxu0 %v324_v0 }
  0x26   :  { %164 = vmatpush1.bf16.msra.mxu0 %v308_v11 }
  0x27   :  { %165 = vmatprep.subr.bf16.mxu0 %v324_v0 }
  0x2a   :  { %166 = vmatpush1.bf16.msra.mxu0 %v309_v12 }
  0x2b   :  { %167 = vmatprep.subr.bf16.mxu0 %v324_v0 }
  0x2e   :  { %168 = vmatpush1.bf16.msra.mxu0 %v310_v13 }
  0x2f   :  { %169 = vmatprep.subr.bf16.mxu0 %v324_v0 }
  0x32   :  { %170 = vmatpush1.bf16.msra.mxu0 %v311_v14 }
  0x33   :  { %171 = vmatprep.subr.bf16.mxu0 %v324_v0 }
  0x36   :  { %172 = vmatpush1.bf16.msra.mxu0 %v143_v16 }
  0x39   :  { %178 = vmatmul.mubr.bf16.vlgmr.msra.gmra.mrb[0].mxu0 %v313_v17 }
 0x10c   :  { %v179_v18 = vpop.f32.mrb[0].mxu0 }
 0x10d   :  { %v181_v19 = vpop.f32.mrb[1].mxu0  ;;  %v187_v20 = vsel %vm186_vm2, %v179_v18, 0.0 }
 0x10e   :  { %188 = vadd.xlane.f32.xlu0 %v187_v20  ;;  %v182_v21 = vpop.f32.mrb[2].mxu0 }
 0x10f   :  { %v184_v22 = vpop.f32.mrb[3].mxu0  ;;  %v190_v23 = vsel %vm186_vm2, %v182_v21, 0.0 }
 0x112   :  { %191 = vadd.xlane.f32.xlu0 %v190_v23 }
 0x19b   :  { %v189_v24 = vpop.xlane.xlu0 %188 }
 0x19c   :  { %v194_v25 = vmul.f32 0.010416667, %v189_v24 }
 0x19e   :  { %v196_v26 = vsub.f32 %v179_v18, %v194_v25 }
 0x19f   :  { %v192_v27 = vpop.xlane.xlu0 %191 }
 0x1a0   :  { %v195_v28 = vmul.f32 0.010416667, %v192_v27  ;;  %v198_v29 = vmul.f32 %v196_v26, %v196_v26 }
 0x1a2   :  { %v197_v30 = vsub.f32 %v182_v21, %v195_v28  ;;  %v200_v31 = vsel %vm186_vm2, %v198_v29, 0.0 }
 0x1a3   :  { %201 = vadd.xlane.f32.xlu1 %v200_v31 }
 0x1a4   :  { %v199_v32 = vmul.f32 %v197_v30, %v197_v30 }
 0x1a6   :  { %v203_v33 = vsel %vm186_vm2, %v199_v32, 0.0 }
 0x1a7   :  { %204 = vadd.xlane.f32.xlu1 %v203_v33 }
 0x230   :  { %v202_v34 = vpop.xlane.xlu1 %201 }
 0x231   :  { %v206_v35 = vmul.f32 0.010416667, %v202_v34 }
 0x233   :  { %v210_v36 = vadd.f32 1e-05, %v206_v35 }
 0x234   :  { %v205_v37 = vpop.xlane.xlu1 %204 }
 0x235   :  { %316 = vrsqrt.f32 %v210_v36  ;;  %v207_v38 = vmul.f32 0.010416667, %v205_v37 }
 0x237   :  { %v211_v39 = vadd.f32 1e-05, %v207_v38 }
 0x239   :  { %318 = vrsqrt.f32 %v211_v39 }
 0x23f   :  { %v317_v41 = vpop.eup %316 }
 0x240   :  { %v214_v42 = vmul.f32 %v317_v41, %v208_v40 }
 0x242   :  { %224 = vperm.xlu0 %297, %v214_v42   ;;  %v218_v46 = vmul.f32 %v214_v42, %v194_v25 }
 0x243   :  { %v319_v44 = vpop.eup %318 }
 0x244   :  { %v215_v45 = vmul.f32 %v319_v44, %v209_v43  ;;  %v220_v48 = vsub.f32 %v216_v47, %v218_v46 }
 0x246   :  { %229 = vperm.xlu1 %298, %v215_v45   ;;  %v219_v49 = vmul.f32 %v215_v45, %v195_v28 }
 0x248   :  { %v221_v51 = vsub.f32 %v217_v50, %v219_v49 }
 0x24a   :  { %236 = vperm.xlu1 %298, %v220_v48  }
 0x24e   :  { %241 = vperm.xlu1 %298, %v221_v51  }
 0x2c1   :  { %v225_v52 = vpop.permute.xlu0 %224 }
 0x2c2   :  { %v232_v54 = vmul.f32 %v225_v52, %v179_v18 }
 0x2c5   :  { %v230_v53 = vpop.permute.xlu1 %229 }
 0x2c6   :  { %v233_v57 = vmul.f32 %v230_v53, %v182_v21 }
 0x2c9   :  { %v237_v55 = vpop.permute.xlu1 %236 }
 0x2ca   :  { %v244_v56 = vadd.f32 %v237_v55, %v232_v54 }
 0x2cc   :  { %v248_v58 = vmin.f32 %v244_v56, 0.0  ;;  %vm246_vm3 = vcmp.gt.f32.partialorder %v244_v56, 0.0 }
 0x2cd   :  { %v242_v59 = vpop.permute.xlu1 %241 }
 0x2ce   :  { %v250_v60 = vmul.f32 1.442695, %v248_v58  ;;  %v245_v61 = vadd.f32 %v242_v59, %v233_v57 }
 0x2d0   :  { %320 = vpow2.f32 %v250_v60  ;;  %v249_v62 = vmin.f32 %v245_v61, 0.0  ;;  %vm247_vm5 = vcmp.gt.f32.partialorder %v245_v61, 0.0 }
 0x2d2   :  { %v252_v63 = vmul.f32 1.442695, %v249_v62 }
 0x2d4   :  { %322 = vpow2.f32 %v252_v63 }
 0x2da   :  { %v321_v0 = vpop.eup %320 }
 0x2db   :  { %v290_v1 = vadd.f32 -1.0, %v321_v0 }
 0x2dd   :  { %v256_v2 = vsel %vm246_vm3, %v244_v56, %v290_v1 }
 0x2de   :  { %v323_v3 = vpop.eup %322  ;;  %v294_v4 = vpack.c.bf16 %v256_v2, %v256_v2 }
 0x2df   :  { %v291_v5 = vadd.f32 -1.0, %v323_v3 }
 0x2e0   :  { %267 = vst.msk [vmem:[%s424_s4] sm:$0xf] %vm266_vm4, %v294_v4 }
 0x2e1   :  { %v257_v6 = vsel %vm247_vm5, %v245_v61, %v291_v5 }
 0x2e2   :  { %v295_v7 = vpack.c.bf16 %v257_v6, %v257_v6 }
 0x2e4   :  { %268 = vst.msk [vmem:[%s424_s4 + $0x4] sm:$0xf] %vm266_vm4, %v295_v7 }

// kernel: parallel_model.11
= control target key start
LH: loop header
LB: loop body
LE: loop exit
PB: predicated region body
PF: predicated region fallthrough
CT: control target
= control target key end

     0   :  { %v187_v0 = vmov 0   ;;  %v188_v10 = vmov 1   ;;  %vm80_vm0 = vcmask 785408   ;;  %vm92_vm1 = vcmask 783360   ;;  %s268_s3 = inlined_call_operand.vmem [shape: f32[54,1], index: 3, kind: input, shape index: {}]   ;;  %s269_s1 = inlined_call_operand.vmem [shape: f32[16,2], index: 1, kind: input, shape index: {}]   ;;  %s270_s2 = inlined_call_operand.vmem [shape: bf16[54,96], index: 2, kind: input, shape index: {}]   ;;  %s271_s0 = inlined_call_operand.vmem [shape: bf16[16,96], index: 0, kind: input, shape index: {}]   ;;  %s272_s4 = inlined_call_operand.vmem [shape: bf16[16,96], index: 4, kind: output, shape index: {}]  }
   0x1   :  { %180 = vset.pattern.permute.xlu1 %v187_v0  ;;  %179 = vset.pattern.permute.xlu0 %v187_v0  ;;  %v33_v1 = vld [vmem:[%s268_s3 + $0x10] sm:$0xff]  ;;  %v31_v2 = vld [vmem:[%s268_s3] sm:$0xff]  ;;  %v34_v3 = vld [vmem:[%s268_s3 + $0x18] sm:$0xff]  ;;  %v107_v57 = vlaneseq  ;;  %vm148_vm3 = vcmask 781312  }
   0x2   :  { %50 = vperm.xlu1 %180, %v33_v1   ;;  %40 = vperm.xlu0 %179, %v31_v2   ;;  %v32_v4 = vld [vmem:[%s268_s3 + $0x8] sm:$0xff]  ;;  %v35_v6 = vld [vmem:[%s268_s3 + $0x20] sm:$0xff]  ;;  %v37_v7 = vld [vmem:[%s268_s3 + $0x30] sm:$0x3f] }
   0x3   :  { %v36_v5 = vld [vmem:[%s268_s3 + $0x28] sm:$0xff]  ;;  %v109_v8 = vld [vmem:[%s269_s1] sm:$0xff]  ;;  %v176_v18 = vld [vmem:[%s270_s2 + $0x10] sm:$0xff]   ;;  %v108_v62 = vand.u32 127, %v107_v57 }
   0x4   :  { %v110_v9 = vld [vmem:[%s269_s1 + $0x8] sm:$0xff]  ;;  %v160_v11 = vld [vmem:[%s270_s2] sm:$0xff]   ;;  %v169_v25 = vunpack.c.l.bf16 %v176_v18  ;;  %v23_v26 = vld [vmem:[%s270_s2 + $0x18] sm:$0x7]  ;;  %v170_v30 = vunpack.c.h.bf16 %v176_v18 }
   0x5   :  { %v175_v12 = vld [vmem:[%s270_s2 + $0x8] sm:$0xff]   ;;  %v161_v13 = vunpack.c.l.bf16 %v160_v11  ;;  %v162_v17 = vunpack.c.h.bf16 %v160_v11  ;;  %v30_v36 = vunpack.c.l.bf16 %v23_v26  ;;  %v172_v63 = vld [vmem:[%s271_s0] sm:$0xff]   ;;  %vm129_vm2 = vcmp.ge.s32.totalorder %v108_v62, 48 }
   0x6   :  { %55 = vperm.xlu1 %180, %v34_v3   ;;  %45 = vperm.xlu0 %179, %v32_v4   ;;  %v165_v16 = vunpack.c.l.bf16 %v175_v12  ;;  %v166_v20 = vunpack.c.h.bf16 %v175_v12  ;;  %v173_v2 = vunpack.c.l.bf16 %v172_v63  ;;  %v174_v3 = vunpack.c.h.bf16 %v172_v63 }
   0xa   :  { %65 = vperm.xlu1 %180, %v36_v5   ;;  %60 = vperm.xlu0 %179, %v35_v6  }
   0xe   :  { %70 = vperm.xlu0 %179, %v37_v7   ;;  %113 = vperm.xlu1 %180, %v109_v8  }
  0x12   :  { %118 = vperm.xlu0 %179, %v110_v9   ;;  %181 = vset.pattern.permute.xlu1 %v188_v10 }
  0x13   :  { %122 = vperm.xlu1 %181, %v109_v8  }
  0x16   :  { %182 = vset.pattern.permute.xlu0 %v188_v10 }
  0x17   :  { %126 = vperm.xlu0 %182, %v110_v9  }
  0x81   :  { %v51_v14 = vpop.permute.xlu1 %50  ;;  %v41_v15 = vpop.permute.xlu0 %40 }
  0x82   :  { %v73_v19 = vmul.f32 %v161_v13, %v41_v15  ;;  %v75_v23 = vmul.f32 %v165_v16, %v51_v14 }
  0x84   :  { %v81_v27 = vsel %vm80_vm0, %v73_v19, 0.0  ;;  %v84_v34 = vsel %vm80_vm0, %v75_v23, 0.0 }
  0x85   :  { %v56_v21 = vpop.permute.xlu1 %55  ;;  %v46_v22 = vpop.permute.xlu0 %45 }
  0x86   :  { %v74_v24 = vmul.f32 %v162_v17, %v46_v22  ;;  %v76_v28 = vmul.f32 %v166_v20, %v56_v21 }
  0x88   :  { %v82_v29 = vsel %vm80_vm0, %v74_v24, 0.0  ;;  %v86_v38 = vsel %vm80_vm0, %v76_v28, 0.0 }
  0x89   :  { %v83_v31 = vadd.f32 %v82_v29, %v81_v27  ;;  %v66_v32 = vpop.permute.xlu1 %65  ;;  %v61_v33 = vpop.permute.xlu0 %60 }
  0x8a   :  { %v77_v35 = vmul.f32 %v169_v25, %v61_v33  ;;  %v78_v39 = vmul.f32 %v170_v30, %v66_v32 }
  0x8b   :  { %v85_v37 = vadd.f32 %v84_v34, %v83_v31 }
  0x8c   :  { %v88_v42 = vsel %vm80_vm0, %v77_v35, 0.0  ;;  %v90_v45 = vsel %vm80_vm0, %v78_v39, 0.0 }
  0x8d   :  { %v87_v40 = vadd.f32 %v86_v38, %v85_v37  ;;  %v71_v41 = vpop.permute.xlu0 %70  ;;  %v114_v59 = vpop.permute.xlu1 %113 }
  0x8e   :  { %v79_v43 = vmul.f32 %v71_v41, %v30_v36 }
  0x8f   :  { %v89_v44 = vadd.f32 %v88_v42, %v87_v40 }
  0x90   :  { %v93_v47 = vsel %vm92_vm1, %v79_v43, 0.0 }
  0x91   :  { %v91_v46 = vadd.f32 %v90_v45, %v89_v44  ;;  %v119_v60 = vpop.permute.xlu0 %118 }
  0x92   :  { %v123_v0 = vpop.permute.xlu1 %122 }
  0x93   :  { %v94_v48 = vadd.f32 %v93_v47, %v91_v46  ;;  %v130_v4 = vsel %vm129_vm2, %v123_v0, %v114_v59 }
  0x94   :  { %v136_v6 = vmul.f32 %v173_v2, %v130_v4 }
  0x95   :  { %v95_v49 = vrot.slane %v94_v48, 4 }
  0x96   :  { %v127_v1 = vpop.permute.xlu0 %126 }
  0x97   :  { %v96_v50 = vadd.f32 %v95_v49, %v94_v48  ;;  %v131_v5 = vsel %vm129_vm2, %v127_v1, %v119_v60 }
  0x98   :  { %v137_v7 = vmul.f32 %v174_v3, %v131_v5 }
  0x99   :  { %v97_v51 = vrot.slane %v96_v50, 2 }
  0x9b   :  { %v98_v52 = vadd.f32 %v97_v51, %v96_v50 }
  0x9d   :  { %v99_v53 = vrot.slane %v98_v52, 1 }
  0x9f   :  { %v100_v54 = vadd.f32 %v99_v53, %v98_v52 }
  0xa1   :  { %v101_v55 = vsub.f32 0.0, %v100_v54 }
  0xa3   :  { %v102_v56 = vmul.f32 1.442695, %v101_v55 }
  0xa5   :  { %183 = vpow2.f32 %v102_v56 }
  0xaf   :  { %v184_v58 = vpop.eup %183 }
  0xb0   :  { %v104_v61 = vadd.f32 1.0, %v184_v58 }
  0xb2   :  { %185 = vrcp.f32 %v104_v61 }
  0xbc   :  { %v186_v8 = vpop.eup %185 }
  0xbd   :  { %v138_v9 = vmul.f32 %v186_v8, %v136_v6  ;;  %v139_v10 = vmul.f32 %v186_v8, %v137_v7 }
  0xbf   :  { %v157_v11 = vpack.c.bf16 %v138_v9, %v138_v9  ;;  %v158_v12 = vpack.c.bf16 %v139_v10, %v139_v10 }
  0xc1   :  { %149 = vst.msk [vmem:[%s272_s4] sm:$0xf] %vm148_vm3, %v157_v11  ;;  %150 = vst.msk [vmem:[%s272_s4 + $0x4] sm:$0xf] %vm148_vm3, %v158_v12 }

// kernel: reverse
= control target key start
LH: loop header
LB: loop body
LE: loop exit
PB: predicated region body
PF: predicated region fallthrough
CT: control target
= control target key end

     0   :  { %v377_v3 = vmov 0.0   ;;  %s766_s0 = inlined_call_operand.vmem [shape: f32[16,16,3,3,3], index: 0, kind: input, shape index: {}]   ;;  %s767_s1 = inlined_call_operand.vmem [shape: bf16[16,16,3,3,3], index: 1, kind: output, shape index: {}]  }
   0x1   :  { %v270_v0 = vld [vmem:[%s766_s0 + $0x1a0] sm:$0xff]  ;;  %v271_v1 = vld [vmem:[%s766_s0 + $0x110] sm:$0xff]  ;;  %v322_v55 = vld [vmem:[%s766_s0 + $0x1a8] sm:$0xff] }
   0x2   :  { %v273_v2 = vld [vmem:[%s766_s0 + $0x80] sm:$0xff]  ;;  %v4_v4 = vpack.c.bf16 %v377_v3, %v270_v0  ;;  %v9_v5 = vpack.c.bf16 %v377_v3, %v271_v1  ;;  %v275_v7 = vld [vmem:[%s766_s0 + $0x170] sm:$0xff]  ;;  %v324_v56 = vld [vmem:[%s766_s0 + $0x118] sm:$0xff]  ;;  %v138_v58 = vpack.c.bf16 %v377_v3, %v322_v55 }
   0x3   :  { %v14_v6 = vpack.c.bf16 %v377_v3, %v273_v2  ;;  %v277_v8 = vld [vmem:[%s766_s0 + $0xe0] sm:$0xff]  ;;  %v279_v9 = vld [vmem:[%s766_s0 + $0x50] sm:$0xff]  ;;  %v19_v10 = vpack.c.bf16 %v377_v3, %v275_v7  ;;  %v326_v57 = vld [vmem:[%s766_s0 + $0x88] sm:$0xff]  ;;  %v143_v59 = vpack.c.bf16 %v377_v3, %v324_v56 }
   0x4   :  { %v24_v11 = vpack.c.bf16 %v377_v3, %v277_v8  ;;  %v29_v12 = vpack.c.bf16 %v377_v3, %v279_v9  ;;  %v281_v13 = vld [vmem:[%s766_s0 + $0x140] sm:$0xff]  ;;  %v283_v14 = vld [vmem:[%s766_s0 + $0xb0] sm:$0xff]  ;;  %5 = vst [vmem:[%s767_s1] sm:$0xf] %v4_v4  ;;  %272 = vst [vmem:[%s767_s1 + $0x48] sm:$0xf] %v9_v5  ;;  %v148_v60 = vpack.c.bf16 %v377_v3, %v326_v57 }
   0x5   :  { %v285_v15 = vld [vmem:[%s766_s0 + $0x20] sm:$0xff]  ;;  %274 = vst [vmem:[%s767_s1 + $0x90] sm:$0xf] %v14_v6  ;;  %v34_v16 = vpack.c.bf16 %v377_v3, %v281_v13  ;;  %v39_v17 = vpack.c.bf16 %v377_v3, %v283_v14  ;;  %v287_v19 = vld [vmem:[%s766_s0 + $0x190] sm:$0xff]  ;;  %276 = vst [vmem:[%s767_s1 + $0x18] sm:$0xf] %v19_v10 }
   0x6   :  { %v44_v18 = vpack.c.bf16 %v377_v3, %v285_v15  ;;  %v289_v20 = vld [vmem:[%s766_s0 + $0x100] sm:$0xff]  ;;  %v291_v21 = vld [vmem:[%s766_s0 + $0x70] sm:$0xff]  ;;  %278 = vst [vmem:[%s767_s1 + $0x60] sm:$0xf] %v24_v11  ;;  %280 = vst [vmem:[%s767_s1 + $0xa8] sm:$0xf] %v29_v12  ;;  %v49_v22 = vpack.c.bf16 %v377_v3, %v287_v19 }
   0x7   :  { %v54_v23 = vpack.c.bf16 %v377_v3, %v289_v20  ;;  %v59_v24 = vpack.c.bf16 %v377_v3, %v291_v21  ;;  %v293_v25 = vld [vmem:[%s766_s0 + $0x160] sm:$0xff]  ;;  %v295_v26 = vld [vmem:[%s766_s0 + $0xd0] sm:$0xff]  ;;  %282 = vst [vmem:[%s767_s1 + $0x30] sm:$0xf] %v34_v16  ;;  %284 = vst [vmem:[%s767_s1 + $0x78] sm:$0xf] %v39_v17 }
   0x8   :  { %v297_v27 = vld [vmem:[%s766_s0 + $0x40] sm:$0xff]  ;;  %286 = vst [vmem:[%s767_s1 + $0xc0] sm:$0xf] %v44_v18  ;;  %v64_v28 = vpack.c.bf16 %v377_v3, %v293_v25  ;;  %v69_v29 = vpack.c.bf16 %v377_v3, %v295_v26  ;;  %v299_v31 = vld [vmem:[%s766_s0 + $0x130] sm:$0xff]  ;;  %288 = vst [vmem:[%s767_s1 + $0x8] sm:$0xf] %v49_v22 }
   0x9   :  { %v74_v30 = vpack.c.bf16 %v377_v3, %v297_v27  ;;  %v301_v32 = vld [vmem:[%s766_s0 + $0xa0] sm:$0xff]  ;;  %v303_v33 = vld [vmem:[%s766_s0 + $0x10] sm:$0xff]  ;;  %290 = vst [vmem:[%s767_s1 + $0x50] sm:$0xf] %v54_v23  ;;  %292 = vst [vmem:[%s767_s1 + $0x98] sm:$0xf] %v59_v24  ;;  %v79_v34 = vpack.c.bf16 %v377_v3, %v299_v31 }
   0xa   :  { %v84_v35 = vpack.c.bf16 %v377_v3, %v301_v32  ;;  %v89_v36 = vpack.c.bf16 %v377_v3, %v303_v33  ;;  %v305_v37 = vld [vmem:[%s766_s0 + $0x180] sm:$0xff]  ;;  %v307_v38 = vld [vmem:[%s766_s0 + $0xf0] sm:$0xff]  ;;  %294 = vst [vmem:[%s767_s1 + $0x20] sm:$0xf] %v64_v28  ;;  %296 = vst [vmem:[%s767_s1 + $0x68] sm:$0xf] %v69_v29 }
   0xb   :  { %v309_v39 = vld [vmem:[%s766_s0 + $0x60] sm:$0xff]  ;;  %298 = vst [vmem:[%s767_s1 + $0xb0] sm:$0xf] %v74_v30  ;;  %v94_v40 = vpack.c.bf16 %v377_v3, %v305_v37  ;;  %v99_v41 = vpack.c.bf16 %v377_v3, %v307_v38  ;;  %v311_v43 = vld [vmem:[%s766_s0 + $0x150] sm:$0xff]  ;;  %300 = vst [vmem:[%s767_s1 + $0x38] sm:$0xf] %v79_v34 }
   0xc   :  { %v104_v42 = vpack.c.bf16 %v377_v3, %v309_v39  ;;  %v313_v44 = vld [vmem:[%s766_s0 + $0xc0] sm:$0xff]  ;;  %v315_v45 = vld [vmem:[%s766_s0 + $0x30] sm:$0xff]  ;;  %302 = vst [vmem:[%s767_s1 + $0x80] sm:$0xf] %v84_v35  ;;  %304 = vst [vmem:[%s767_s1 + $0xc8] sm:$0xf] %v89_v36  ;;  %v109_v46 = vpack.c.bf16 %v377_v3, %v311_v43 }
   0xd   :  { %v114_v47 = vpack.c.bf16 %v377_v3, %v313_v44  ;;  %v119_v48 = vpack.c.bf16 %v377_v3, %v315_v45  ;;  %v317_v49 = vld [vmem:[%s766_s0 + $0x120] sm:$0xff]  ;;  %v319_v50 = vld [vmem:[%s766_s0 + $0x90] sm:$0xff]  ;;  %306 = vst [vmem:[%s767_s1 + $0x10] sm:$0xf] %v94_v40  ;;  %308 = vst [vmem:[%s767_s1 + $0x58] sm:$0xf] %v99_v41 }
   0xe   :  { %v131_v51 = vld [vmem:[%s766_s0] sm:$0xff]  ;;  %310 = vst [vmem:[%s767_s1 + $0xa0] sm:$0xf] %v104_v42  ;;  %v124_v52 = vpack.c.bf16 %v377_v3, %v317_v49  ;;  %v129_v53 = vpack.c.bf16 %v377_v3, %v319_v50  ;;  %312 = vst [vmem:[%s767_s1 + $0x28] sm:$0xf] %v109_v46  ;;  %v328_v61 = vld [vmem:[%s766_s0 + $0x178] sm:$0xff] }
   0xf   :  { %v133_v54 = vpack.c.bf16 %v377_v3, %v131_v51  ;;  %314 = vst [vmem:[%s767_s1 + $0x70] sm:$0xf] %v114_v47  ;;  %316 = vst [vmem:[%s767_s1 + $0xb8] sm:$0xf] %v119_v48  ;;  %v330_v62 = vld [vmem:[%s766_s0 + $0xe8] sm:$0xff]  ;;  %v332_v63 = vld [vmem:[%s766_s0 + $0x58] sm:$0xff]  ;;  %v153_v0 = vpack.c.bf16 %v377_v3, %v328_v61 }
  0x10   :  { %318 = vst [vmem:[%s767_s1 + $0x40] sm:$0xf] %v124_v52  ;;  %320 = vst [vmem:[%s767_s1 + $0x88] sm:$0xf] %v129_v53  ;;  %v158_v1 = vpack.c.bf16 %v377_v3, %v330_v62  ;;  %v163_v2 = vpack.c.bf16 %v377_v3, %v332_v63  ;;  %v334_v4 = vld [vmem:[%s766_s0 + $0x148] sm:$0xff]  ;;  %v336_v5 = vld [vmem:[%s766_s0 + $0xb8] sm:$0xff] }
  0x11   :  { %321 = vst [vmem:[%s767_s1 + $0xd0] sm:$0xf] %v133_v54  ;;  %v338_v6 = vld [vmem:[%s766_s0 + $0x28] sm:$0xff]  ;;  %323 = vst [vmem:[%s767_s1 + $0x4] sm:$0xf] %v138_v58  ;;  %v168_v7 = vpack.c.bf16 %v377_v3, %v334_v4  ;;  %v173_v8 = vpack.c.bf16 %v377_v3, %v336_v5  ;;  %v340_v10 = vld [vmem:[%s766_s0 + $0x198] sm:$0xff] }
  0x12   :  { %325 = vst [vmem:[%s767_s1 + $0x4c] sm:$0xf] %v143_v59  ;;  %327 = vst [vmem:[%s767_s1 + $0x94] sm:$0xf] %v148_v60  ;;  %v178_v9 = vpack.c.bf16 %v377_v3, %v338_v6  ;;  %v342_v11 = vld [vmem:[%s766_s0 + $0x108] sm:$0xff]  ;;  %v344_v12 = vld [vmem:[%s766_s0 + $0x78] sm:$0xff]  ;;  %v183_v13 = vpack.c.bf16 %v377_v3, %v340_v10 }
  0x13   :  { %329 = vst [vmem:[%s767_s1 + $0x1c] sm:$0xf] %v153_v0  ;;  %331 = vst [vmem:[%s767_s1 + $0x64] sm:$0xf] %v158_v1  ;;  %v188_v14 = vpack.c.bf16 %v377_v3, %v342_v11  ;;  %v193_v15 = vpack.c.bf16 %v377_v3, %v344_v12  ;;  %v346_v16 = vld [vmem:[%s766_s0 + $0x168] sm:$0xff]  ;;  %v348_v17 = vld [vmem:[%s766_s0 + $0xd8] sm:$0xff] }
  0x14   :  { %333 = vst [vmem:[%s767_s1 + $0xac] sm:$0xf] %v163_v2  ;;  %v350_v18 = vld [vmem:[%s766_s0 + $0x48] sm:$0xff]  ;;  %335 = vst [vmem:[%s767_s1 + $0x34] sm:$0xf] %v168_v7  ;;  %v198_v19 = vpack.c.bf16 %v377_v3, %v346_v16  ;;  %v203_v20 = vpack.c.bf16 %v377_v3, %v348_v17  ;;  %v352_v22 = vld [vmem:[%s766_s0 + $0x138] sm:$0xff] }
  0x15   :  { %337 = vst [vmem:[%s767_s1 + $0x7c] sm:$0xf] %v173_v8  ;;  %339 = vst [vmem:[%s767_s1 + $0xc4] sm:$0xf] %v178_v9  ;;  %v208_v21 = vpack.c.bf16 %v377_v3, %v350_v18  ;;  %v354_v23 = vld [vmem:[%s766_s0 + $0xa8] sm:$0xff]  ;;  %v356_v24 = vld [vmem:[%s766_s0 + $0x18] sm:$0xff]  ;;  %v213_v25 = vpack.c.bf16 %v377_v3, %v352_v22 }
  0x16   :  { %341 = vst [vmem:[%s767_s1 + $0xc] sm:$0xf] %v183_v13  ;;  %343 = vst [vmem:[%s767_s1 + $0x54] sm:$0xf] %v188_v14  ;;  %v218_v26 = vpack.c.bf16 %v377_v3, %v354_v23  ;;  %v223_v27 = vpack.c.bf16 %v377_v3, %v356_v24  ;;  %v358_v28 = vld [vmem:[%s766_s0 + $0x188] sm:$0xff]  ;;  %v360_v29 = vld [vmem:[%s766_s0 + $0xf8] sm:$0xff] }
  0x17   :  { %345 = vst [vmem:[%s767_s1 + $0x9c] sm:$0xf] %v193_v15  ;;  %v362_v30 = vld [vmem:[%s766_s0 + $0x68] sm:$0xff]  ;;  %347 = vst [vmem:[%s767_s1 + $0x24] sm:$0xf] %v198_v19  ;;  %v228_v31 = vpack.c.bf16 %v377_v3, %v358_v28  ;;  %v233_v32 = vpack.c.bf16 %v377_v3, %v360_v29  ;;  %v364_v34 = vld [vmem:[%s766_s0 + $0x158] sm:$0xff] }
  0x18   :  { %349 = vst [vmem:[%s767_s1 + $0x6c] sm:$0xf] %v203_v20  ;;  %351 = vst [vmem:[%s767_s1 + $0xb4] sm:$0xf] %v208_v21  ;;  %v238_v33 = vpack.c.bf16 %v377_v3, %v362_v30  ;;  %v366_v35 = vld [vmem:[%s766_s0 + $0xc8] sm:$0xff]  ;;  %v368_v36 = vld [vmem:[%s766_s0 + $0x38] sm:$0xff]  ;;  %v243_v37 = vpack.c.bf16 %v377_v3, %v364_v34 }
  0x19   :  { %353 = vst [vmem:[%s767_s1 + $0x3c] sm:$0xf] %v213_v25  ;;  %355 = vst [vmem:[%s767_s1 + $0x84] sm:$0xf] %v218_v26  ;;  %v248_v38 = vpack.c.bf16 %v377_v3, %v366_v35  ;;  %v253_v39 = vpack.c.bf16 %v377_v3, %v368_v36  ;;  %v370_v40 = vld [vmem:[%s766_s0 + $0x128] sm:$0xff]  ;;  %v372_v41 = vld [vmem:[%s766_s0 + $0x98] sm:$0xff] }
  0x1a   :  { %357 = vst [vmem:[%s767_s1 + $0xcc] sm:$0xf] %v223_v27  ;;  %v374_v42 = vld [vmem:[%s766_s0 + $0x8] sm:$0xff]  ;;  %359 = vst [vmem:[%s767_s1 + $0x14] sm:$0xf] %v228_v31  ;;  %v258_v43 = vpack.c.bf16 %v377_v3, %v370_v40  ;;  %v263_v44 = vpack.c.bf16 %v377_v3, %v372_v41 }
  0x1b   :  { %361 = vst [vmem:[%s767_s1 + $0x5c] sm:$0xf] %v233_v32  ;;  %363 = vst [vmem:[%s767_s1 + $0xa4] sm:$0xf] %v238_v33  ;;  %v268_v3 = vpack.c.bf16 %v377_v3, %v374_v42 }
  0x1c   :  { %365 = vst [vmem:[%s767_s1 + $0x2c] sm:$0xf] %v243_v37  ;;  %367 = vst [vmem:[%s767_s1 + $0x74] sm:$0xf] %v248_v38 }
  0x1d   :  { %369 = vst [vmem:[%s767_s1 + $0xbc] sm:$0xf] %v253_v39  ;;  %371 = vst [vmem:[%s767_s1 + $0x44] sm:$0xf] %v258_v43 }
  0x1e   :  { %373 = vst [vmem:[%s767_s1 + $0x8c] sm:$0xf] %v263_v44  ;;  %375 = vst [vmem:[%s767_s1 + $0xd4] sm:$0xf] %v268_v3 }

</bundles_post_ra>
